<compile_context>
chip_gen: v6e
topology: v6e:2x2x1
jax: 0.10.0
libtpu: 0.0.40
codegen_flags: <defaults>
</compile_context>

<pallas_src>
import functools

import jax
import jax.numpy as jnp
from jax.experimental import pallas as pl
from jax.experimental.pallas import tpu as pltpu

# -------- hyper-parameters (small, lane-dense, consistent with the module) ----
B = 2             # batch
EMB_DIM = 128     # emb_dim   (512 in the module; 128 keeps everything lane-dense)
NUM_HEADS = 4     # num_heads
N_GROUPS = 8      # n_groups  (40 in the module)
N_SAMPLE = 4      # n_sample  (20 in the module)
N_POINTS = 128    # N_raw     (2048 in the module)
TEXT_LEN = 8      # text sequence length
TEXT_HID = 64     # text hidden size (768 in the module)
FFN_DIM = 256     # decoder FFN hidden size
N_QUERY = N_SAMPLE + N_GROUPS

F32 = jnp.float32
BF16 = jnp.bfloat16


# ------------------------------ fused mega-kernel -----------------------------
def _pointsam_kernel(
    # per-batch data
    xyz_ref, txt_ref, mrow_ref, mcol_ref,
    # point-encoder surrogate (column layout)
    pe_w1t_ref, pe_b1_ref, pe_w2t_ref, pe_b2_ref,
    # text_resizer (Linear + LayerNorm eps=1e-12) + view-query projection
    tr_w_ref, tr_b_ref, tr_g_ref, tr_bn_ref, vs_w_ref, vs_b_ref,
    # learned query positions (pos3d)
    pos_ref,
    # decoder self-attn (fused Q|K), V, out
    sa_wqk_ref, sa_bqk_ref, sa_wv_ref, sa_bv_ref, sa_wo_ref, sa_bo_ref,
    # decoder cross-attn Q, fused K|V (pre-transposed [2C,C]), out
    ca_wq_ref, ca_bq_ref, ca_wkvt_ref, ca_bkv_ref, ca_wo_ref, ca_bo_ref,
    # FFN
    ffn_w1_ref, ffn_b1_ref, ffn_w2_ref, ffn_b2_ref,
    # LayerNorm params, rows = [norm1, norm2, norm3, decoder-final-norm]
    ng_ref, nb_ref,
    # output
    o_ref,
    # scratch
    tgt_scr, hcat_scr,
    *, num_heads, n_sample, n_groups):
  """One batch element: point MLP + text/view queries + 1-layer decoder
  (post-norm) + final norm + masked affordance head + sigmoid."""
  C = EMB_DIM
  dh = C // num_heads
  scale = 1.0 / float(dh) ** 0.5

  # ---- point-encoder surrogate, memory kept in [C, N] (the module's native
  #      point_feature [B, C, N] orientation).  First layer = 3 dual-broadcast
  #      VPU FMAs in f32; second layer = bf16 MXU matmul with pre-transposed W2.
  xyz_b = xyz_ref[0]                                              # [3, N] f32
  h1 = (pe_w1t_ref[:, 0:1] * xyz_b[0:1, :]
        + pe_w1t_ref[:, 1:2] * xyz_b[1:2, :]
        + pe_w1t_ref[:, 2:3] * xyz_b[2:3, :]
        + pe_b1_ref[...])                                         # [C, N]
  h1 = jnp.maximum(h1, 0.0)
  pf = jnp.dot(pe_w2t_ref[...], h1.astype(BF16),
               preferred_element_type=F32) + pe_b2_ref[...]       # [C, N] f32
  mem_bf = pf.astype(BF16)   # single bf16 copy, reused by 3 MXU consumers

  # ---- one-pass LayerNorm helper (E[x^2] - E[x]^2) --------------------------
  def ln_stats(x, g, b, eps):
    m = jnp.mean(x, axis=-1, keepdims=True)
    m2 = jnp.mean(x * x, axis=-1, keepdims=True)
    var = jnp.maximum(m2 - m * m, 0.0)
    return (x - m) * jax.lax.rsqrt(var + eps) * g + b

  def ln(x, idx):
    return ln_stats(x, ng_ref[idx], nb_ref[idx], 1e-5)

  def bdot(x, w_ref, b_ref):   # bf16 MXU matmul, f32 accumulate
    return jnp.dot(x.astype(BF16), w_ref[...],
                   preferred_element_type=F32) + b_ref[...]

  def softmax_rows(s):         # f32 stats; approx reciprocal only here
    s = s - jnp.max(s, axis=-1, keepdims=True)
    p = jnp.exp(s)
    return p * pl.reciprocal(jnp.sum(p, axis=-1, keepdims=True), approx=True)

  def out_proj(wo_ref, bo_ref):  # single K=128 output projection from scratch
    return jnp.dot(hcat_scr[...].astype(BF16), wo_ref[...],
                   preferred_element_type=F32) + bo_ref[...]

  # ---- text_resizer + LN(eps=1e-12) + view-query projection surrogate -------
  t = jnp.dot(txt_ref[0].astype(BF16), tr_w_ref[...],
              preferred_element_type=F32) + tr_b_ref[...]         # [Lt, C]
  t = ln_stats(t, tr_g_ref[...], tr_bn_ref[...], 1e-12)
  vq = jnp.dot(t[:n_sample].astype(BF16), vs_w_ref[...],
               preferred_element_type=F32) + vs_b_ref[...]        # [n_sample, C]

  # ---- group queries = first n_groups point features, pulled out of the
  #      column-layout memory with a one-hot selector matmul (no transpose) ----
  rr = jax.lax.broadcasted_iota(jnp.int32, (n_groups, pf.shape[1]), 0)
  cc = jax.lax.broadcasted_iota(jnp.int32, (n_groups, pf.shape[1]), 1)
  sel = jnp.where(rr == cc, 1.0, 0.0).astype(BF16)                # [n_groups, N]
  gq = jax.lax.dot_general(sel, mem_bf, (((1,), (1,)), ((), ())),
                           preferred_element_type=F32)            # [n_groups, C]

  # ---- assemble tgt = concat([view queries, group queries]) in VMEM ---------
  tgt_scr[0:n_sample, :] = vq
  tgt_scr[n_sample:, :] = gq
  tgt = tgt_scr[...]                                              # [L, C] f32

  pos = pos_ref[0]                                                # [L, C]
  mrow = mrow_ref[0]                                              # [1, L] 1=valid
  key_bias = (mrow - 1.0) * 1e9                                   # 0 / -1e9

  # ---- self-attention: q = k = tgt + pos, v = tgt; query-padding key bias ----
  qk = bdot(tgt + pos, sa_wqk_ref, sa_bqk_ref)                    # [L, 2C]
  v_sa = bdot(tgt, sa_wv_ref, sa_bv_ref)                          # [L, C]
  q_sa = qk[:, :C]
  k_sa = qk[:, C:]
  for hh in range(num_heads):
    sl = slice(hh * dh, (hh + 1) * dh)
    s = jax.lax.dot_general(q_sa[:, sl].astype(BF16), k_sa[:, sl].astype(BF16),
                            (((1,), (1,)), ((), ())),
                            preferred_element_type=F32) * scale + key_bias
    p = softmax_rows(s)
    hcat_scr[:, sl] = jnp.dot(p.astype(BF16), v_sa[:, sl].astype(BF16),
                              preferred_element_type=F32)         # [L, dh]
  tgt = ln(tgt + out_proj(sa_wo_ref, sa_bo_ref), 0)

  # ---- cross-attention over the [C, N] point memory (all keys valid) --------
  # K|V projection is a standard matmul (weights pre-transposed to [2C, C]);
  # per-head K/V slices below are tile-aligned sublane slices (free).
  q_ca = bdot(tgt + pos, ca_wq_ref, ca_bq_ref)                    # [L, C]
  kv = jnp.dot(ca_wkvt_ref[...], mem_bf,
               preferred_element_type=F32) + ca_bkv_ref[...]      # [2C, N] f32
  kv_bf = kv.astype(BF16)
  for hh in range(num_heads):
    sl = slice(hh * dh, (hh + 1) * dh)
    k_h = kv_bf[hh * dh:(hh + 1) * dh, :]                         # [dh, N]
    v_h = kv_bf[C + hh * dh:C + (hh + 1) * dh, :]                 # [dh, N]
    s = jnp.dot(q_ca[:, sl].astype(BF16), k_h,
                preferred_element_type=F32) * scale               # [L, N]
    p = softmax_rows(s)
    hcat_scr[:, sl] = jax.lax.dot_general(p.astype(BF16), v_h,
                                          (((1,), (1,)), ((), ())),
                                          preferred_element_type=F32)
  tgt = ln(tgt + out_proj(ca_wo_ref, ca_bo_ref), 1)

  # ---- feed-forward + final decoder norm -------------------------------------
  hid = jnp.maximum(bdot(tgt, ffn_w1_ref, ffn_b1_ref), 0.0)
  tgt = ln(tgt + bdot(hid, ffn_w2_ref, ffn_b2_ref), 2)
  tgt = ln(tgt, 3)

  # ---- affordance head: mask padded queries, f32 VPU average over valid
  #      queries (exact division), one [1,C]x[C,N] mat-vec, sigmoid ------------
  mcol = mcol_ref[0]                                              # [L, 1] 1=valid
  qsum = jnp.sum(tgt * mcol, axis=0, keepdims=True)               # [1, C] f32
  denom = jnp.maximum(jnp.sum(mrow), 1.0)                         # NaN guard
  row = qsum / denom                                              # exact division
  aff = jnp.dot(row.astype(BF16), mem_bf,
                preferred_element_type=F32)                       # [1, N]
  o_ref[0] = jax.nn.sigmoid(aff)


# ------------------------------ wrapper ---------------------------------------
def pointsam_forward(params, text, xyz, view_mask):
  """text: [B, Lt, TEXT_HID], xyz: [B, 3, N], view_mask: [B, n_sample] -> [B, N]."""
  Bq = xyz.shape[0]
  N = xyz.shape[2]
  L = N_QUERY
  C = EMB_DIM

  # full query-padding mask (1 = valid); both layouts needed in-kernel
  qmask = jnp.concatenate(
      [view_mask.astype(F32), jnp.ones((Bq, N_GROUPS), F32)], axis=1)  # [B, L]
  mrow = qmask.reshape(Bq, 1, L)
  mcol = qmask.reshape(Bq, L, 1)

  weight_names = [
      "pe_w1t", "pe_b1", "pe_w2t", "pe_b2",
      "tr_w", "tr_b", "tr_g", "tr_bn",
      "vs_w", "vs_b",
      "pos3d",
      "sa_wqk", "sa_bqk", "sa_wv", "sa_bv", "sa_wo", "sa_bo",
      "ca_wq", "ca_bq", "ca_wkvt", "ca_bkv", "ca_wo", "ca_bo",
      "ffn_w1", "ffn_b1", "ffn_w2", "ffn_b2",
      "norm_g", "norm_b",
  ]
  weights = [params[n] for n in weight_names]

  def wspec(arr):
    nd = arr.ndim
    # TODO(synk): at module scale (C=512, FFN=2048) mark these grid-constant
    # weight specs pipeline_mode=pl.Buffered(1) to halve weight VMEM (v7x).
    return pl.BlockSpec(arr.shape, lambda b, _n=nd: (0,) * _n)

  in_specs = [
      pl.BlockSpec((1, 3, N), lambda b: (b, 0, 0)),                 # xyz
      pl.BlockSpec((1, TEXT_LEN, TEXT_HID), lambda b: (b, 0, 0)),   # text
      pl.BlockSpec((1, 1, L), lambda b: (b, 0, 0)),                 # mask row
      pl.BlockSpec((1, L, 1), lambda b: (b, 0, 0)),                 # mask col
  ] + [wspec(w) for w in weights]

  out = pl.pallas_call(
      functools.partial(_pointsam_kernel, num_heads=NUM_HEADS,
                        n_sample=N_SAMPLE, n_groups=N_GROUPS),
      out_shape=jax.ShapeDtypeStruct((Bq, 1, N), F32),
      grid=(Bq,),
      in_specs=in_specs,
      out_specs=pl.BlockSpec((1, 1, N), lambda b: (b, 0, 0)),
      scratch_shapes=[
          pltpu.VMEM((L, C), F32),   # tgt assembly buffer
          pltpu.VMEM((L, C), F32),   # per-head output concat buffer
      ],
      compiler_params=pltpu.CompilerParams(dimension_semantics=("parallel",)),
      # TODO(synk): at module scale (C=512, N=2048) tile the key/memory axis N
      # (extra "arbitrary" grid axis or inner pl.loop) and set vmem_limit_bytes
      # so the cross-attn K|V intermediate fits v7x's 64 MiB VMEM.
  )(xyz, text, mrow, mcol, *weights)
  return out.reshape(Bq, N)


# ------------------------------ parameter init --------------------------------
def init_params(key):
  C, Ht, Fh = EMB_DIM, TEXT_HID, FFN_DIM
  L = N_QUERY
  ks = iter(jax.random.split(key, 32))

  def w(shape, std=0.02):
    return (std * jax.random.normal(next(ks), shape)).astype(F32)

  def wb(shape, std=0.02):        # bf16 MXU weights
    return w(shape, std).astype(BF16)

  def zeros(shape):
    return jnp.zeros(shape, F32)

  def ones(shape):
    return jnp.ones(shape, F32)

  return dict(
      # point-encoder surrogate MLP; first layer f32 in [C,3]/[C,1] column
      # layout, second layer pre-transposed so pf stays in [C, N]
      pe_w1t=w((C, 3)), pe_b1=zeros((C, 1)),
      pe_w2t=wb((C, C)), pe_b2=zeros((C, 1)),
      # text_resizer (Linear + LayerNorm) + view-query projection
      tr_w=wb((Ht, C)), tr_b=zeros((1, C)),
      tr_g=ones((1, C)), tr_bn=zeros((1, C)),
      vs_w=wb((C, C)), vs_b=zeros((1, C)),
      # learned query positions (pos3d in the module)
      pos3d=(0.2 * jax.random.truncated_normal(
          next(ks), -2.0, 2.0, (1, L, C))).astype(F32),
      # decoder layer: self-attn fused Q|K, V, out
      sa_wqk=wb((C, 2 * C)), sa_bqk=zeros((1, 2 * C)),
      sa_wv=wb((C, C)), sa_bv=zeros((1, C)),
      sa_wo=wb((C, C)), sa_bo=zeros((1, C)),
      # cross-attn Q, fused K|V pre-transposed to [2C, C] (column-layout memory)
      ca_wq=wb((C, C)), ca_bq=zeros((1, C)),
      ca_wkvt=wb((2 * C, C)), ca_bkv=zeros((2 * C, 1)),
      ca_wo=wb((C, C)), ca_bo=zeros((1, C)),
      # FFN
      ffn_w1=wb((C, Fh)), ffn_b1=zeros((1, Fh)),
      ffn_w2=wb((Fh, C)), ffn_b2=zeros((1, C)),
      # layernorm params, rows = [norm1, norm2, norm3, decoder-final-norm]
      norm_g=ones((4, C)), norm_b=zeros((4, C)),
  )


# ----------------------------------- main --------------------------------------
if __name__ == "__main__":
  key = jax.random.PRNGKey(0)
  k_text, k_xyz, k_params = jax.random.split(key, 3)

  # TODO(synk): real text features come from a frozen RoBERTa; PointUni3d and
  # CrossDistanceSampler are not reproducible from the given source — both are
  # replaced in-kernel by small deterministic surrogate projections.
  text = jax.random.normal(k_text, (B, TEXT_LEN, TEXT_HID), F32)
  xyz = jax.random.normal(k_xyz, (B, 3, N_POINTS), F32)      # native [B, 3, N]
  view_mask = jnp.array([[1.0, 1.0, 1.0, 0.0],
                         [1.0, 1.0, 0.0, 0.0]], F32)         # [B, n_sample], 1=valid

  params = init_params(k_params)

  fwd = jax.jit(pointsam_forward)
  out = jax.block_until_ready(fwd(params, text, xyz, view_mask))   # [B, N]
  assert out.shape == (B, N_POINTS)
  assert bool(jnp.all(jnp.isfinite(out)))
  print("KERNEL_OK")
</pallas_src>

<mosaic_0001>
module attributes {stable_mosaic.version = 11 : i64} {
  func.func @_pointsam_kernel(%arg0: i32, %arg1: memref<1x3x128xf32, #tpu.memory_space<vmem>>, %arg2: memref<1x8x64xf32, #tpu.memory_space<vmem>>, %arg3: memref<1x1x12xf32, #tpu.memory_space<vmem>>, %arg4: memref<1x12x1xf32, #tpu.memory_space<vmem>>, %arg5: memref<128x3xf32, #tpu.memory_space<vmem>>, %arg6: memref<128x1xf32, #tpu.memory_space<vmem>>, %arg7: memref<128x128xbf16, #tpu.memory_space<vmem>>, %arg8: memref<128x1xf32, #tpu.memory_space<vmem>>, %arg9: memref<64x128xbf16, #tpu.memory_space<vmem>>, %arg10: memref<1x128xf32, #tpu.memory_space<vmem>>, %arg11: memref<1x128xf32, #tpu.memory_space<vmem>>, %arg12: memref<1x128xf32, #tpu.memory_space<vmem>>, %arg13: memref<128x128xbf16, #tpu.memory_space<vmem>>, %arg14: memref<1x128xf32, #tpu.memory_space<vmem>>, %arg15: memref<1x12x128xf32, #tpu.memory_space<vmem>>, %arg16: memref<128x256xbf16, #tpu.memory_space<vmem>>, %arg17: memref<1x256xf32, #tpu.memory_space<vmem>>, %arg18: memref<128x128xbf16, #tpu.memory_space<vmem>>, %arg19: memref<1x128xf32, #tpu.memory_space<vmem>>, %arg20: memref<128x128xbf16, #tpu.memory_space<vmem>>, %arg21: memref<1x128xf32, #tpu.memory_space<vmem>>, %arg22: memref<128x128xbf16, #tpu.memory_space<vmem>>, %arg23: memref<1x128xf32, #tpu.memory_space<vmem>>, %arg24: memref<256x128xbf16, #tpu.memory_space<vmem>>, %arg25: memref<256x1xf32, #tpu.memory_space<vmem>>, %arg26: memref<128x128xbf16, #tpu.memory_space<vmem>>, %arg27: memref<1x128xf32, #tpu.memory_space<vmem>>, %arg28: memref<128x256xbf16, #tpu.memory_space<vmem>>, %arg29: memref<1x256xf32, #tpu.memory_space<vmem>>, %arg30: memref<256x128xbf16, #tpu.memory_space<vmem>>, %arg31: memref<1x128xf32, #tpu.memory_space<vmem>>, %arg32: memref<4x128xf32, #tpu.memory_space<vmem>>, %arg33: memref<4x128xf32, #tpu.memory_space<vmem>>, %arg34: memref<1x1x128xf32, #tpu.memory_space<vmem>>, %arg35: memref<12x128xf32, #tpu.memory_space<vmem>>, %arg36: memref<12x128xf32, #tpu.memory_space<vmem>>) attributes {dimension_semantics = [#tpu.dimension_semantics<parallel>], iteration_bounds = array<i64: 2>, scalar_prefetch = 0 : i64, scratch_operands = 2 : i64, tpu.core_type = #tpu.core_type<tc>, window_params = [{transform_indices = @transform_0, window_bounds = array<i64: 1, 3, 128>}, {transform_indices = @transform_1, window_bounds = array<i64: 1, 8, 64>}, {transform_indices = @transform_2, window_bounds = array<i64: 1, 1, 12>}, {transform_indices = @transform_3, window_bounds = array<i64: 1, 12, 1>}, {pipeline_mode = #tpu.pipeline_mode<synchronous>, transform_indices = @transform_4, window_bounds = array<i64: 128, 3>}, {pipeline_mode = #tpu.pipeline_mode<synchronous>, transform_indices = @transform_5, window_bounds = array<i64: 128, 1>}, {pipeline_mode = #tpu.pipeline_mode<synchronous>, transform_indices = @transform_6, window_bounds = array<i64: 128, 128>}, {pipeline_mode = #tpu.pipeline_mode<synchronous>, transform_indices = @transform_7, window_bounds = array<i64: 128, 1>}, {pipeline_mode = #tpu.pipeline_mode<synchronous>, transform_indices = @transform_8, window_bounds = array<i64: 64, 128>}, {pipeline_mode = #tpu.pipeline_mode<synchronous>, transform_indices = @transform_9, window_bounds = array<i64: 1, 128>}, {pipeline_mode = #tpu.pipeline_mode<synchronous>, transform_indices = @transform_10, window_bounds = array<i64: 1, 128>}, {pipeline_mode = #tpu.pipeline_mode<synchronous>, transform_indices = @transform_11, window_bounds = array<i64: 1, 128>}, {pipeline_mode = #tpu.pipeline_mode<synchronous>, transform_indices = @transform_12, window_bounds = array<i64: 128, 128>}, {pipeline_mode = #tpu.pipeline_mode<synchronous>, transform_indices = @transform_13, window_bounds = array<i64: 1, 128>}, {pipeline_mode = #tpu.pipeline_mode<synchronous>, transform_indices = @transform_14, window_bounds = array<i64: 1, 12, 128>}, {pipeline_mode = #tpu.pipeline_mode<synchronous>, transform_indices = @transform_15, window_bounds = array<i64: 128, 256>}, {pipeline_mode = #tpu.pipeline_mode<synchronous>, transform_indices = @transform_16, window_bounds = array<i64: 1, 256>}, {pipeline_mode = #tpu.pipeline_mode<synchronous>, transform_indices = @transform_17, window_bounds = array<i64: 128, 128>}, {pipeline_mode = #tpu.pipeline_mode<synchronous>, transform_indices = @transform_18, window_bounds = array<i64: 1, 128>}, {pipeline_mode = #tpu.pipeline_mode<synchronous>, transform_indices = @transform_19, window_bounds = array<i64: 128, 128>}, {pipeline_mode = #tpu.pipeline_mode<synchronous>, transform_indices = @transform_20, window_bounds = array<i64: 1, 128>}, {pipeline_mode = #tpu.pipeline_mode<synchronous>, transform_indices = @transform_21, window_bounds = array<i64: 128, 128>}, {pipeline_mode = #tpu.pipeline_mode<synchronous>, transform_indices = @transform_22, window_bounds = array<i64: 1, 128>}, {pipeline_mode = #tpu.pipeline_mode<synchronous>, transform_indices = @transform_23, window_bounds = array<i64: 256, 128>}, {pipeline_mode = #tpu.pipeline_mode<synchronous>, transform_indices = @transform_24, window_bounds = array<i64: 256, 1>}, {pipeline_mode = #tpu.pipeline_mode<synchronous>, transform_indices = @transform_25, window_bounds = array<i64: 128, 128>}, {pipeline_mode = #tpu.pipeline_mode<synchronous>, transform_indices = @transform_26, window_bounds = array<i64: 1, 128>}, {pipeline_mode = #tpu.pipeline_mode<synchronous>, transform_indices = @transform_27, window_bounds = array<i64: 128, 256>}, {pipeline_mode = #tpu.pipeline_mode<synchronous>, transform_indices = @transform_28, window_bounds = array<i64: 1, 256>}, {pipeline_mode = #tpu.pipeline_mode<synchronous>, transform_indices = @transform_29, window_bounds = array<i64: 256, 128>}, {pipeline_mode = #tpu.pipeline_mode<synchronous>, transform_indices = @transform_30, window_bounds = array<i64: 1, 128>}, {pipeline_mode = #tpu.pipeline_mode<synchronous>, transform_indices = @transform_31, window_bounds = array<i64: 4, 128>}, {pipeline_mode = #tpu.pipeline_mode<synchronous>, transform_indices = @transform_32, window_bounds = array<i64: 4, 128>}, {transform_indices = @transform_33, window_bounds = array<i64: 1, 1, 128>}]} {
    %c0 = arith.constant 0 : index
    %c0_0 = arith.constant 0 : index
    %c0_1 = arith.constant 0 : index
    %0 = vector.load %arg1[%c0, %c0_0, %c0_1] : memref<1x3x128xf32, #tpu.memory_space<vmem>>, vector<1x3x128xf32>
    %1 = vector.shape_cast %0 : vector<1x3x128xf32> to vector<3x128xf32>
    %c0_2 = arith.constant 0 : index
    %c0_3 = arith.constant 0 : index
    %2 = vector.load %arg5[%c0_2, %c0_3] : memref<128x3xf32, #tpu.memory_space<vmem>>, vector<128x1xf32>
    %3 = vector.extract_strided_slice %1 {offsets = [0, 0], sizes = [1, 128], strides = [1, 1]} : vector<3x128xf32> to vector<1x128xf32>
    %4 = vector.broadcast %2 : vector<128x1xf32> to vector<128x128xf32>
    %5 = vector.broadcast %3 : vector<1x128xf32> to vector<128x128xf32>
    %6 = arith.mulf %4, %5 : vector<128x128xf32>
    %c0_4 = arith.constant 0 : index
    %c1 = arith.constant 1 : index
    %7 = vector.load %arg5[%c0_4, %c1] : memref<128x3xf32, #tpu.memory_space<vmem>>, vector<128x1xf32>
    %8 = vector.extract_strided_slice %1 {offsets = [1, 0], sizes = [1, 128], strides = [1, 1]} : vector<3x128xf32> to vector<1x128xf32>
    %9 = vector.broadcast %7 : vector<128x1xf32> to vector<128x128xf32>
    %10 = vector.broadcast %8 : vector<1x128xf32> to vector<128x128xf32>
    %11 = arith.mulf %9, %10 : vector<128x128xf32>
    %12 = arith.addf %6, %11 : vector<128x128xf32>
    %c0_5 = arith.constant 0 : index
    %c2 = arith.constant 2 : index
    %13 = vector.load %arg5[%c0_5, %c2] : memref<128x3xf32, #tpu.memory_space<vmem>>, vector<128x1xf32>
    %14 = vector.extract_strided_slice %1 {offsets = [2, 0], sizes = [1, 128], strides = [1, 1]} : vector<3x128xf32> to vector<1x128xf32>
    %15 = vector.broadcast %13 : vector<128x1xf32> to vector<128x128xf32>
    %16 = vector.broadcast %14 : vector<1x128xf32> to vector<128x128xf32>
    %17 = arith.mulf %15, %16 : vector<128x128xf32>
    %18 = arith.addf %12, %17 : vector<128x128xf32>
    %c0_6 = arith.constant 0 : index
    %c0_7 = arith.constant 0 : index
    %19 = vector.load %arg6[%c0_6, %c0_7] : memref<128x1xf32, #tpu.memory_space<vmem>>, vector<128x1xf32>
    %20 = vector.broadcast %19 : vector<128x1xf32> to vector<128x128xf32>
    %21 = arith.addf %18, %20 : vector<128x128xf32>
    %cst = arith.constant 0.000000e+00 : f32
    %22 = vector.broadcast %cst : f32 to vector<128x128xf32>
    %23 = arith.maximumf %21, %22 : vector<128x128xf32>
    %c0_8 = arith.constant 0 : index
    %c0_9 = arith.constant 0 : index
    %24 = vector.load %arg7[%c0_8, %c0_9] : memref<128x128xbf16, #tpu.memory_space<vmem>>, vector<128x128xbf16>
    %25 = arith.truncf %23 : vector<128x128xf32> to vector<128x128xbf16>
    %cst_10 = arith.constant dense<0.000000e+00> : vector<128x128xf32>
    %26 = tpu.matmul %24, %25, %cst_10 {dimension_numbers = #tpu.dot_dimension_numbers<[1], [0], [0], [1], [0, 0, 1, 1], [], []>} : vector<128x128xbf16>, vector<128x128xbf16>, vector<128x128xf32> -> vector<128x128xf32>
    %c0_11 = arith.constant 0 : index
    %c0_12 = arith.constant 0 : index
    %27 = vector.load %arg8[%c0_11, %c0_12] : memref<128x1xf32, #tpu.memory_space<vmem>>, vector<128x1xf32>
    %28 = vector.broadcast %27 : vector<128x1xf32> to vector<128x128xf32>
    %29 = arith.addf %26, %28 : vector<128x128xf32>
    %30 = arith.truncf %29 : vector<128x128xf32> to vector<128x128xbf16>
    %c0_13 = arith.constant 0 : index
    %c0_14 = arith.constant 0 : index
    %c0_15 = arith.constant 0 : index
    %31 = vector.load %arg2[%c0_13, %c0_14, %c0_15] : memref<1x8x64xf32, #tpu.memory_space<vmem>>, vector<1x8x64xf32>
    %32 = vector.shape_cast %31 : vector<1x8x64xf32> to vector<8x64xf32>
    %33 = arith.truncf %32 : vector<8x64xf32> to vector<8x64xbf16>
    %c0_16 = arith.constant 0 : index
    %c0_17 = arith.constant 0 : index
    %34 = vector.load %arg9[%c0_16, %c0_17] : memref<64x128xbf16, #tpu.memory_space<vmem>>, vector<64x128xbf16>
    %cst_18 = arith.constant dense<0.000000e+00> : vector<8x128xf32>
    %35 = tpu.matmul %33, %34, %cst_18 {dimension_numbers = #tpu.dot_dimension_numbers<[1], [0], [0], [1], [0, 0, 1, 1], [], []>} : vector<8x64xbf16>, vector<64x128xbf16>, vector<8x128xf32> -> vector<8x128xf32>
    %c0_19 = arith.constant 0 : index
    %c0_20 = arith.constant 0 : index
    %36 = vector.load %arg10[%c0_19, %c0_20] : memref<1x128xf32, #tpu.memory_space<vmem>>, vector<1x128xf32>
    %37 = vector.broadcast %36 : vector<1x128xf32> to vector<8x128xf32>
    %38 = arith.addf %35, %37 : vector<8x128xf32>
    %c0_21 = arith.constant 0 : index
    %c0_22 = arith.constant 0 : index
    %39 = vector.load %arg11[%c0_21, %c0_22] : memref<1x128xf32, #tpu.memory_space<vmem>>, vector<1x128xf32>
    %c0_23 = arith.constant 0 : index
    %c0_24 = arith.constant 0 : index
    %40 = vector.load %arg12[%c0_23, %c0_24] : memref<1x128xf32, #tpu.memory_space<vmem>>, vector<1x128xf32>
    %cst_25 = arith.constant dense<0.000000e+00> : vector<8xf32>
    %41 = vector.multi_reduction <add>, %38, %cst_25 [1] : vector<8x128xf32> to vector<8xf32>
    %42 = vector.shape_cast %41 : vector<8xf32> to vector<8x1xf32>
    %cst_26 = arith.constant 1.280000e+02 : f32
    %43 = vector.broadcast %cst_26 : f32 to vector<8x1xf32>
    %44 = arith.divf %42, %43 : vector<8x1xf32>
    %45 = arith.mulf %38, %38 : vector<8x128xf32>
    %cst_27 = arith.constant dense<0.000000e+00> : vector<8xf32>
    %46 = vector.multi_reduction <add>, %45, %cst_27 [1] : vector<8x128xf32> to vector<8xf32>
    %47 = vector.shape_cast %46 : vector<8xf32> to vector<8x1xf32>
    %cst_28 = arith.constant 1.280000e+02 : f32
    %48 = vector.broadcast %cst_28 : f32 to vector<8x1xf32>
    %49 = arith.divf %47, %48 : vector<8x1xf32>
    %50 = arith.mulf %44, %44 : vector<8x1xf32>
    %51 = arith.subf %49, %50 : vector<8x1xf32>
    %cst_29 = arith.constant 0.000000e+00 : f32
    %52 = vector.broadcast %cst_29 : f32 to vector<8x1xf32>
    %53 = arith.maximumf %51, %52 : vector<8x1xf32>
    %54 = vector.broadcast %44 : vector<8x1xf32> to vector<8x128xf32>
    %55 = arith.subf %38, %54 : vector<8x128xf32>
    %cst_30 = arith.constant 9.99999996E-13 : f32
    %56 = vector.broadcast %cst_30 : f32 to vector<8x1xf32>
    %57 = arith.addf %53, %56 : vector<8x1xf32>
    %58 = math.rsqrt %57 : vector<8x1xf32>
    %59 = vector.broadcast %58 : vector<8x1xf32> to vector<8x128xf32>
    %60 = arith.mulf %55, %59 : vector<8x128xf32>
    %61 = vector.broadcast %39 : vector<1x128xf32> to vector<8x128xf32>
    %62 = arith.mulf %60, %61 : vector<8x128xf32>
    %63 = vector.broadcast %40 : vector<1x128xf32> to vector<8x128xf32>
    %64 = arith.addf %62, %63 : vector<8x128xf32>
    %65 = vector.extract_strided_slice %64 {offsets = [0, 0], sizes = [4, 128], strides = [1, 1]} : vector<8x128xf32> to vector<4x128xf32>
    %66 = arith.truncf %65 : vector<4x128xf32> to vector<4x128xbf16>
    %c0_31 = arith.constant 0 : index
    %c0_32 = arith.constant 0 : index
    %67 = vector.load %arg13[%c0_31, %c0_32] : memref<128x128xbf16, #tpu.memory_space<vmem>>, vector<128x128xbf16>
    %cst_33 = arith.constant dense<0.000000e+00> : vector<4x128xf32>
    %68 = tpu.matmul %66, %67, %cst_33 {dimension_numbers = #tpu.dot_dimension_numbers<[1], [0], [0], [1], [0, 0, 1, 1], [], []>} : vector<4x128xbf16>, vector<128x128xbf16>, vector<4x128xf32> -> vector<4x128xf32>
    %c0_34 = arith.constant 0 : index
    %c0_35 = arith.constant 0 : index
    %69 = vector.load %arg14[%c0_34, %c0_35] : memref<1x128xf32, #tpu.memory_space<vmem>>, vector<1x128xf32>
    %70 = vector.broadcast %69 : vector<1x128xf32> to vector<4x128xf32>
    %71 = arith.addf %68, %70 : vector<4x128xf32>
    %72 = tpu.iota {dimensions = array<i32: 0>} : vector<8x128xi32>
    %73 = tpu.iota {dimensions = array<i32: 1>} : vector<8x128xi32>
    %74 = arith.cmpi eq, %72, %73 : vector<8x128xi32>
    %cst_36 = arith.constant 1.000000e+00 : f32
    %cst_37 = arith.constant 0.000000e+00 : f32
    %75 = vector.broadcast %cst_36 : f32 to vector<8x128xf32>
    %76 = vector.broadcast %cst_37 : f32 to vector<8x128xf32>
    %77 = arith.select %74, %75, %76 : vector<8x128xi1>, vector<8x128xf32>
    %78 = arith.truncf %77 : vector<8x128xf32> to vector<8x128xbf16>
    %cst_38 = arith.constant dense<0.000000e+00> : vector<8x128xf32>
    %79 = tpu.matmul %78, %30, %cst_38 {dimension_numbers = #tpu.dot_dimension_numbers<[1], [1], [0], [0], [0, 0, 1, 0], [], []>} : vector<8x128xbf16>, vector<128x128xbf16>, vector<8x128xf32> -> vector<8x128xf32>
    %c0_39 = arith.constant 0 : index
    %c0_40 = arith.constant 0 : index
    %80 = vector.load %arg35[%c0_39, %c0_40] : memref<12x128xf32, #tpu.memory_space<vmem>>, vector<4x128xf32>
    tpu.vector_store %arg35[%c0_39, %c0_40], %71 {strides = array<i32>} : memref<12x128xf32, #tpu.memory_space<vmem>>, vector<4x128xf32>,
    %c4 = arith.constant 4 : index
    %c0_41 = arith.constant 0 : index
    %81 = vector.load %arg35[%c4, %c0_41] : memref<12x128xf32, #tpu.memory_space<vmem>>, vector<8x128xf32>
    tpu.vector_store %arg35[%c4, %c0_41], %79 {strides = array<i32>} : memref<12x128xf32, #tpu.memory_space<vmem>>, vector<8x128xf32>,
    %c0_42 = arith.constant 0 : index
    %c0_43 = arith.constant 0 : index
    %82 = vector.load %arg35[%c0_42, %c0_43] : memref<12x128xf32, #tpu.memory_space<vmem>>, vector<12x128xf32>
    %c0_44 = arith.constant 0 : index
    %c0_45 = arith.constant 0 : index
    %c0_46 = arith.constant 0 : index
    %83 = vector.load %arg15[%c0_44, %c0_45, %c0_46] : memref<1x12x128xf32, #tpu.memory_space<vmem>>, vector<1x12x128xf32>
    %84 = vector.shape_cast %83 : vector<1x12x128xf32> to vector<12x128xf32>
    %c0_47 = arith.constant 0 : index
    %c0_48 = arith.constant 0 : index
    %c0_49 = arith.constant 0 : index
    %85 = vector.load %arg3[%c0_47, %c0_48, %c0_49] : memref<1x1x12xf32, #tpu.memory_space<vmem>>, vector<1x1x12xf32>
    %86 = vector.shape_cast %85 : vector<1x1x12xf32> to vector<1x12xf32>
    %cst_50 = arith.constant 1.000000e+00 : f32
    %87 = vector.broadcast %cst_50 : f32 to vector<1x12xf32>
    %88 = arith.subf %86, %87 : vector<1x12xf32>
    %cst_51 = arith.constant 1.000000e+09 : f32
    %89 = vector.broadcast %cst_51 : f32 to vector<1x12xf32>
    %90 = arith.mulf %88, %89 : vector<1x12xf32>
    %91 = arith.addf %82, %84 : vector<12x128xf32>
    %92 = arith.truncf %91 : vector<12x128xf32> to vector<12x128xbf16>
    %c0_52 = arith.constant 0 : index
    %c0_53 = arith.constant 0 : index
    %93 = vector.load %arg16[%c0_52, %c0_53] : memref<128x256xbf16, #tpu.memory_space<vmem>>, vector<128x256xbf16>
    %cst_54 = arith.constant dense<0.000000e+00> : vector<12x256xf32>
    %94 = tpu.matmul %92, %93, %cst_54 {dimension_numbers = #tpu.dot_dimension_numbers<[1], [0], [0], [1], [0, 0, 1, 1], [], []>} : vector<12x128xbf16>, vector<128x256xbf16>, vector<12x256xf32> -> vector<12x256xf32>
    %c0_55 = arith.constant 0 : index
    %c0_56 = arith.constant 0 : index
    %95 = vector.load %arg17[%c0_55, %c0_56] : memref<1x256xf32, #tpu.memory_space<vmem>>, vector<1x256xf32>
    %96 = vector.broadcast %95 : vector<1x256xf32> to vector<12x256xf32>
    %97 = arith.addf %94, %96 : vector<12x256xf32>
    %98 = arith.truncf %82 : vector<12x128xf32> to vector<12x128xbf16>
    %c0_57 = arith.constant 0 : index
    %c0_58 = arith.constant 0 : index
    %99 = vector.load %arg18[%c0_57, %c0_58] : memref<128x128xbf16, #tpu.memory_space<vmem>>, vector<128x128xbf16>
    %cst_59 = arith.constant dense<0.000000e+00> : vector<12x128xf32>
    %100 = tpu.matmul %98, %99, %cst_59 {dimension_numbers = #tpu.dot_dimension_numbers<[1], [0], [0], [1], [0, 0, 1, 1], [], []>} : vector<12x128xbf16>, vector<128x128xbf16>, vector<12x128xf32> -> vector<12x128xf32>
    %c0_60 = arith.constant 0 : index
    %c0_61 = arith.constant 0 : index
    %101 = vector.load %arg19[%c0_60, %c0_61] : memref<1x128xf32, #tpu.memory_space<vmem>>, vector<1x128xf32>
    %102 = vector.broadcast %101 : vector<1x128xf32> to vector<12x128xf32>
    %103 = arith.addf %100, %102 : vector<12x128xf32>
    %104 = vector.extract_strided_slice %97 {offsets = [0, 0], sizes = [12, 128], strides = [1, 1]} : vector<12x256xf32> to vector<12x128xf32>
    %105 = vector.extract_strided_slice %97 {offsets = [0, 128], sizes = [12, 128], strides = [1, 1]} : vector<12x256xf32> to vector<12x128xf32>
    %106 = vector.extract_strided_slice %104 {offsets = [0, 0], sizes = [12, 32], strides = [1, 1]} : vector<12x128xf32> to vector<12x32xf32>
    %107 = arith.truncf %106 : vector<12x32xf32> to vector<12x32xbf16>
    %108 = vector.extract_strided_slice %105 {offsets = [0, 0], sizes = [12, 32], strides = [1, 1]} : vector<12x128xf32> to vector<12x32xf32>
    %109 = arith.truncf %108 : vector<12x32xf32> to vector<12x32xbf16>
    %cst_62 = arith.constant dense<0.000000e+00> : vector<12x12xf32>
    %110 = tpu.matmul %107, %109, %cst_62 {dimension_numbers = #tpu.dot_dimension_numbers<[1], [1], [0], [0], [0, 0, 1, 0], [], []>} : vector<12x32xbf16>, vector<12x32xbf16>, vector<12x12xf32> -> vector<12x12xf32>
    %cst_63 = arith.constant 0.176776692 : f32
    %111 = vector.broadcast %cst_63 : f32 to vector<12x12xf32>
    %112 = arith.mulf %110, %111 : vector<12x12xf32>
    %113 = vector.broadcast %90 : vector<1x12xf32> to vector<12x12xf32>
    %114 = arith.addf %112, %113 : vector<12x12xf32>
    %cst_64 = arith.constant dense<0xFF800000> : vector<12xf32>
    %115 = vector.multi_reduction <maximumf>, %114, %cst_64 [1] : vector<12x12xf32> to vector<12xf32>
    %116 = vector.shape_cast %115 : vector<12xf32> to vector<12x1xf32>
    %117 = vector.broadcast %116 : vector<12x1xf32> to vector<12x12xf32>
    %118 = arith.subf %114, %117 : vector<12x12xf32>
    %119 = math.exp %118 : vector<12x12xf32>
    %cst_65 = arith.constant dense<0.000000e+00> : vector<12xf32>
    %120 = vector.multi_reduction <add>, %119, %cst_65 [1] : vector<12x12xf32> to vector<12xf32>
    %121 = vector.shape_cast %120 : vector<12xf32> to vector<12x1xf32>
    %122 = tpu.reciprocal %121 {approx = true} : vector<12x1xf32> -> vector<12x1xf32>
    %123 = vector.broadcast %122 : vector<12x1xf32> to vector<12x12xf32>
    %124 = arith.mulf %119, %123 : vector<12x12xf32>
    %125 = arith.truncf %124 : vector<12x12xf32> to vector<12x12xbf16>
    %126 = vector.extract_strided_slice %103 {offsets = [0, 0], sizes = [12, 32], strides = [1, 1]} : vector<12x128xf32> to vector<12x32xf32>
    %127 = arith.truncf %126 : vector<12x32xf32> to vector<12x32xbf16>
    %cst_66 = arith.constant dense<0.000000e+00> : vector<12x32xf32>
    %128 = tpu.matmul %125, %127, %cst_66 {dimension_numbers = #tpu.dot_dimension_numbers<[1], [0], [0], [1], [0, 0, 1, 1], [], []>} : vector<12x12xbf16>, vector<12x32xbf16>, vector<12x32xf32> -> vector<12x32xf32>
    %c0_67 = arith.constant 0 : index
    %c0_68 = arith.constant 0 : index
    %129 = vector.load %arg36[%c0_67, %c0_68] : memref<12x128xf32, #tpu.memory_space<vmem>>, vector<12x32xf32>
    tpu.vector_store %arg36[%c0_67, %c0_68], %128 {strides = array<i32>} : memref<12x128xf32, #tpu.memory_space<vmem>>, vector<12x32xf32>,
    %130 = vector.extract_strided_slice %104 {offsets = [0, 32], sizes = [12, 32], strides = [1, 1]} : vector<12x128xf32> to vector<12x32xf32>
    %131 = arith.truncf %130 : vector<12x32xf32> to vector<12x32xbf16>
    %132 = vector.extract_strided_slice %105 {offsets = [0, 32], sizes = [12, 32], strides = [1, 1]} : vector<12x128xf32> to vector<12x32xf32>
    %133 = arith.truncf %132 : vector<12x32xf32> to vector<12x32xbf16>
    %cst_69 = arith.constant dense<0.000000e+00> : vector<12x12xf32>
    %134 = tpu.matmul %131, %133, %cst_69 {dimension_numbers = #tpu.dot_dimension_numbers<[1], [1], [0], [0], [0, 0, 1, 0], [], []>} : vector<12x32xbf16>, vector<12x32xbf16>, vector<12x12xf32> -> vector<12x12xf32>
    %cst_70 = arith.constant 0.176776692 : f32
    %135 = vector.broadcast %cst_70 : f32 to vector<12x12xf32>
    %136 = arith.mulf %134, %135 : vector<12x12xf32>
    %137 = vector.broadcast %90 : vector<1x12xf32> to vector<12x12xf32>
    %138 = arith.addf %136, %137 : vector<12x12xf32>
    %cst_71 = arith.constant dense<0xFF800000> : vector<12xf32>
    %139 = vector.multi_reduction <maximumf>, %138, %cst_71 [1] : vector<12x12xf32> to vector<12xf32>
    %140 = vector.shape_cast %139 : vector<12xf32> to vector<12x1xf32>
    %141 = vector.broadcast %140 : vector<12x1xf32> to vector<12x12xf32>
    %142 = arith.subf %138, %141 : vector<12x12xf32>
    %143 = math.exp %142 : vector<12x12xf32>
    %cst_72 = arith.constant dense<0.000000e+00> : vector<12xf32>
    %144 = vector.multi_reduction <add>, %143, %cst_72 [1] : vector<12x12xf32> to vector<12xf32>
    %145 = vector.shape_cast %144 : vector<12xf32> to vector<12x1xf32>
    %146 = tpu.reciprocal %145 {approx = true} : vector<12x1xf32> -> vector<12x1xf32>
    %147 = vector.broadcast %146 : vector<12x1xf32> to vector<12x12xf32>
    %148 = arith.mulf %143, %147 : vector<12x12xf32>
    %149 = arith.truncf %148 : vector<12x12xf32> to vector<12x12xbf16>
    %150 = vector.extract_strided_slice %103 {offsets = [0, 32], sizes = [12, 32], strides = [1, 1]} : vector<12x128xf32> to vector<12x32xf32>
    %151 = arith.truncf %150 : vector<12x32xf32> to vector<12x32xbf16>
    %cst_73 = arith.constant dense<0.000000e+00> : vector<12x32xf32>
    %152 = tpu.matmul %149, %151, %cst_73 {dimension_numbers = #tpu.dot_dimension_numbers<[1], [0], [0], [1], [0, 0, 1, 1], [], []>} : vector<12x12xbf16>, vector<12x32xbf16>, vector<12x32xf32> -> vector<12x32xf32>
    %c0_74 = arith.constant 0 : index
    %c32 = arith.constant 32 : index
    %153 = vector.load %arg36[%c0_74, %c32] : memref<12x128xf32, #tpu.memory_space<vmem>>, vector<12x32xf32>
    tpu.vector_store %arg36[%c0_74, %c32], %152 {strides = array<i32>} : memref<12x128xf32, #tpu.memory_space<vmem>>, vector<12x32xf32>,
    %154 = vector.extract_strided_slice %104 {offsets = [0, 64], sizes = [12, 32], strides = [1, 1]} : vector<12x128xf32> to vector<12x32xf32>
    %155 = arith.truncf %154 : vector<12x32xf32> to vector<12x32xbf16>
    %156 = vector.extract_strided_slice %105 {offsets = [0, 64], sizes = [12, 32], strides = [1, 1]} : vector<12x128xf32> to vector<12x32xf32>
    %157 = arith.truncf %156 : vector<12x32xf32> to vector<12x32xbf16>
    %cst_75 = arith.constant dense<0.000000e+00> : vector<12x12xf32>
    %158 = tpu.matmul %155, %157, %cst_75 {dimension_numbers = #tpu.dot_dimension_numbers<[1], [1], [0], [0], [0, 0, 1, 0], [], []>} : vector<12x32xbf16>, vector<12x32xbf16>, vector<12x12xf32> -> vector<12x12xf32>
    %cst_76 = arith.constant 0.176776692 : f32
    %159 = vector.broadcast %cst_76 : f32 to vector<12x12xf32>
    %160 = arith.mulf %158, %159 : vector<12x12xf32>
    %161 = vector.broadcast %90 : vector<1x12xf32> to vector<12x12xf32>
    %162 = arith.addf %160, %161 : vector<12x12xf32>
    %cst_77 = arith.constant dense<0xFF800000> : vector<12xf32>
    %163 = vector.multi_reduction <maximumf>, %162, %cst_77 [1] : vector<12x12xf32> to vector<12xf32>
    %164 = vector.shape_cast %163 : vector<12xf32> to vector<12x1xf32>
    %165 = vector.broadcast %164 : vector<12x1xf32> to vector<12x12xf32>
    %166 = arith.subf %162, %165 : vector<12x12xf32>
    %167 = math.exp %166 : vector<12x12xf32>
    %cst_78 = arith.constant dense<0.000000e+00> : vector<12xf32>
    %168 = vector.multi_reduction <add>, %167, %cst_78 [1] : vector<12x12xf32> to vector<12xf32>
    %169 = vector.shape_cast %168 : vector<12xf32> to vector<12x1xf32>
    %170 = tpu.reciprocal %169 {approx = true} : vector<12x1xf32> -> vector<12x1xf32>
    %171 = vector.broadcast %170 : vector<12x1xf32> to vector<12x12xf32>
    %172 = arith.mulf %167, %171 : vector<12x12xf32>
    %173 = arith.truncf %172 : vector<12x12xf32> to vector<12x12xbf16>
    %174 = vector.extract_strided_slice %103 {offsets = [0, 64], sizes = [12, 32], strides = [1, 1]} : vector<12x128xf32> to vector<12x32xf32>
    %175 = arith.truncf %174 : vector<12x32xf32> to vector<12x32xbf16>
    %cst_79 = arith.constant dense<0.000000e+00> : vector<12x32xf32>
    %176 = tpu.matmul %173, %175, %cst_79 {dimension_numbers = #tpu.dot_dimension_numbers<[1], [0], [0], [1], [0, 0, 1, 1], [], []>} : vector<12x12xbf16>, vector<12x32xbf16>, vector<12x32xf32> -> vector<12x32xf32>
    %c0_80 = arith.constant 0 : index
    %c64 = arith.constant 64 : index
    %177 = vector.load %arg36[%c0_80, %c64] : memref<12x128xf32, #tpu.memory_space<vmem>>, vector<12x32xf32>
    tpu.vector_store %arg36[%c0_80, %c64], %176 {strides = array<i32>} : memref<12x128xf32, #tpu.memory_space<vmem>>, vector<12x32xf32>,
    %178 = vector.extract_strided_slice %104 {offsets = [0, 96], sizes = [12, 32], strides = [1, 1]} : vector<12x128xf32> to vector<12x32xf32>
    %179 = arith.truncf %178 : vector<12x32xf32> to vector<12x32xbf16>
    %180 = vector.extract_strided_slice %105 {offsets = [0, 96], sizes = [12, 32], strides = [1, 1]} : vector<12x128xf32> to vector<12x32xf32>
    %181 = arith.truncf %180 : vector<12x32xf32> to vector<12x32xbf16>
    %cst_81 = arith.constant dense<0.000000e+00> : vector<12x12xf32>
    %182 = tpu.matmul %179, %181, %cst_81 {dimension_numbers = #tpu.dot_dimension_numbers<[1], [1], [0], [0], [0, 0, 1, 0], [], []>} : vector<12x32xbf16>, vector<12x32xbf16>, vector<12x12xf32> -> vector<12x12xf32>
    %cst_82 = arith.constant 0.176776692 : f32
    %183 = vector.broadcast %cst_82 : f32 to vector<12x12xf32>
    %184 = arith.mulf %182, %183 : vector<12x12xf32>
    %185 = vector.broadcast %90 : vector<1x12xf32> to vector<12x12xf32>
    %186 = arith.addf %184, %185 : vector<12x12xf32>
    %cst_83 = arith.constant dense<0xFF800000> : vector<12xf32>
    %187 = vector.multi_reduction <maximumf>, %186, %cst_83 [1] : vector<12x12xf32> to vector<12xf32>
    %188 = vector.shape_cast %187 : vector<12xf32> to vector<12x1xf32>
    %189 = vector.broadcast %188 : vector<12x1xf32> to vector<12x12xf32>
    %190 = arith.subf %186, %189 : vector<12x12xf32>
    %191 = math.exp %190 : vector<12x12xf32>
    %cst_84 = arith.constant dense<0.000000e+00> : vector<12xf32>
    %192 = vector.multi_reduction <add>, %191, %cst_84 [1] : vector<12x12xf32> to vector<12xf32>
    %193 = vector.shape_cast %192 : vector<12xf32> to vector<12x1xf32>
    %194 = tpu.reciprocal %193 {approx = true} : vector<12x1xf32> -> vector<12x1xf32>
    %195 = vector.broadcast %194 : vector<12x1xf32> to vector<12x12xf32>
    %196 = arith.mulf %191, %195 : vector<12x12xf32>
    %197 = arith.truncf %196 : vector<12x12xf32> to vector<12x12xbf16>
    %198 = vector.extract_strided_slice %103 {offsets = [0, 96], sizes = [12, 32], strides = [1, 1]} : vector<12x128xf32> to vector<12x32xf32>
    %199 = arith.truncf %198 : vector<12x32xf32> to vector<12x32xbf16>
    %cst_85 = arith.constant dense<0.000000e+00> : vector<12x32xf32>
    %200 = tpu.matmul %197, %199, %cst_85 {dimension_numbers = #tpu.dot_dimension_numbers<[1], [0], [0], [1], [0, 0, 1, 1], [], []>} : vector<12x12xbf16>, vector<12x32xbf16>, vector<12x32xf32> -> vector<12x32xf32>
    %c0_86 = arith.constant 0 : index
    %c96 = arith.constant 96 : index
    %201 = vector.load %arg36[%c0_86, %c96] : memref<12x128xf32, #tpu.memory_space<vmem>>, vector<12x32xf32>
    tpu.vector_store %arg36[%c0_86, %c96], %200 {strides = array<i32>} : memref<12x128xf32, #tpu.memory_space<vmem>>, vector<12x32xf32>,
    %c0_87 = arith.constant 0 : index
    %c0_88 = arith.constant 0 : index
    %202 = vector.load %arg36[%c0_87, %c0_88] : memref<12x128xf32, #tpu.memory_space<vmem>>, vector<12x128xf32>
    %203 = arith.truncf %202 : vector<12x128xf32> to vector<12x128xbf16>
    %c0_89 = arith.constant 0 : index
    %c0_90 = arith.constant 0 : index
    %204 = vector.load %arg20[%c0_89, %c0_90] : memref<128x128xbf16, #tpu.memory_space<vmem>>, vector<128x128xbf16>
    %cst_91 = arith.constant dense<0.000000e+00> : vector<12x128xf32>
    %205 = tpu.matmul %203, %204, %cst_91 {dimension_numbers = #tpu.dot_dimension_numbers<[1], [0], [0], [1], [0, 0, 1, 1], [], []>} : vector<12x128xbf16>, vector<128x128xbf16>, vector<12x128xf32> -> vector<12x128xf32>
    %c0_92 = arith.constant 0 : index
    %c0_93 = arith.constant 0 : index
    %206 = vector.load %arg21[%c0_92, %c0_93] : memref<1x128xf32, #tpu.memory_space<vmem>>, vector<1x128xf32>
    %207 = vector.broadcast %206 : vector<1x128xf32> to vector<12x128xf32>
    %208 = arith.addf %205, %207 : vector<12x128xf32>
    %209 = arith.addf %82, %208 : vector<12x128xf32>
    %c0_94 = arith.constant 0 : index
    %c0_95 = arith.constant 0 : index
    %210 = vector.load %arg32[%c0_94, %c0_95] : memref<4x128xf32, #tpu.memory_space<vmem>>, vector<1x128xf32>
    %211 = vector.shape_cast %210 : vector<1x128xf32> to vector<128xf32>
    %c0_96 = arith.constant 0 : index
    %c0_97 = arith.constant 0 : index
    %212 = vector.load %arg33[%c0_96, %c0_97] : memref<4x128xf32, #tpu.memory_space<vmem>>, vector<1x128xf32>
    %213 = vector.shape_cast %212 : vector<1x128xf32> to vector<128xf32>
    %cst_98 = arith.constant dense<0.000000e+00> : vector<12xf32>
    %214 = vector.multi_reduction <add>, %209, %cst_98 [1] : vector<12x128xf32> to vector<12xf32>
    %215 = vector.shape_cast %214 : vector<12xf32> to vector<12x1xf32>
    %cst_99 = arith.constant 1.280000e+02 : f32
    %216 = vector.broadcast %cst_99 : f32 to vector<12x1xf32>
    %217 = arith.divf %215, %216 : vector<12x1xf32>
    %218 = arith.mulf %209, %209 : vector<12x128xf32>
    %cst_100 = arith.constant dense<0.000000e+00> : vector<12xf32>
    %219 = vector.multi_reduction <add>, %218, %cst_100 [1] : vector<12x128xf32> to vector<12xf32>
    %220 = vector.shape_cast %219 : vector<12xf32> to vector<12x1xf32>
    %cst_101 = arith.constant 1.280000e+02 : f32
    %221 = vector.broadcast %cst_101 : f32 to vector<12x1xf32>
    %222 = arith.divf %220, %221 : vector<12x1xf32>
    %223 = arith.mulf %217, %217 : vector<12x1xf32>
    %224 = arith.subf %222, %223 : vector<12x1xf32>
    %cst_102 = arith.constant 0.000000e+00 : f32
    %225 = vector.broadcast %cst_102 : f32 to vector<12x1xf32>
    %226 = arith.maximumf %224, %225 : vector<12x1xf32>
    %227 = vector.broadcast %217 : vector<12x1xf32> to vector<12x128xf32>
    %228 = arith.subf %209, %227 : vector<12x128xf32>
    %cst_103 = arith.constant 9.99999974E-6 : f32
    %229 = vector.broadcast %cst_103 : f32 to vector<12x1xf32>
    %230 = arith.addf %226, %229 : vector<12x1xf32>
    %231 = math.rsqrt %230 : vector<12x1xf32>
    %232 = vector.broadcast %231 : vector<12x1xf32> to vector<12x128xf32>
    %233 = arith.mulf %228, %232 : vector<12x128xf32>
    %234 = vector.shape_cast %211 : vector<128xf32> to vector<1x128xf32>
    %235 = vector.broadcast %234 : vector<1x128xf32> to vector<12x128xf32>
    %236 = arith.mulf %233, %235 : vector<12x128xf32>
    %237 = vector.shape_cast %213 : vector<128xf32> to vector<1x128xf32>
    %238 = vector.broadcast %237 : vector<1x128xf32> to vector<12x128xf32>
    %239 = arith.addf %236, %238 : vector<12x128xf32>
    %240 = arith.addf %239, %84 : vector<12x128xf32>
    %241 = arith.truncf %240 : vector<12x128xf32> to vector<12x128xbf16>
    %c0_104 = arith.constant 0 : index
    %c0_105 = arith.constant 0 : index
    %242 = vector.load %arg22[%c0_104, %c0_105] : memref<128x128xbf16, #tpu.memory_space<vmem>>, vector<128x128xbf16>
    %cst_106 = arith.constant dense<0.000000e+00> : vector<12x128xf32>
    %243 = tpu.matmul %241, %242, %cst_106 {dimension_numbers = #tpu.dot_dimension_numbers<[1], [0], [0], [1], [0, 0, 1, 1], [], []>} : vector<12x128xbf16>, vector<128x128xbf16>, vector<12x128xf32> -> vector<12x128xf32>
    %c0_107 = arith.constant 0 : index
    %c0_108 = arith.constant 0 : index
    %244 = vector.load %arg23[%c0_107, %c0_108] : memref<1x128xf32, #tpu.memory_space<vmem>>, vector<1x128xf32>
    %245 = vector.broadcast %244 : vector<1x128xf32> to vector<12x128xf32>
    %246 = arith.addf %243, %245 : vector<12x128xf32>
    %c0_109 = arith.constant 0 : index
    %c0_110 = arith.constant 0 : index
    %247 = vector.load %arg24[%c0_109, %c0_110] : memref<256x128xbf16, #tpu.memory_space<vmem>>, vector<256x128xbf16>
    %cst_111 = arith.constant dense<0.000000e+00> : vector<256x128xf32>
    %248 = tpu.matmul %247, %30, %cst_111 {dimension_numbers = #tpu.dot_dimension_numbers<[1], [0], [0], [1], [0, 0, 1, 1], [], []>} : vector<256x128xbf16>, vector<128x128xbf16>, vector<256x128xf32> -> vector<256x128xf32>
    %c0_112 = arith.constant 0 : index
    %c0_113 = arith.constant 0 : index
    %249 = vector.load %arg25[%c0_112, %c0_113] : memref<256x1xf32, #tpu.memory_space<vmem>>, vector<256x1xf32>
    %250 = vector.broadcast %249 : vector<256x1xf32> to vector<256x128xf32>
    %251 = arith.addf %248, %250 : vector<256x128xf32>
    %252 = arith.truncf %251 : vector<256x128xf32> to vector<256x128xbf16>
    %253 = vector.extract_strided_slice %252 {offsets = [0, 0], sizes = [32, 128], strides = [1, 1]} : vector<256x128xbf16> to vector<32x128xbf16>
    %254 = vector.extract_strided_slice %252 {offsets = [128, 0], sizes = [32, 128], strides = [1, 1]} : vector<256x128xbf16> to vector<32x128xbf16>
    %255 = vector.extract_strided_slice %246 {offsets = [0, 0], sizes = [12, 32], strides = [1, 1]} : vector<12x128xf32> to vector<12x32xf32>
    %256 = arith.truncf %255 : vector<12x32xf32> to vector<12x32xbf16>
    %cst_114 = arith.constant dense<0.000000e+00> : vector<12x128xf32>
    %257 = tpu.matmul %256, %253, %cst_114 {dimension_numbers = #tpu.dot_dimension_numbers<[1], [0], [0], [1], [0, 0, 1, 1], [], []>} : vector<12x32xbf16>, vector<32x128xbf16>, vector<12x128xf32> -> vector<12x128xf32>
    %cst_115 = arith.constant 0.176776692 : f32
    %258 = vector.broadcast %cst_115 : f32 to vector<12x128xf32>
    %259 = arith.mulf %257, %258 : vector<12x128xf32>
    %cst_116 = arith.constant dense<0xFF800000> : vector<12xf32>
    %260 = vector.multi_reduction <maximumf>, %259, %cst_116 [1] : vector<12x128xf32> to vector<12xf32>
    %261 = vector.shape_cast %260 : vector<12xf32> to vector<12x1xf32>
    %262 = vector.broadcast %261 : vector<12x1xf32> to vector<12x128xf32>
    %263 = arith.subf %259, %262 : vector<12x128xf32>
    %264 = math.exp %263 : vector<12x128xf32>
    %cst_117 = arith.constant dense<0.000000e+00> : vector<12xf32>
    %265 = vector.multi_reduction <add>, %264, %cst_117 [1] : vector<12x128xf32> to vector<12xf32>
    %266 = vector.shape_cast %265 : vector<12xf32> to vector<12x1xf32>
    %267 = tpu.reciprocal %266 {approx = true} : vector<12x1xf32> -> vector<12x1xf32>
    %268 = vector.broadcast %267 : vector<12x1xf32> to vector<12x128xf32>
    %269 = arith.mulf %264, %268 : vector<12x128xf32>
    %270 = arith.truncf %269 : vector<12x128xf32> to vector<12x128xbf16>
    %cst_118 = arith.constant dense<0.000000e+00> : vector<12x32xf32>
    %271 = tpu.matmul %270, %254, %cst_118 {dimension_numbers = #tpu.dot_dimension_numbers<[1], [1], [0], [0], [0, 0, 1, 0], [], []>} : vector<12x128xbf16>, vector<32x128xbf16>, vector<12x32xf32> -> vector<12x32xf32>
    %c0_119 = arith.constant 0 : index
    %c0_120 = arith.constant 0 : index
    %272 = vector.load %arg36[%c0_119, %c0_120] : memref<12x128xf32, #tpu.memory_space<vmem>>, vector<12x32xf32>
    tpu.vector_store %arg36[%c0_119, %c0_120], %271 {strides = array<i32>} : memref<12x128xf32, #tpu.memory_space<vmem>>, vector<12x32xf32>,
    %273 = vector.extract_strided_slice %252 {offsets = [32, 0], sizes = [32, 128], strides = [1, 1]} : vector<256x128xbf16> to vector<32x128xbf16>
    %274 = vector.extract_strided_slice %252 {offsets = [160, 0], sizes = [32, 128], strides = [1, 1]} : vector<256x128xbf16> to vector<32x128xbf16>
    %275 = vector.extract_strided_slice %246 {offsets = [0, 32], sizes = [12, 32], strides = [1, 1]} : vector<12x128xf32> to vector<12x32xf32>
    %276 = arith.truncf %275 : vector<12x32xf32> to vector<12x32xbf16>
    %cst_121 = arith.constant dense<0.000000e+00> : vector<12x128xf32>
    %277 = tpu.matmul %276, %273, %cst_121 {dimension_numbers = #tpu.dot_dimension_numbers<[1], [0], [0], [1], [0, 0, 1, 1], [], []>} : vector<12x32xbf16>, vector<32x128xbf16>, vector<12x128xf32> -> vector<12x128xf32>
    %cst_122 = arith.constant 0.176776692 : f32
    %278 = vector.broadcast %cst_122 : f32 to vector<12x128xf32>
    %279 = arith.mulf %277, %278 : vector<12x128xf32>
    %cst_123 = arith.constant dense<0xFF800000> : vector<12xf32>
    %280 = vector.multi_reduction <maximumf>, %279, %cst_123 [1] : vector<12x128xf32> to vector<12xf32>
    %281 = vector.shape_cast %280 : vector<12xf32> to vector<12x1xf32>
    %282 = vector.broadcast %281 : vector<12x1xf32> to vector<12x128xf32>
    %283 = arith.subf %279, %282 : vector<12x128xf32>
    %284 = math.exp %283 : vector<12x128xf32>
    %cst_124 = arith.constant dense<0.000000e+00> : vector<12xf32>
    %285 = vector.multi_reduction <add>, %284, %cst_124 [1] : vector<12x128xf32> to vector<12xf32>
    %286 = vector.shape_cast %285 : vector<12xf32> to vector<12x1xf32>
    %287 = tpu.reciprocal %286 {approx = true} : vector<12x1xf32> -> vector<12x1xf32>
    %288 = vector.broadcast %287 : vector<12x1xf32> to vector<12x128xf32>
    %289 = arith.mulf %284, %288 : vector<12x128xf32>
    %290 = arith.truncf %289 : vector<12x128xf32> to vector<12x128xbf16>
    %cst_125 = arith.constant dense<0.000000e+00> : vector<12x32xf32>
    %291 = tpu.matmul %290, %274, %cst_125 {dimension_numbers = #tpu.dot_dimension_numbers<[1], [1], [0], [0], [0, 0, 1, 0], [], []>} : vector<12x128xbf16>, vector<32x128xbf16>, vector<12x32xf32> -> vector<12x32xf32>
    %c0_126 = arith.constant 0 : index
    %c32_127 = arith.constant 32 : index
    %292 = vector.load %arg36[%c0_126, %c32_127] : memref<12x128xf32, #tpu.memory_space<vmem>>, vector<12x32xf32>
    tpu.vector_store %arg36[%c0_126, %c32_127], %291 {strides = array<i32>} : memref<12x128xf32, #tpu.memory_space<vmem>>, vector<12x32xf32>,
    %293 = vector.extract_strided_slice %252 {offsets = [64, 0], sizes = [32, 128], strides = [1, 1]} : vector<256x128xbf16> to vector<32x128xbf16>
    %294 = vector.extract_strided_slice %252 {offsets = [192, 0], sizes = [32, 128], strides = [1, 1]} : vector<256x128xbf16> to vector<32x128xbf16>
    %295 = vector.extract_strided_slice %246 {offsets = [0, 64], sizes = [12, 32], strides = [1, 1]} : vector<12x128xf32> to vector<12x32xf32>
    %296 = arith.truncf %295 : vector<12x32xf32> to vector<12x32xbf16>
    %cst_128 = arith.constant dense<0.000000e+00> : vector<12x128xf32>
    %297 = tpu.matmul %296, %293, %cst_128 {dimension_numbers = #tpu.dot_dimension_numbers<[1], [0], [0], [1], [0, 0, 1, 1], [], []>} : vector<12x32xbf16>, vector<32x128xbf16>, vector<12x128xf32> -> vector<12x128xf32>
    %cst_129 = arith.constant 0.176776692 : f32
    %298 = vector.broadcast %cst_129 : f32 to vector<12x128xf32>
    %299 = arith.mulf %297, %298 : vector<12x128xf32>
    %cst_130 = arith.constant dense<0xFF800000> : vector<12xf32>
    %300 = vector.multi_reduction <maximumf>, %299, %cst_130 [1] : vector<12x128xf32> to vector<12xf32>
    %301 = vector.shape_cast %300 : vector<12xf32> to vector<12x1xf32>
    %302 = vector.broadcast %301 : vector<12x1xf32> to vector<12x128xf32>
    %303 = arith.subf %299, %302 : vector<12x128xf32>
    %304 = math.exp %303 : vector<12x128xf32>
    %cst_131 = arith.constant dense<0.000000e+00> : vector<12xf32>
    %305 = vector.multi_reduction <add>, %304, %cst_131 [1] : vector<12x128xf32> to vector<12xf32>
    %306 = vector.shape_cast %305 : vector<12xf32> to vector<12x1xf32>
    %307 = tpu.reciprocal %306 {approx = true} : vector<12x1xf32> -> vector<12x1xf32>
    %308 = vector.broadcast %307 : vector<12x1xf32> to vector<12x128xf32>
    %309 = arith.mulf %304, %308 : vector<12x128xf32>
    %310 = arith.truncf %309 : vector<12x128xf32> to vector<12x128xbf16>
    %cst_132 = arith.constant dense<0.000000e+00> : vector<12x32xf32>
    %311 = tpu.matmul %310, %294, %cst_132 {dimension_numbers = #tpu.dot_dimension_numbers<[1], [1], [0], [0], [0, 0, 1, 0], [], []>} : vector<12x128xbf16>, vector<32x128xbf16>, vector<12x32xf32> -> vector<12x32xf32>
    %c0_133 = arith.constant 0 : index
    %c64_134 = arith.constant 64 : index
    %312 = vector.load %arg36[%c0_133, %c64_134] : memref<12x128xf32, #tpu.memory_space<vmem>>, vector<12x32xf32>
    tpu.vector_store %arg36[%c0_133, %c64_134], %311 {strides = array<i32>} : memref<12x128xf32, #tpu.memory_space<vmem>>, vector<12x32xf32>,
    %313 = vector.extract_strided_slice %252 {offsets = [96, 0], sizes = [32, 128], strides = [1, 1]} : vector<256x128xbf16> to vector<32x128xbf16>
    %314 = vector.extract_strided_slice %252 {offsets = [224, 0], sizes = [32, 128], strides = [1, 1]} : vector<256x128xbf16> to vector<32x128xbf16>
    %315 = vector.extract_strided_slice %246 {offsets = [0, 96], sizes = [12, 32], strides = [1, 1]} : vector<12x128xf32> to vector<12x32xf32>
    %316 = arith.truncf %315 : vector<12x32xf32> to vector<12x32xbf16>
    %cst_135 = arith.constant dense<0.000000e+00> : vector<12x128xf32>
    %317 = tpu.matmul %316, %313, %cst_135 {dimension_numbers = #tpu.dot_dimension_numbers<[1], [0], [0], [1], [0, 0, 1, 1], [], []>} : vector<12x32xbf16>, vector<32x128xbf16>, vector<12x128xf32> -> vector<12x128xf32>
    %cst_136 = arith.constant 0.176776692 : f32
    %318 = vector.broadcast %cst_136 : f32 to vector<12x128xf32>
    %319 = arith.mulf %317, %318 : vector<12x128xf32>
    %cst_137 = arith.constant dense<0xFF800000> : vector<12xf32>
    %320 = vector.multi_reduction <maximumf>, %319, %cst_137 [1] : vector<12x128xf32> to vector<12xf32>
    %321 = vector.shape_cast %320 : vector<12xf32> to vector<12x1xf32>
    %322 = vector.broadcast %321 : vector<12x1xf32> to vector<12x128xf32>
    %323 = arith.subf %319, %322 : vector<12x128xf32>
    %324 = math.exp %323 : vector<12x128xf32>
    %cst_138 = arith.constant dense<0.000000e+00> : vector<12xf32>
    %325 = vector.multi_reduction <add>, %324, %cst_138 [1] : vector<12x128xf32> to vector<12xf32>
    %326 = vector.shape_cast %325 : vector<12xf32> to vector<12x1xf32>
    %327 = tpu.reciprocal %326 {approx = true} : vector<12x1xf32> -> vector<12x1xf32>
    %328 = vector.broadcast %327 : vector<12x1xf32> to vector<12x128xf32>
    %329 = arith.mulf %324, %328 : vector<12x128xf32>
    %330 = arith.truncf %329 : vector<12x128xf32> to vector<12x128xbf16>
    %cst_139 = arith.constant dense<0.000000e+00> : vector<12x32xf32>
    %331 = tpu.matmul %330, %314, %cst_139 {dimension_numbers = #tpu.dot_dimension_numbers<[1], [1], [0], [0], [0, 0, 1, 0], [], []>} : vector<12x128xbf16>, vector<32x128xbf16>, vector<12x32xf32> -> vector<12x32xf32>
    %c0_140 = arith.constant 0 : index
    %c96_141 = arith.constant 96 : index
    %332 = vector.load %arg36[%c0_140, %c96_141] : memref<12x128xf32, #tpu.memory_space<vmem>>, vector<12x32xf32>
    tpu.vector_store %arg36[%c0_140, %c96_141], %331 {strides = array<i32>} : memref<12x128xf32, #tpu.memory_space<vmem>>, vector<12x32xf32>,
    %c0_142 = arith.constant 0 : index
    %c0_143 = arith.constant 0 : index
    %333 = vector.load %arg36[%c0_142, %c0_143] : memref<12x128xf32, #tpu.memory_space<vmem>>, vector<12x128xf32>
    %334 = arith.truncf %333 : vector<12x128xf32> to vector<12x128xbf16>
    %c0_144 = arith.constant 0 : index
    %c0_145 = arith.constant 0 : index
    %335 = vector.load %arg26[%c0_144, %c0_145] : memref<128x128xbf16, #tpu.memory_space<vmem>>, vector<128x128xbf16>
    %cst_146 = arith.constant dense<0.000000e+00> : vector<12x128xf32>
    %336 = tpu.matmul %334, %335, %cst_146 {dimension_numbers = #tpu.dot_dimension_numbers<[1], [0], [0], [1], [0, 0, 1, 1], [], []>} : vector<12x128xbf16>, vector<128x128xbf16>, vector<12x128xf32> -> vector<12x128xf32>
    %c0_147 = arith.constant 0 : index
    %c0_148 = arith.constant 0 : index
    %337 = vector.load %arg27[%c0_147, %c0_148] : memref<1x128xf32, #tpu.memory_space<vmem>>, vector<1x128xf32>
    %338 = vector.broadcast %337 : vector<1x128xf32> to vector<12x128xf32>
    %339 = arith.addf %336, %338 : vector<12x128xf32>
    %340 = arith.addf %239, %339 : vector<12x128xf32>
    %c1_149 = arith.constant 1 : index
    %c0_150 = arith.constant 0 : index
    %341 = vector.load %arg32[%c1_149, %c0_150] : memref<4x128xf32, #tpu.memory_space<vmem>>, vector<1x128xf32>
    %342 = vector.shape_cast %341 : vector<1x128xf32> to vector<128xf32>
    %c1_151 = arith.constant 1 : index
    %c0_152 = arith.constant 0 : index
    %343 = vector.load %arg33[%c1_151, %c0_152] : memref<4x128xf32, #tpu.memory_space<vmem>>, vector<1x128xf32>
    %344 = vector.shape_cast %343 : vector<1x128xf32> to vector<128xf32>
    %cst_153 = arith.constant dense<0.000000e+00> : vector<12xf32>
    %345 = vector.multi_reduction <add>, %340, %cst_153 [1] : vector<12x128xf32> to vector<12xf32>
    %346 = vector.shape_cast %345 : vector<12xf32> to vector<12x1xf32>
    %cst_154 = arith.constant 1.280000e+02 : f32
    %347 = vector.broadcast %cst_154 : f32 to vector<12x1xf32>
    %348 = arith.divf %346, %347 : vector<12x1xf32>
    %349 = arith.mulf %340, %340 : vector<12x128xf32>
    %cst_155 = arith.constant dense<0.000000e+00> : vector<12xf32>
    %350 = vector.multi_reduction <add>, %349, %cst_155 [1] : vector<12x128xf32> to vector<12xf32>
    %351 = vector.shape_cast %350 : vector<12xf32> to vector<12x1xf32>
    %cst_156 = arith.constant 1.280000e+02 : f32
    %352 = vector.broadcast %cst_156 : f32 to vector<12x1xf32>
    %353 = arith.divf %351, %352 : vector<12x1xf32>
    %354 = arith.mulf %348, %348 : vector<12x1xf32>
    %355 = arith.subf %353, %354 : vector<12x1xf32>
    %cst_157 = arith.constant 0.000000e+00 : f32
    %356 = vector.broadcast %cst_157 : f32 to vector<12x1xf32>
    %357 = arith.maximumf %355, %356 : vector<12x1xf32>
    %358 = vector.broadcast %348 : vector<12x1xf32> to vector<12x128xf32>
    %359 = arith.subf %340, %358 : vector<12x128xf32>
    %cst_158 = arith.constant 9.99999974E-6 : f32
    %360 = vector.broadcast %cst_158 : f32 to vector<12x1xf32>
    %361 = arith.addf %357, %360 : vector<12x1xf32>
    %362 = math.rsqrt %361 : vector<12x1xf32>
    %363 = vector.broadcast %362 : vector<12x1xf32> to vector<12x128xf32>
    %364 = arith.mulf %359, %363 : vector<12x128xf32>
    %365 = vector.shape_cast %342 : vector<128xf32> to vector<1x128xf32>
    %366 = vector.broadcast %365 : vector<1x128xf32> to vector<12x128xf32>
    %367 = arith.mulf %364, %366 : vector<12x128xf32>
    %368 = vector.shape_cast %344 : vector<128xf32> to vector<1x128xf32>
    %369 = vector.broadcast %368 : vector<1x128xf32> to vector<12x128xf32>
    %370 = arith.addf %367, %369 : vector<12x128xf32>
    %371 = arith.truncf %370 : vector<12x128xf32> to vector<12x128xbf16>
    %c0_159 = arith.constant 0 : index
    %c0_160 = arith.constant 0 : index
    %372 = vector.load %arg28[%c0_159, %c0_160] : memref<128x256xbf16, #tpu.memory_space<vmem>>, vector<128x256xbf16>
    %cst_161 = arith.constant dense<0.000000e+00> : vector<12x256xf32>
    %373 = tpu.matmul %371, %372, %cst_161 {dimension_numbers = #tpu.dot_dimension_numbers<[1], [0], [0], [1], [0, 0, 1, 1], [], []>} : vector<12x128xbf16>, vector<128x256xbf16>, vector<12x256xf32> -> vector<12x256xf32>
    %c0_162 = arith.constant 0 : index
    %c0_163 = arith.constant 0 : index
    %374 = vector.load %arg29[%c0_162, %c0_163] : memref<1x256xf32, #tpu.memory_space<vmem>>, vector<1x256xf32>
    %375 = vector.broadcast %374 : vector<1x256xf32> to vector<12x256xf32>
    %376 = arith.addf %373, %375 : vector<12x256xf32>
    %cst_164 = arith.constant 0.000000e+00 : f32
    %377 = vector.broadcast %cst_164 : f32 to vector<12x256xf32>
    %378 = arith.maximumf %376, %377 : vector<12x256xf32>
    %379 = arith.truncf %378 : vector<12x256xf32> to vector<12x256xbf16>
    %c0_165 = arith.constant 0 : index
    %c0_166 = arith.constant 0 : index
    %380 = vector.load %arg30[%c0_165, %c0_166] : memref<256x128xbf16, #tpu.memory_space<vmem>>, vector<256x128xbf16>
    %cst_167 = arith.constant dense<0.000000e+00> : vector<12x128xf32>
    %381 = tpu.matmul %379, %380, %cst_167 {dimension_numbers = #tpu.dot_dimension_numbers<[1], [0], [0], [1], [0, 0, 1, 1], [], []>} : vector<12x256xbf16>, vector<256x128xbf16>, vector<12x128xf32> -> vector<12x128xf32>
    %c0_168 = arith.constant 0 : index
    %c0_169 = arith.constant 0 : index
    %382 = vector.load %arg31[%c0_168, %c0_169] : memref<1x128xf32, #tpu.memory_space<vmem>>, vector<1x128xf32>
    %383 = vector.broadcast %382 : vector<1x128xf32> to vector<12x128xf32>
    %384 = arith.addf %381, %383 : vector<12x128xf32>
    %385 = arith.addf %370, %384 : vector<12x128xf32>
    %c2_170 = arith.constant 2 : index
    %c0_171 = arith.constant 0 : index
    %386 = vector.load %arg32[%c2_170, %c0_171] : memref<4x128xf32, #tpu.memory_space<vmem>>, vector<1x128xf32>
    %387 = vector.shape_cast %386 : vector<1x128xf32> to vector<128xf32>
    %c2_172 = arith.constant 2 : index
    %c0_173 = arith.constant 0 : index
    %388 = vector.load %arg33[%c2_172, %c0_173] : memref<4x128xf32, #tpu.memory_space<vmem>>, vector<1x128xf32>
    %389 = vector.shape_cast %388 : vector<1x128xf32> to vector<128xf32>
    %cst_174 = arith.constant dense<0.000000e+00> : vector<12xf32>
    %390 = vector.multi_reduction <add>, %385, %cst_174 [1] : vector<12x128xf32> to vector<12xf32>
    %391 = vector.shape_cast %390 : vector<12xf32> to vector<12x1xf32>
    %cst_175 = arith.constant 1.280000e+02 : f32
    %392 = vector.broadcast %cst_175 : f32 to vector<12x1xf32>
    %393 = arith.divf %391, %392 : vector<12x1xf32>
    %394 = arith.mulf %385, %385 : vector<12x128xf32>
    %cst_176 = arith.constant dense<0.000000e+00> : vector<12xf32>
    %395 = vector.multi_reduction <add>, %394, %cst_176 [1] : vector<12x128xf32> to vector<12xf32>
    %396 = vector.shape_cast %395 : vector<12xf32> to vector<12x1xf32>
    %cst_177 = arith.constant 1.280000e+02 : f32
    %397 = vector.broadcast %cst_177 : f32 to vector<12x1xf32>
    %398 = arith.divf %396, %397 : vector<12x1xf32>
    %399 = arith.mulf %393, %393 : vector<12x1xf32>
    %400 = arith.subf %398, %399 : vector<12x1xf32>
    %cst_178 = arith.constant 0.000000e+00 : f32
    %401 = vector.broadcast %cst_178 : f32 to vector<12x1xf32>
    %402 = arith.maximumf %400, %401 : vector<12x1xf32>
    %403 = vector.broadcast %393 : vector<12x1xf32> to vector<12x128xf32>
    %404 = arith.subf %385, %403 : vector<12x128xf32>
    %cst_179 = arith.constant 9.99999974E-6 : f32
    %405 = vector.broadcast %cst_179 : f32 to vector<12x1xf32>
    %406 = arith.addf %402, %405 : vector<12x1xf32>
    %407 = math.rsqrt %406 : vector<12x1xf32>
    %408 = vector.broadcast %407 : vector<12x1xf32> to vector<12x128xf32>
    %409 = arith.mulf %404, %408 : vector<12x128xf32>
    %410 = vector.shape_cast %387 : vector<128xf32> to vector<1x128xf32>
    %411 = vector.broadcast %410 : vector<1x128xf32> to vector<12x128xf32>
    %412 = arith.mulf %409, %411 : vector<12x128xf32>
    %413 = vector.shape_cast %389 : vector<128xf32> to vector<1x128xf32>
    %414 = vector.broadcast %413 : vector<1x128xf32> to vector<12x128xf32>
    %415 = arith.addf %412, %414 : vector<12x128xf32>
    %c3 = arith.constant 3 : index
    %c0_180 = arith.constant 0 : index
    %416 = vector.load %arg32[%c3, %c0_180] : memref<4x128xf32, #tpu.memory_space<vmem>>, vector<1x128xf32>
    %417 = vector.shape_cast %416 : vector<1x128xf32> to vector<128xf32>
    %c3_181 = arith.constant 3 : index
    %c0_182 = arith.constant 0 : index
    %418 = vector.load %arg33[%c3_181, %c0_182] : memref<4x128xf32, #tpu.memory_space<vmem>>, vector<1x128xf32>
    %419 = vector.shape_cast %418 : vector<1x128xf32> to vector<128xf32>
    %cst_183 = arith.constant dense<0.000000e+00> : vector<12xf32>
    %420 = vector.multi_reduction <add>, %415, %cst_183 [1] : vector<12x128xf32> to vector<12xf32>
    %421 = vector.shape_cast %420 : vector<12xf32> to vector<12x1xf32>
    %cst_184 = arith.constant 1.280000e+02 : f32
    %422 = vector.broadcast %cst_184 : f32 to vector<12x1xf32>
    %423 = arith.divf %421, %422 : vector<12x1xf32>
    %424 = arith.mulf %415, %415 : vector<12x128xf32>
    %cst_185 = arith.constant dense<0.000000e+00> : vector<12xf32>
    %425 = vector.multi_reduction <add>, %424, %cst_185 [1] : vector<12x128xf32> to vector<12xf32>
    %426 = vector.shape_cast %425 : vector<12xf32> to vector<12x1xf32>
    %cst_186 = arith.constant 1.280000e+02 : f32
    %427 = vector.broadcast %cst_186 : f32 to vector<12x1xf32>
    %428 = arith.divf %426, %427 : vector<12x1xf32>
    %429 = arith.mulf %423, %423 : vector<12x1xf32>
    %430 = arith.subf %428, %429 : vector<12x1xf32>
    %cst_187 = arith.constant 0.000000e+00 : f32
    %431 = vector.broadcast %cst_187 : f32 to vector<12x1xf32>
    %432 = arith.maximumf %430, %431 : vector<12x1xf32>
    %433 = vector.broadcast %423 : vector<12x1xf32> to vector<12x128xf32>
    %434 = arith.subf %415, %433 : vector<12x128xf32>
    %cst_188 = arith.constant 9.99999974E-6 : f32
    %435 = vector.broadcast %cst_188 : f32 to vector<12x1xf32>
    %436 = arith.addf %432, %435 : vector<12x1xf32>
    %437 = math.rsqrt %436 : vector<12x1xf32>
    %438 = vector.broadcast %437 : vector<12x1xf32> to vector<12x128xf32>
    %439 = arith.mulf %434, %438 : vector<12x128xf32>
    %440 = vector.shape_cast %417 : vector<128xf32> to vector<1x128xf32>
    %441 = vector.broadcast %440 : vector<1x128xf32> to vector<12x128xf32>
    %442 = arith.mulf %439, %441 : vector<12x128xf32>
    %443 = vector.shape_cast %419 : vector<128xf32> to vector<1x128xf32>
    %444 = vector.broadcast %443 : vector<1x128xf32> to vector<12x128xf32>
    %445 = arith.addf %442, %444 : vector<12x128xf32>
    %c0_189 = arith.constant 0 : index
    %c0_190 = arith.constant 0 : index
    %c0_191 = arith.constant 0 : index
    %446 = vector.load %arg4[%c0_189, %c0_190, %c0_191] : memref<1x12x1xf32, #tpu.memory_space<vmem>>, vector<1x12x1xf32>
    %447 = vector.shape_cast %446 : vector<1x12x1xf32> to vector<12x1xf32>
    %448 = vector.broadcast %447 : vector<12x1xf32> to vector<12x128xf32>
    %449 = arith.mulf %445, %448 : vector<12x128xf32>
    %cst_192 = arith.constant dense<0.000000e+00> : vector<128xf32>
    %450 = vector.multi_reduction <add>, %449, %cst_192 [0] : vector<12x128xf32> to vector<128xf32>
    %451 = vector.shape_cast %450 : vector<128xf32> to vector<1x128xf32>
    %452 = vector.shape_cast %86 : vector<1x12xf32> to vector<1x1x12xf32>
    %cst_193 = arith.constant dense<0.000000e+00> : vector<1xf32>
    %453 = vector.multi_reduction <add>, %452, %cst_193 [1, 2] : vector<1x1x12xf32> to vector<1xf32>
    %454 = vector.shape_cast %453 : vector<1xf32> to vector<1x1x1xf32>
    %455 = vector.extract %454[0, 0, 0] : f32 from vector<1x1x1xf32>
    %cst_194 = arith.constant 1.000000e+00 : f32
    %456 = arith.maximumf %455, %cst_194 : f32
    %457 = vector.broadcast %456 : f32 to vector<1x128xf32>
    %458 = arith.divf %451, %457 : vector<1x128xf32>
    %459 = arith.truncf %458 : vector<1x128xf32> to vector<1x128xbf16>
    %cst_195 = arith.constant dense<0.000000e+00> : vector<1x128xf32>
    %460 = tpu.matmul %459, %30, %cst_195 {dimension_numbers = #tpu.dot_dimension_numbers<[1], [0], [0], [1], [0, 0, 1, 1], [], []>} : vector<1x128xbf16>, vector<128x128xbf16>, vector<1x128xf32> -> vector<1x128xf32>
    %461 = arith.negf %460 : vector<1x128xf32>
    %462 = math.exp %461 : vector<1x128xf32>
    %cst_196 = arith.constant 1.000000e+00 : f32
    %463 = vector.broadcast %cst_196 : f32 to vector<1x128xf32>
    %464 = arith.addf %463, %462 : vector<1x128xf32>
    %465 = arith.divf %463, %464 : vector<1x128xf32>
    %c0_197 = arith.constant 0 : index
    %c0_198 = arith.constant 0 : index
    %c0_199 = arith.constant 0 : index
    %466 = vector.load %arg34[%c0_197, %c0_198, %c0_199] : memref<1x1x128xf32, #tpu.memory_space<vmem>>, vector<1x1x128xf32>
    %467 = vector.shape_cast %466 : vector<1x1x128xf32> to vector<1x128xf32>
    %468 = vector.shape_cast %465 : vector<1x128xf32> to vector<1x1x128xf32>
    tpu.vector_store %arg34[%c0_197, %c0_198, %c0_199], %468 {strides = array<i32>} : memref<1x1x128xf32, #tpu.memory_space<vmem>>, vector<1x1x128xf32>,
    return
  }
  func.func @transform_0(%arg0: i32) -> (i32, i32, i32) {
    %c0_i32 = arith.constant 0 : i32
    %c0_i32_0 = arith.constant 0 : i32
    %c0_i32_1 = arith.constant 0 : i32
    return %arg0, %c0_i32, %c0_i32_0 : i32, i32, i32
  }
  func.func @transform_1(%arg0: i32) -> (i32, i32, i32) {
    %c0_i32 = arith.constant 0 : i32
    %c0_i32_0 = arith.constant 0 : i32
    %c0_i32_1 = arith.constant 0 : i32
    return %arg0, %c0_i32, %c0_i32_0 : i32, i32, i32
  }
  func.func @transform_2(%arg0: i32) -> (i32, i32, i32) {
    %c0_i32 = arith.constant 0 : i32
    %c0_i32_0 = arith.constant 0 : i32
    %c0_i32_1 = arith.constant 0 : i32
    return %arg0, %c0_i32, %c0_i32_0 : i32, i32, i32
  }
  func.func @transform_3(%arg0: i32) -> (i32, i32, i32) {
    %c0_i32 = arith.constant 0 : i32
    %c0_i32_0 = arith.constant 0 : i32
    %c0_i32_1 = arith.constant 0 : i32
    return %arg0, %c0_i32, %c0_i32_0 : i32, i32, i32
  }
  func.func @transform_4(%arg0: i32) -> (i32, i32) {
    %c0_i32 = arith.constant 0 : i32
    %c0_i32_0 = arith.constant 0 : i32
    %c0_i32_1 = arith.constant 0 : i32
    return %c0_i32, %c0_i32_0 : i32, i32
  }
  func.func @transform_5(%arg0: i32) -> (i32, i32) {
    %c0_i32 = arith.constant 0 : i32
    %c0_i32_0 = arith.constant 0 : i32
    %c0_i32_1 = arith.constant 0 : i32
    return %c0_i32, %c0_i32_0 : i32, i32
  }
  func.func @transform_6(%arg0: i32) -> (i32, i32) {
    %c0_i32 = arith.constant 0 : i32
    %c0_i32_0 = arith.constant 0 : i32
    %c0_i32_1 = arith.constant 0 : i32
    return %c0_i32, %c0_i32_0 : i32, i32
  }
  func.func @transform_7(%arg0: i32) -> (i32, i32) {
    %c0_i32 = arith.constant 0 : i32
    %c0_i32_0 = arith.constant 0 : i32
    %c0_i32_1 = arith.constant 0 : i32
    return %c0_i32, %c0_i32_0 : i32, i32
  }
  func.func @transform_8(%arg0: i32) -> (i32, i32) {
    %c0_i32 = arith.constant 0 : i32
    %c0_i32_0 = arith.constant 0 : i32
    %c0_i32_1 = arith.constant 0 : i32
    return %c0_i32, %c0_i32_0 : i32, i32
  }
  func.func @transform_9(%arg0: i32) -> (i32, i32) {
    %c0_i32 = arith.constant 0 : i32
    %c0_i32_0 = arith.constant 0 : i32
    %c0_i32_1 = arith.constant 0 : i32
    return %c0_i32, %c0_i32_0 : i32, i32
  }
  func.func @transform_10(%arg0: i32) -> (i32, i32) {
    %c0_i32 = arith.constant 0 : i32
    %c0_i32_0 = arith.constant 0 : i32
    %c0_i32_1 = arith.constant 0 : i32
    return %c0_i32, %c0_i32_0 : i32, i32
  }
  func.func @transform_11(%arg0: i32) -> (i32, i32) {
    %c0_i32 = arith.constant 0 : i32
    %c0_i32_0 = arith.constant 0 : i32
    %c0_i32_1 = arith.constant 0 : i32
    return %c0_i32, %c0_i32_0 : i32, i32
  }
  func.func @transform_12(%arg0: i32) -> (i32, i32) {
    %c0_i32 = arith.constant 0 : i32
    %c0_i32_0 = arith.constant 0 : i32
    %c0_i32_1 = arith.constant 0 : i32
    return %c0_i32, %c0_i32_0 : i32, i32
  }
  func.func @transform_13(%arg0: i32) -> (i32, i32) {
    %c0_i32 = arith.constant 0 : i32
    %c0_i32_0 = arith.constant 0 : i32
    %c0_i32_1 = arith.constant 0 : i32
    return %c0_i32, %c0_i32_0 : i32, i32
  }
  func.func @transform_14(%arg0: i32) -> (i32, i32, i32) {
    %c0_i32 = arith.constant 0 : i32
    %c0_i32_0 = arith.constant 0 : i32
    %c0_i32_1 = arith.constant 0 : i32
    %c0_i32_2 = arith.constant 0 : i32
    return %c0_i32, %c0_i32_0, %c0_i32_1 : i32, i32, i32
  }
  func.func @transform_15(%arg0: i32) -> (i32, i32) {
    %c0_i32 = arith.constant 0 : i32
    %c0_i32_0 = arith.constant 0 : i32
    %c0_i32_1 = arith.constant 0 : i32
    return %c0_i32, %c0_i32_0 : i32, i32
  }
  func.func @transform_16(%arg0: i32) -> (i32, i32) {
    %c0_i32 = arith.constant 0 : i32
    %c0_i32_0 = arith.constant 0 : i32
    %c0_i32_1 = arith.constant 0 : i32
    return %c0_i32, %c0_i32_0 : i32, i32
  }
  func.func @transform_17(%arg0: i32) -> (i32, i32) {
    %c0_i32 = arith.constant 0 : i32
    %c0_i32_0 = arith.constant 0 : i32
    %c0_i32_1 = arith.constant 0 : i32
    return %c0_i32, %c0_i32_0 : i32, i32
  }
  func.func @transform_18(%arg0: i32) -> (i32, i32) {
    %c0_i32 = arith.constant 0 : i32
    %c0_i32_0 = arith.constant 0 : i32
    %c0_i32_1 = arith.constant 0 : i32
    return %c0_i32, %c0_i32_0 : i32, i32
  }
  func.func @transform_19(%arg0: i32) -> (i32, i32) {
    %c0_i32 = arith.constant 0 : i32
    %c0_i32_0 = arith.constant 0 : i32
    %c0_i32_1 = arith.constant 0 : i32
    return %c0_i32, %c0_i32_0 : i32, i32
  }
  func.func @transform_20(%arg0: i32) -> (i32, i32) {
    %c0_i32 = arith.constant 0 : i32
    %c0_i32_0 = arith.constant 0 : i32
    %c0_i32_1 = arith.constant 0 : i32
    return %c0_i32, %c0_i32_0 : i32, i32
  }
  func.func @transform_21(%arg0: i32) -> (i32, i32) {
    %c0_i32 = arith.constant 0 : i32
    %c0_i32_0 = arith.constant 0 : i32
    %c0_i32_1 = arith.constant 0 : i32
    return %c0_i32, %c0_i32_0 : i32, i32
  }
  func.func @transform_22(%arg0: i32) -> (i32, i32) {
    %c0_i32 = arith.constant 0 : i32
    %c0_i32_0 = arith.constant 0 : i32
    %c0_i32_1 = arith.constant 0 : i32
    return %c0_i32, %c0_i32_0 : i32, i32
  }
  func.func @transform_23(%arg0: i32) -> (i32, i32) {
    %c0_i32 = arith.constant 0 : i32
    %c0_i32_0 = arith.constant 0 : i32
    %c0_i32_1 = arith.constant 0 : i32
    return %c0_i32, %c0_i32_0 : i32, i32
  }
  func.func @transform_24(%arg0: i32) -> (i32, i32) {
    %c0_i32 = arith.constant 0 : i32
    %c0_i32_0 = arith.constant 0 : i32
    %c0_i32_1 = arith.constant 0 : i32
    return %c0_i32, %c0_i32_0 : i32, i32
  }
  func.func @transform_25(%arg0: i32) -> (i32, i32) {
    %c0_i32 = arith.constant 0 : i32
    %c0_i32_0 = arith.constant 0 : i32
    %c0_i32_1 = arith.constant 0 : i32
    return %c0_i32, %c0_i32_0 : i32, i32
  }
  func.func @transform_26(%arg0: i32) -> (i32, i32) {
    %c0_i32 = arith.constant 0 : i32
    %c0_i32_0 = arith.constant 0 : i32
    %c0_i32_1 = arith.constant 0 : i32
    return %c0_i32, %c0_i32_0 : i32, i32
  }
  func.func @transform_27(%arg0: i32) -> (i32, i32) {
    %c0_i32 = arith.constant 0 : i32
    %c0_i32_0 = arith.constant 0 : i32
    %c0_i32_1 = arith.constant 0 : i32
    return %c0_i32, %c0_i32_0 : i32, i32
  }
  func.func @transform_28(%arg0: i32) -> (i32, i32) {
    %c0_i32 = arith.constant 0 : i32
    %c0_i32_0 = arith.constant 0 : i32
    %c0_i32_1 = arith.constant 0 : i32
    return %c0_i32, %c0_i32_0 : i32, i32
  }
  func.func @transform_29(%arg0: i32) -> (i32, i32) {
    %c0_i32 = arith.constant 0 : i32
    %c0_i32_0 = arith.constant 0 : i32
    %c0_i32_1 = arith.constant 0 : i32
    return %c0_i32, %c0_i32_0 : i32, i32
  }
  func.func @transform_30(%arg0: i32) -> (i32, i32) {
    %c0_i32 = arith.constant 0 : i32
    %c0_i32_0 = arith.constant 0 : i32
    %c0_i32_1 = arith.constant 0 : i32
    return %c0_i32, %c0_i32_0 : i32, i32
  }
  func.func @transform_31(%arg0: i32) -> (i32, i32) {
    %c0_i32 = arith.constant 0 : i32
    %c0_i32_0 = arith.constant 0 : i32
    %c0_i32_1 = arith.constant 0 : i32
    return %c0_i32, %c0_i32_0 : i32, i32
  }
  func.func @transform_32(%arg0: i32) -> (i32, i32) {
    %c0_i32 = arith.constant 0 : i32
    %c0_i32_0 = arith.constant 0 : i32
    %c0_i32_1 = arith.constant 0 : i32
    return %c0_i32, %c0_i32_0 : i32, i32
  }
  func.func @transform_33(%arg0: i32) -> (i32, i32, i32) {
    %c0_i32 = arith.constant 0 : i32
    %c0_i32_0 = arith.constant 0 : i32
    %c0_i32_1 = arith.constant 0 : i32
    return %arg0, %c0_i32, %c0_i32_0 : i32, i32, i32
  }
}

</mosaic_0001>

<bundles_post_ra>
// kernel: pointsam_forward.1
= control target key start
LH: loop header
LB: loop body
LE: loop exit
PB: predicated region body
PF: predicated region fallthrough
CT: control target
= control target key end

     0   :  { %s6897_s6 = smov 1   ;;  %s6898_s10 = smov 2   ;;  %s8145_s0 = inlined_call_operand.smem [shape: u32[34], index: -1, kind: input, shape index: {}] }
   0x1   :  { %s6965_s5 = sld [smem:[%s8145_s0]]   ;;  %s6899_s14 = smov 3  }
   0x2   :  { %s6970_s9 = sld [smem:[%s8145_s0 + %s6897_s6]]   ;;  %s6900_s18 = smov 4  }
   0x3   :  { %s6975_s13 = sld [smem:[%s8145_s0 + %s6898_s10]]   ;;  %s6901_s22 = smov 5  }
   0x4   :  { %s6980_s17 = sld [smem:[%s8145_s0 + %s6899_s14]]   ;;  %s6902_s26 = smov 6  }
   0x5   :  { %s6985_s21 = sld [smem:[%s8145_s0 + %s6900_s18]]   ;;  %s6903_s30 = smov 7  }
   0x6   :  { %s6990_s25 = sld [smem:[%s8145_s0 + %s6901_s22]]   ;;  %s6904_s4 = smov 8  }
   0x7   :  { %8183 = sst [smem:[#allocation37_spill]] %s6965_s5  ;;  %s6905_s10 = smov 9  }
   0x8   :  { %8184 = sst [smem:[#allocation38_spill]] %s6970_s9  ;;  %s6906_s15 = smov 10  }
   0x9   :  { %8185 = sst [smem:[#allocation39_spill]] %s6975_s13  ;;  %s6907_s20 = smov 11  }
   0xa   :  { %8186 = sst [smem:[#allocation40_spill]] %s6980_s17  ;;  %s6909_s1 = smov 13  }
   0xb   :  { %s6995_s29 = sld [smem:[%s8145_s0 + %s6902_s26]]   ;;  %s6908_s26 = smov 12  }
   0xc   :  { %s7000_s3 = sld [smem:[%s8145_s0 + %s6903_s30]]   ;;  %s6910_s7 = smov 14  }
   0xd   :  { %s7005_s8 = sld [smem:[%s8145_s0 + %s6904_s4]]   ;;  %s6912_s22 = smov 16  }
   0xe   :  { %s7010_s14 = sld [smem:[%s8145_s0 + %s6905_s10]]   ;;  %s6913_s28 = smov 17  }
   0xf   :  { %s7015_s19 = sld [smem:[%s8145_s0 + %s6906_s15]]   ;;  %s6911_s15 = smov 15  }
  0x10   :  { %s7020_s24 = sld [smem:[%s8145_s0 + %s6907_s20]]  }
  0x11   :  { %8187 = sst [smem:[#allocation41_spill]] %s6995_s29 }
  0x12   :  { %8188 = sst [smem:[#allocation42_spill]] %s7000_s3 }
  0x13   :  { %8189 = sst [smem:[#allocation43_spill]] %s7005_s8 }
  0x14   :  { %8190 = sst [smem:[#allocation44_spill]] %s7010_s14 }
  0x15   :  { %8191 = sst [smem:[#allocation45_spill]] %s7015_s19 }
  0x16   :  { %s7025_s30 = sld [smem:[%s8145_s0 + %s6908_s26]]  }
  0x17   :  { %s7030_s6 = sld [smem:[%s8145_s0 + %s6909_s1]]  }
  0x18   :  { %s7035_s12 = sld [smem:[%s8145_s0 + %s6910_s7]]   ;;  %s6914_s7 = smov 18  }
  0x19   :  { %s7040_s20 = sld [smem:[%s8145_s0 + %s6911_s15]]   ;;  %s6915_s15 = smov 19  }
  0x1a   :  { %s7045_s27 = sld [smem:[%s8145_s0 + %s6912_s22]]   ;;  %s6916_s22 = smov 20  }
  0x1b   :  { %s7050_s4 = sld [smem:[%s8145_s0 + %s6913_s28]]   ;;  %s6917_s28 = smov 21  }
  0x1c   :  { %8192 = sst [smem:[#allocation46_spill]] %s7025_s30 }
  0x1d   :  { %8193 = sst [smem:[#allocation47_spill]] %s7030_s6 }
  0x1e   :  { %8194 = sst [smem:[#allocation48_spill]] %s7035_s12 }
  0x1f   :  { %8195 = sst [smem:[#allocation49_spill]] %s7040_s20 }
  0x20   :  { %s7055_s17 = sld [smem:[%s8145_s0 + %s6914_s7]]   ;;  %s6918_s7 = smov 22  }
  0x21   :  { %8196 = sst [smem:[#allocation50_spill]] %s7050_s4 }
  0x22   :  { %s7060_s13 = sld [smem:[%s8145_s0 + %s6915_s15]]   ;;  %s6919_s15 = smov 23  }
  0x23   :  { %s7065_s12 = sld [smem:[%s8145_s0 + %s6916_s22]]   ;;  %s6920_s22 = smov 24  }
  0x24   :  { %s7070_s4 = sld [smem:[%s8145_s0 + %s6917_s28]]   ;;  %s6921_s28 = smov 25  }
  0x25   :  { %s7075_s6 = sld [smem:[%s8145_s0 + %s6918_s7]]   ;;  %s6922_s7 = smov 26  }
  0x26   :  { %s7085_s20 = sld [smem:[%s8145_s0 + %s6920_s22]]   ;;  %s6924_s22 = smov 28  }
  0x27   :  { %s7090_s19 = sld [smem:[%s8145_s0 + %s6921_s28]]   ;;  %s6925_s28 = smov 29  }
  0x28   :  { %8197 = sst [smem:[#allocation51_spill]] %s7060_s13 }
  0x29   :  { %8198 = sst [smem:[#allocation52_spill]] %s7065_s12 }
  0x2a   :  { %8199 = sst [smem:[#allocation53_spill]] %s7070_s4 }
  0x2b   :  { %8200 = sst [smem:[#allocation54_spill]] %s7075_s6 }
  0x2c   :  { %s7080_s13 = sld [smem:[%s8145_s0 + %s6919_s15]]   ;;  %s6923_s15 = smov 27  }
  0x2d   :  { %8202 = sst [smem:[#allocation56_spill]] %s7085_s20 }
  0x2e   :  { %s7095_s30 = sld [smem:[%s8145_s0 + %s6922_s7]]   ;;  %s6926_s7 = smov 30  }
  0x2f   :  { %s7105_s20 = sld [smem:[%s8145_s0 + %s6924_s22]]   ;;  %s6928_s22 = smov 32  }
  0x30   :  { %s7110_s14 = sld [smem:[%s8145_s0 + %s6925_s28]]   ;;  %s6929_s28 = smov 33  }
  0x31   :  { %s7115_s29 = sld [smem:[%s8145_s0 + %s6926_s7]]  }
  0x32   :  { %8201 = sst [smem:[#allocation55_spill]] %s7080_s13 }
  0x33   :  { %s7100_s13 = sld [smem:[%s8145_s0 + %s6923_s15]]   ;;  %s6927_s15 = smov 31  }
  0x34   :  { %s7125_s5 = sld [smem:[%s8145_s0 + %s6928_s22]]  }
  0x36   :  { %8204 = sst [smem:[#allocation58_spill]] %s7110_s14 }
  0x37   :  { %s7130_s14 = sld [smem:[%s8145_s0 + %s6929_s28]]  }
  0x39   :  { %8203 = sst [smem:[#allocation57_spill]] %s7100_s13 }
  0x3a   :  { %s7120_s13 = sld [smem:[%s8145_s0 + %s6927_s15]]  }
  0x3b   :  { %8206 = sst [smem:[#allocation60_spill]] %s7125_s5 }
  0x3d   :  { %8207 = sst [smem:[#allocation61_spill]] %s7130_s14 }
  0x40   :  { %8205 = sst [smem:[#allocation59_spill]] %s7120_s13 }
  0x41   :  { %72 = vsyncpa [#allocation5], 0 }
  0x42   :  { %74 = vsyncpa [#allocation5 + $0x1], 0 }
  0x43   :  { %75 = vsyncpa [#allocation8], 0 }
  0x44   :  { %76 = vsyncpa [#allocation11], 0 }
  0x45   :  { %77 = vsyncpa [#allocation14], 0 }
  0x46   :  { %78 = vsyncpa [#allocation17], 0 }
  0x47   :  { %79 = vsyncpa [#allocation20], 0 }
  0x48   :  { %80 = vsyncpa [#allocation23], 0 }
  0x49   :  { %81 = vsyncpa [#allocation26], 0 }
  0x4a   :  { %82 = vsyncpa [#allocation6], 0 }
  0x4b   :  { %84 = vsyncpa [#allocation6 + $0x1], 0  ;;  %s7132_s7 = smov 0   ;;  %s7134_s10 = smov 0  }
  0x4c   :  { %s7136_s11 = smov 0   ;;  %s7138_s15 = smov 0  }
  0x4d LB: > { %s8208_s9 = sld [smem:[#allocation38_spill]]  ;;  %s6930_s0 = smov [#allocation7]   ;;  %s6883_s7 = sphi %s7132_s7, %s8266_s7   ;;  %s6895_s15 = sphi %s7138_s15, %s8269_s15   ;;  %s6891_s11 = sphi %s7136_s11, %s8268_s11   ;;  %s6887_s10 = sphi %s7134_s10, %s8267_s10  }
  0x4e   : > { %s858_s16 = sshll.u32 %s6930_s0, 4  ;;  %s7153_s18 = sadd.s32 4294967295, %s6895_s15   ;;  %s859_s16 = int_to_ptr.vmem [resolvable:$true] %s858_s16 }
  0x4f   : > { %p5262_p0 = scmp.ge.s32.totalorder %s6895_s15, 1  ;;  %p8162_p1 = scmp.eq.s32.totalorder %s7153_s18, 0 }
  0x50   : > { %p834_p2 = scmp.lt.s32.totalorder %s6895_s15, 3  ;;  %s6931_s23 = smov [#allocation10]  }
  0x51   : > { %s901_s26 = sshll.u32 %s6931_s23, 4  ;;  %s6932_s1 = smov [#allocation13]   ;;  %s902_s26 = int_to_ptr.vmem [resolvable:$true] %s901_s26 }
  0x52   : > { %p7158_p3 = pnand %p5262_p0, %p834_p2  ;;  %s929_s2 = sshll.u32 %s6932_s1, 4  ;;  %s7171_s2 = int_to_ptr.vmem [resolvable:$true] %s929_s2 }
  0x53   : > { %s6448_s14 = scalar_lea.vmem %s859_s16, 512  ;;  %p6456_p11 = scmp.lt.s32.totalorder %s859_s16, %s859_s16 }
  0x54   : > { %s8209_s22 = scalar_select %p7158_p3, 1, 0 }
  0x55   : > { %p6023_p5 = pneg %p7158_p3  ;;  %p6449_p8 = scmp.ne.s32.totalorder %s859_s16, %s6448_s14 }
  0x56   : > { %p6457_p12 = scmp.lt.s32.totalorder %s6448_s14, %s6448_s14 }
  0x57   : > { %p7167_p6 = pnand %p6023_p5, %p8162_p1 }
  0x58   : > { %p6458_p13 = por %p6457_p12, %p6456_p11 }
  0x59   : > { %p7175_p7 = pneg %p7167_p6 }
  0x5b   : > { %p6451_p9 = pnand %p6449_p8, %p7175_p7 }
  0x5d   : > { %p6452_p10 = pneg %p6451_p9 }
  0x5f   : > { %p6459_p0 = pnand %p6458_p13, %p6452_p10 }
  0x61   : > { %6462 = shalt.err (!%p6459_p0)
}
  0x62   : > { %s8158_s23 = smov 64   ;;  %s8212_s8 = sld [smem:[#allocation43_spill]] }
  0x63   : > { %s8160_s1 = smov 4   ;;  %s6474_s3 = scalar_lea.vmem %s902_s26, 32 }
  0x64   : > { %p6475_p2 = scmp.ne.s32.totalorder %s902_s26, %s6474_s3  ;;  %p6482_p9 = scmp.lt.s32.totalorder %s902_s26, %s902_s26 }
  0x65   : > { %p6483_p4 = scmp.lt.s32.totalorder %s6474_s3, %s6474_s3 }
  0x66   : > { %p6477_p5 = pnand %p6475_p2, %p7175_p7 }
  0x67   : > { %p6484_p11 = por %p6483_p4, %p6482_p9 }
  0x68   : > { %6026 = dma.hbm_to_vmem [thread:$0]  (!%p7167_p6), %s8212_s8, 512, %s859_s16, [#allocation8], %s8158_s23, %s8158_s23, %s8160_s1  }
  0x69   : > { %p6478_p8 = pneg %p6477_p5 }
  0x6b   : > { %p6485_p10 = pnand %p6484_p11, %p6478_p8 }
  0x6d   : > { %6488 = shalt.err (!%p6485_p10)
}
  0x6e   : > { %6032 = dma.hbm_to_vmem [thread:$0]  (!%p7167_p6), %s7045_s27, 32, %s902_s26, [#allocation11]  }
  0x6f   : > { %s6500_s14 = scalar_lea.vmem %s7171_s2, 16  ;;  %s6507_s16 = scalar_lea.vmem %s7171_s2, 32 }
  0x70   : > { %p6501_p12 = scmp.ne.s32.totalorder %s7171_s2, %s6500_s14  ;;  %p6508_p2 = scmp.lt.s32.totalorder %s7171_s2, %s7171_s2 }
  0x71   : > { %p6509_p4 = scmp.lt.s32.totalorder %s6507_s16, %s6500_s14 }
  0x72   : > { %p6503_p13 = pnand %p6501_p12, %p7175_p7 }
  0x73   : > { %p6510_p5 = por %p6509_p4, %p6508_p2 }
  0x74   : > { %p6504_p0 = pneg %p6503_p13 }
  0x76   : > { %p6511_p8 = pnand %p6510_p5, %p6504_p0 }
  0x78   : > { %6514 = shalt.err (!%p6511_p8)
}
  0x79   : > { %s8213_s12 = sld [smem:[#allocation52_spill]]  ;;  %s6935_s3 = smov [#allocation16]  }
  0x7a   : > { %s953_s26 = sshll.u32 %s6935_s3, 4  ;;  %s6936_s23 = smov [#allocation19]   ;;  %s954_s26 = int_to_ptr.vmem [resolvable:$true] %s953_s26 }
  0x7b   : > { %s983_s1 = sshll.u32 %s6936_s23, 4  ;;  %s6526_s8 = scalar_lea.vmem %s954_s26, 16  ;;  %s984_s1 = int_to_ptr.vmem [resolvable:$true] %s983_s1 }
  0x7c   : > { %p6527_p9 = scmp.ne.s32.totalorder %s954_s26, %s6526_s8  ;;  %s6533_s14 = scalar_lea.vmem %s954_s26, 32 }
  0x7d   : > { %p6534_p12 = scmp.lt.s32.totalorder %s954_s26, %s954_s26  ;;  %p6535_p13 = scmp.lt.s32.totalorder %s6533_s14, %s6526_s8 }
  0x7e   : > { %p6529_p11 = pnand %p6527_p9, %p7175_p7 }
  0x7f   : > { %6038 = dma.hbm_to_vmem [thread:$0]  (!%p7167_p6), %s8213_s12, 16, %s7171_s2, [#allocation14]  }
  0x80   : > { %p6530_p10 = pneg %p6529_p11  ;;  %p6536_p0 = por %p6535_p13, %p6534_p12 }
  0x82   : > { %p6537_p2 = pnand %p6536_p0, %p6530_p10 }
  0x84   : > { %6540 = shalt.err (!%p6537_p2)
}
  0x85   : > { %s8214_s6 = sld [smem:[#allocation54_spill]]  ;;  %s6552_s2 = scalar_lea.vmem %s984_s1, 16 }
  0x86   : > { %p6553_p4 = scmp.ne.s32.totalorder %s984_s1, %s6552_s2  ;;  %s6559_s23 = scalar_lea.vmem %s984_s1, 32 }
  0x87   : > { %p6560_p9 = scmp.lt.s32.totalorder %s984_s1, %s984_s1  ;;  %p6561_p11 = scmp.lt.s32.totalorder %s6559_s23, %s6552_s2 }
  0x88   : > { %p6555_p5 = pnand %p6553_p4, %p7175_p7 }
  0x89   : > { %p6562_p1 = por %p6561_p11, %p6560_p9 }
  0x8a   : > { %p6556_p8 = pneg %p6555_p5 }
  0x8b   : > { %6044 = dma.hbm_to_vmem [thread:$0]  (!%p7167_p6), %s8214_s6, 16, %s954_s26, [#allocation17]  }
  0x8c   : > { %p6563_p3 = pnand %p6562_p1, %p6556_p8 }
  0x8e   : > { %6566 = shalt.err (!%p6563_p3)
}
  0x8f   : > { %6050 = dma.hbm_to_vmem [thread:$0]  (!%p7167_p6), %s7095_s30, 16, %s984_s1, [#allocation20]  }
  0x90   : > { %s6937_s8 = smov [#allocation22]   ;;  %s6938_s3 = smov [#allocation9]  }
  0x91   : > { %s1011_s16 = sshll.u32 %s6937_s8, 4  ;;  %s878_s26 = sshll.u32 %s6938_s3, 4  ;;  %s1012_s16 = int_to_ptr.vmem [resolvable:$true] %s1011_s16  ;;  %s879_s26 = int_to_ptr.vmem [resolvable:$true] %s878_s26 }
  0x92   : > { %s6578_s14 = scalar_lea.vmem %s1012_s16, 16  ;;  %s6585_s6 = scalar_lea.vmem %s1012_s16, 32 }
  0x93   : > { %p6579_p10 = scmp.ne.s32.totalorder %s1012_s16, %s6578_s14  ;;  %p6586_p0 = scmp.lt.s32.totalorder %s1012_s16, %s1012_s16 }
  0x94   : > { %p6587_p2 = scmp.lt.s32.totalorder %s6585_s6, %s6578_s14 }
  0x95   : > { %p6581_p12 = pnand %p6579_p10, %p7175_p7 }
  0x96   : > { %p6588_p1 = por %p6587_p2, %p6586_p0 }
  0x97   : > { %p6582_p13 = pneg %p6581_p12 }
  0x99   : > { %p6589_p3 = pnand %p6588_p1, %p6582_p13 }
  0x9b   : > { %6592 = shalt.err (!%p6589_p3)
}
  0x9c   : > { %6056 = dma.hbm_to_vmem [thread:$0]  (!%p7167_p6), %s7115_s29, 16, %s1012_s16, [#allocation23]  }
  0x9d   : > { %s6604_s1 = scalar_lea.vmem %s879_s26, 16  ;;  %s6611_s2 = scalar_lea.vmem %s879_s26, 32 }
  0x9e   : > { %p6605_p4 = scmp.ne.s32.totalorder %s879_s26, %s6604_s1  ;;  %p6612_p9 = scmp.lt.s32.totalorder %s879_s26, %s879_s26 }
  0x9f   : > { %p6613_p11 = scmp.lt.s32.totalorder %s6611_s2, %s6604_s1 }
  0xa0   : > { %p6607_p5 = pnand %p6605_p4, %p7175_p7 }
  0xa1   : > { %p6614_p10 = por %p6613_p11, %p6612_p9 }
  0xa2   : > { %p6608_p8 = pneg %p6607_p5 }
  0xa4   : > { %p6615_p12 = pnand %p6614_p10, %p6608_p8 }
  0xa6   : > { %6618 = shalt.err (!%p6615_p12)
}
  0xa7   : > { %6029 = dma.hbm_to_vmem [thread:$0]  (!%p7167_p6), %s7020_s24, 16, %s879_s26, [#allocation8]  }
  0xa8   : > { %s6939_s6 = smov [#allocation12]   ;;  %s6940_s8 = smov [#allocation15]  }
  0xa9   : > { %s915_s23 = sshll.u32 %s6939_s6, 4  ;;  %s939_s16 = sshll.u32 %s6940_s8, 4  ;;  %s916_s23 = int_to_ptr.vmem [resolvable:$true] %s915_s23  ;;  %s940_s16 = int_to_ptr.vmem [resolvable:$true] %s939_s16 }
  0xaa   : > { %s6630_s3 = scalar_lea.vmem %s916_s23, 16  ;;  %s6637_s14 = scalar_lea.vmem %s916_s23, 32 }
  0xab   : > { %p6631_p13 = scmp.ne.s32.totalorder %s916_s23, %s6630_s3  ;;  %p6638_p1 = scmp.lt.s32.totalorder %s916_s23, %s916_s23 }
  0xac   : > { %p6639_p3 = scmp.lt.s32.totalorder %s6637_s14, %s6630_s3 }
  0xad   : > { %p6633_p0 = pnand %p6631_p13, %p7175_p7 }
  0xae   : > { %p6640_p4 = por %p6639_p3, %p6638_p1 }
  0xaf   : > { %p6634_p2 = pneg %p6633_p0 }
  0xb1   : > { %p6641_p5 = pnand %p6640_p4, %p6634_p2 }
  0xb3   : > { %6644 = shalt.err (!%p6641_p5)
}
  0xb4   : > { %6035 = dma.hbm_to_vmem [thread:$0]  (!%p7167_p6), %s7055_s17, 16, %s916_s23, [#allocation11]  }
  0xb5   : > { %s6656_s26 = scalar_lea.vmem %s940_s16, 1024  ;;  %p6664_p10 = scmp.lt.s32.totalorder %s940_s16, %s940_s16 }
  0xb6   : > { %p6657_p8 = scmp.ne.s32.totalorder %s940_s16, %s6656_s26  ;;  %p6665_p12 = scmp.lt.s32.totalorder %s6656_s26, %s6656_s26 }
  0xb8   : > { %p6659_p9 = pnand %p6657_p8, %p7175_p7  ;;  %p6666_p13 = por %p6665_p12, %p6664_p10 }
  0xba   : > { %p6660_p11 = pneg %p6659_p9 }
  0xbc   : > { %p6667_p0 = pnand %p6666_p13, %p6660_p11 }
  0xbe   : > { %6670 = shalt.err (!%p6667_p0)
}
  0xbf   : > { %s8215_s1 = smov 4   ;;  %s8216_s2 = smov 64  }
  0xc0   : > { %s8217_s4 = sld [smem:[#allocation53_spill]]  ;;  %s6941_s6 = smov [#allocation18]  }
  0xc1   : > { %s969_s23 = sshll.u32 %s6941_s6, 4  ;;  %s6942_s8 = smov [#allocation21]   ;;  %s970_s23 = int_to_ptr.vmem [resolvable:$true] %s969_s23 }
  0xc2   : > { %s997_s3 = sshll.u32 %s6942_s8, 4  ;;  %s6682_s14 = scalar_lea.vmem %s970_s23, 1024  ;;  %s998_s3 = int_to_ptr.vmem [resolvable:$true] %s997_s3 }
  0xc3   : > { %p6683_p2 = scmp.ne.s32.totalorder %s970_s23, %s6682_s14  ;;  %p6690_p4 = scmp.lt.s32.totalorder %s970_s23, %s970_s23 }
  0xc4   : > { %p6691_p5 = scmp.lt.s32.totalorder %s6682_s14, %s6682_s14 }
  0xc5   : > { %p6685_p1 = pnand %p6683_p2, %p7175_p7 }
  0xc6   : > { %6041 = dma.hbm_to_vmem [thread:$0]  (!%p7167_p6), %s8217_s4, 1024, %s940_s16, [#allocation14], %s8216_s2, %s8216_s2, %s8215_s1  }
  0xc7   : > { %p6686_p3 = pneg %p6685_p1  ;;  %p6692_p8 = por %p6691_p5, %p6690_p4 }
  0xc9   : > { %p6693_p9 = pnand %p6692_p8, %p6686_p3 }
  0xcb   : > { %6696 = shalt.err (!%p6693_p9)
}
  0xcc   : > { %6047 = dma.hbm_to_vmem [thread:$0]  (!%p7167_p6), %s7090_s19, 1024, %s970_s23, [#allocation17], %s8216_s2, %s8216_s2, %s8215_s1  }
  0xcd   : > { %s6708_s16 = scalar_lea.vmem %s998_s3, 32  ;;  %p6716_p13 = scmp.lt.s32.totalorder %s998_s3, %s998_s3 }
  0xce   : > { %p6709_p11 = scmp.ne.s32.totalorder %s998_s3, %s6708_s16  ;;  %p6717_p0 = scmp.lt.s32.totalorder %s6708_s16, %s6708_s16 }
  0xd0   : > { %p6711_p10 = pnand %p6709_p11, %p7175_p7  ;;  %p6718_p2 = por %p6717_p0, %p6716_p13 }
  0xd2   : > { %p6712_p12 = pneg %p6711_p10 }
  0xd4   : > { %p6719_p1 = pnand %p6718_p2, %p6712_p12 }
  0xd6   : > { %6722 = shalt.err (!%p6719_p1)
}
  0xd7   : > { %6053 = dma.hbm_to_vmem [thread:$0]  (!%p7167_p6), %s7105_s20, 32, %s998_s3, [#allocation20]  }
  0xd8   : > { %s6943_s26 = smov [#allocation24]   ;;  %s6944_s1 = smov [#allocation25]  }
  0xd9   : > { %s1022_s6 = sshll.u32 %s6943_s26, 4  ;;  %s1033_s2 = sshll.u32 %s6944_s1, 4  ;;  %s1023_s6 = int_to_ptr.vmem [resolvable:$true] %s1022_s6  ;;  %s1034_s2 = int_to_ptr.vmem [resolvable:$true] %s1033_s2 }
  0xda   : > { %s6734_s23 = scalar_lea.vmem %s1023_s6, 64  ;;  %p6742_p8 = scmp.lt.s32.totalorder %s1023_s6, %s1023_s6 }
  0xdb   : > { %p6735_p3 = scmp.ne.s32.totalorder %s1023_s6, %s6734_s23  ;;  %p6743_p9 = scmp.lt.s32.totalorder %s6734_s23, %s6734_s23 }
  0xdd   : > { %p6737_p4 = pnand %p6735_p3, %p7175_p7  ;;  %p6744_p11 = por %p6743_p9, %p6742_p8 }
  0xdf   : > { %p6738_p5 = pneg %p6737_p4 }
  0xe1   : > { %p6745_p10 = pnand %p6744_p11, %p6738_p5 }
  0xe3   : > { %6748 = shalt.err (!%p6745_p10)
}
  0xe4   : > { %s8218_s13 = sld [smem:[#allocation59_spill]]  ;;  %s6760_s8 = scalar_lea.vmem %s1034_s2, 64 }
  0xe5   : > { %p6761_p12 = scmp.ne.s32.totalorder %s1034_s2, %s6760_s8  ;;  %p6768_p2 = scmp.lt.s32.totalorder %s1034_s2, %s1034_s2 }
  0xe6   : > { %p6769_p1 = scmp.lt.s32.totalorder %s6760_s8, %s6760_s8 }
  0xe7   : > { %p6763_p13 = pnand %p6761_p12, %p7175_p7 }
  0xe8   : > { %p6770_p3 = por %p6769_p1, %p6768_p2 }
  0xe9   : > { %p6764_p0 = pneg %p6763_p13 }
  0xea   : > { %6059 = dma.hbm_to_vmem [thread:$0]  (!%p7167_p6), %s8218_s13, 64, %s1023_s6, [#allocation23]  }
  0xeb   : > { %p6771_p4 = pnand %p6770_p3, %p6764_p0 }
  0xed   : > { %6774 = shalt.err (!%p6771_p4)
}
  0xee   : > { %s8219_s5 = sld [smem:[#allocation60_spill]]  ;;  %s5261_s0 = sadd.s32 4294967294, %s6895_s15  }
  0xef   : > { %s7261_s3 = sadd.s32 1, %s6895_s15   ;;  %s123_s28 = sadd.s32 1, %s6891_s11 }
  0xf0   : > { %s120_s14 = ssub.s32 %s6895_s15, %s7261_s3  ;;  %p130_p7 = scmp.ne.s32.totalorder %s6891_s11, %s6887_s10 }
  0xf1   : > { %p121_p5 = scmp.eq.s32.totalorder %s120_s14, 0  ;;  %p131_p8 = scmp.eq.s32.totalorder %s6895_s15, 0 }
  0xf2   : > { %p136_p9 = scmp.ne.s32.totalorder %s6887_s10, %s6883_s7  ;;  %p821_p11 = scmp.eq.s32.totalorder %s7153_s18, 1 }
  0xf3   : > { %s7273_s16 = scalar_select %p121_p5, %s6891_s11, %s123_s28  }
  0xf4   : > { %6062 = dma.hbm_to_vmem [thread:$0]  (!%p7167_p6), %s8219_s5, 64, %s1034_s2, [#allocation26]  }
  0xf5   : > { %p132_p10 = por %p131_p8, %p130_p7  ;;  %p8220_p12 = scmp.eq.s32.totalorder %s7153_s18, 0 }
  0xf6   : > { %p7281_p6 = por %p821_p11, %p130_p7  ;;  %p827_p0 = scmp.eq.s32.totalorder %s5261_s0, 1 }
  0xf7   : > { %p7277_p13 = por %p8220_p12, %p136_p9  ;;  %p6084_p2 = scmp.lt.s32.totalorder %s6895_s15, 2 }
  0xf8   : > { %s8222_s6 = scalar_select %p7281_p6, 1, 0 }
  0xf9   : > { %s8221_s26 = scalar_select %p7277_p13, 1, 0 }
  0xfa   : > { %s1051_s1 = sand.u32 1, %s6891_s11   ;;  %p7287_p1 = por %p827_p0, %p136_p9 }
  0xfb   : > { %s5277_s23 = sshll.u32 %s1051_s1, 3  ;;  %s5278_s8 = sshll.u32 %s6895_s15, 7 }
  0xfc   : > { %s8223_s2 = scalar_select %p7287_p1, 1, 0 }
  0xfd   : > { %s7293_s28 = scalar_lea.hbm %s8208_s9, %s5278_s8  ;;  %s1055_s14 = scalar_lea.vmem [#allocation4], %s5277_s23 }
  0xfe   : > { %s1062_s4 = sshll.u32 %s1055_s14, 4  ;;  %p7295_p3 = pnand %p6084_p2, %p132_p10  ;;  %s1063_s4 = int_to_ptr.vmem [resolvable:$true] %s1062_s4 }
  0xff   : > { %s1052_s0 = scalar_lea.sflag [#allocation5], %s1051_s1  ;;  %s6775_s12 = scalar_lea.hbm %s7293_s28, 128 }
 0x100   : > { %s8224_s5 = scalar_select %p7295_p3, 1, 0 }
 0x101   : > { %p6776_p4 = scmp.ne.s32.totalorder %s7293_s28, %s6775_s12  ;;  %p6777_p7 = pneg %p7295_p3 }
 0x102   : > { %s6780_s8 = scalar_lea.hbm %s8208_s9, 256  ;;  %p6781_p9 = scmp.lt.s32.totalorder %s7293_s28, %s8208_s9 }
 0x103   : > { %p6778_p5 = pnand %p6777_p7, %p6776_p4  ;;  %p6782_p11 = scmp.lt.s32.totalorder %s6780_s8, %s6775_s12 }
 0x105   : > { %p6779_p8 = pneg %p6778_p5  ;;  %p6783_p12 = por %p6782_p11, %p6781_p9 }
 0x107   : > { %p6784_p0 = pnand %p6783_p12, %p6779_p8 }
 0x109   : > { %6787 = shalt.err (!%p6784_p0)
}
 0x10a   : > { %s6788_s23 = scalar_lea.vmem %s1063_s4, 128  ;;  %s6945_s14 = smov [#allocation4]  }
 0x10b   : > { %p6789_p10 = scmp.ne.s32.totalorder %s1063_s4, %s6788_s23  ;;  %s6793_s13 = sshll.u32 %s6945_s14, 4  ;;  %s6794_s13 = int_to_ptr.vmem [resolvable:$false] %s6793_s13 }
 0x10c   : > { %s6795_s1 = scalar_lea.vmem %s6794_s13, 256  ;;  %p6796_p6 = scmp.lt.s32.totalorder %s1063_s4, %s6794_s13 }
 0x10d   : > { %p6791_p2 = pnand %p6789_p10, %p6777_p7  ;;  %p6797_p13 = scmp.lt.s32.totalorder %s6795_s1, %s6788_s23 }
 0x10f   : > { %p6792_p1 = pneg %p6791_p2  ;;  %p6798_p3 = por %p6797_p13, %p6796_p6 }
 0x111   : > { %p6799_p4 = pnand %p6798_p3, %p6792_p1 }
 0x113   : > { %6802 = shalt.err (!%p6799_p4)
}
 0x114   : > { %p8225_p5 = scmp.ne.s32.totalorder %s8224_s5, 0  ;;  %p8226_p8 = scmp.ne.s32.totalorder %s8209_s22, 0 }
 0x115   : > { %s7312_s12 = sand.u32 (!%p8226_p8), 1, %s6887_s10   ;;  %p8227_p13 = scmp.ne.s32.totalorder (!%p8226_p8), %s8221_s26, 0 }
 0x116   : > { %6066 = dma.hbm_to_vmem [thread:$0]  (!%p8225_p5), %s7293_s28, 128, %s1063_s4, %s1052_s0  }
 0x117   : > { %1085 = sbr.rel (%p8226_p8) target bundleno = 7108 (0x1bc4), region = 152  ;;  %s5280_s8 = sshll.u32 (!%p8226_p8), %s7312_s12, 3 }
 0x118   : > { %s1088_s14 = scalar_lea.sflag (!%p8226_p8), [#allocation5], %s7312_s12  ;;  %s7316_s13 = scalar_lea.vmem (!%p8226_p8), [#allocation4], %s5280_s8 }
 0x11c   : > { %6846 = dma.done.wait (%p8227_p13), %s1088_s14, 128  }
 0x11d   : > { %6848 = vsyncadd (%p8227_p13), %s1088_s14, 4294967168  ;;  %p8228_p6 = scmp.eq.s32.totalorder %s7153_s18, 0 }
 0x11f   : > { %6850 = dma.done.wait (%p8228_p6), [#allocation8], 528   ;;  %p8229_p1 = pmov %p8228_p6 }
 0x121   : > { %6852 = vsyncadd (%p8229_p1), [#allocation8], 4294966768  ;;  %p8230_p3 = pmov %p8229_p1 }
 0x122   : > { %p8231_p7 = pmov %p8229_p1 }
 0x123   : > { %6854 = dma.done.wait (%p8230_p3), [#allocation11], 48  }
 0x124   : > { %6856 = vsyncadd (%p8231_p7), [#allocation11], 4294967248  ;;  %p8232_p9 = pmov %p8229_p1 }
 0x125   : > { %p8233_p11 = pmov %p8229_p1 }
 0x126   : > { %6858 = dma.done.wait (%p8232_p9), [#allocation14], 1040  }
 0x127   : > { %6860 = vsyncadd (%p8233_p11), [#allocation14], 4294966256  ;;  %p8234_p12 = pmov %p8229_p1 }
 0x128   : > { %p8235_p0 = pmov %p8229_p1 }
 0x129   : > { %6862 = dma.done.wait (%p8234_p12), [#allocation17], 1040  }
 0x12a   : > { %6864 = vsyncadd (%p8235_p0), [#allocation17], 4294966256  ;;  %p8236_p10 = pmov %p8235_p0 }
 0x12b   : > { %p8237_p2 = pmov %p8235_p0 }
 0x12c   : > { %6866 = dma.done.wait (%p8236_p10), [#allocation20], 48  }
 0x12d   : > { %6868 = vsyncadd (%p8237_p2), [#allocation20], 4294967248  ;;  %p8238_p4 = pmov %p8235_p0 }
 0x12e   : > { %p8239_p5 = pmov %p8235_p0 }
 0x12f   : > { %6870 = dma.done.wait (%p8238_p4), [#allocation23], 80  }
 0x130   : > { %6872 = vsyncadd (%p8239_p5), [#allocation23], 4294967216  ;;  %p8240_p8 = pmov %p8235_p0 }
 0x131   : > { %p8241_p13 = pmov %p8235_p0 }
 0x132   : > { %6874 = dma.done.wait (%p8240_p8), [#allocation26], 64  }
 0x133   : > { %6876 = vsyncadd (%p8241_p13), [#allocation26], 4294967232  ;;  %v6946_v0 = vmov 2   ;;  %v6947_v1 = vmov 1   ;;  %v6948_v2 = vmov 0.0   ;;  %vm6949_vm0 = vmmov 0  }
 0x134   : > { %6190 = vset.pattern.permute.xlu0 %v6946_v0  ;;  %6189 = vset.pattern.permute.xlu1 %v6947_v1  ;;  %v1265_v3 = vld [vmem:[%s6985_s21 + $0x70] sm:$0xff]  ;;  %v6216_v4 = vld [vmem:[#allocation7 + $0x18] sm:$0xff]   ;;  %v1266_v5 = vld [vmem:[%s6985_s21 + $0x78] sm:$0xff]  ;;  %v6950_v13 = vmov 0   ;;  %vm2009_vm1 = vcmask 523264   ;;  %s8242_s5 = sld [smem:[#allocation42_spill]]  ;;  %v1347_v53 = vlaneseq }
 0x135   : > { %5653 = vmatprep.subr.bf16.mxu1 %v6948_v2  ;;  %5661 = vmatprep.mubr.msk.bf16.mxu1 %vm6949_vm0, %v6948_v2  ;;  %v1263_v6 = vld [vmem:[%s6985_s21 + $0x60] sm:$0xff]  ;;  %v1262_v8 = vld [vmem:[%s6985_s21 + $0x58] sm:$0xff]  ;;  %v1261_v10 = vld [vmem:[%s6985_s21 + $0x50] sm:$0xff]  ;;  %s8243_s4 = sld [smem:[#allocation37_spill]]  ;;  %p1237_p6 = scmp.lt.s32.totalorder %s7153_s18, 1  ;;  %vm2521_vm4 = vcmask 261120  }
 0x136   : > { %1524 = vperm.xlu0 %6190, %v1265_v3   ;;  %1424 = vperm.xlu1 %6189, %v1265_v3   ;;  %v6217_v7 = vld [vmem:[#allocation7 + $0x10] sm:$0xff]   ;;  %v6218_v9 = vld [vmem:[#allocation7 + $0x8] sm:$0xff]   ;;  %v6219_v11 = vld [vmem:[#allocation7] sm:$0xff]   ;;  %v7453_v57 = vshrl.u32 %v1347_v53, 7  ;;  %s8244_s0 = sld [smem:[#allocation41_spill]]  ;;  %vm2608_vm5 = vcmask 1045504  }
 0x137   : > { %5654 = vmatpush3.bf16.msra.mxu1 %v6216_v4  ;;  %v1968_v12 = vld [vmem:[%s7316_s13] sm:$0xff]  ;;  %v7370_v16 = vld [vmem:[%s6985_s21 + $0x38] sm:$0xff]  ;;  %v1581_v20 = vld [vmem:[%s6990_s25 + $0x70] sm:$0xff]  ;;  %s7445_s22 = scalar_select %p1237_p6, %s7153_s18, 1  ;;  %vm2579_vm6 = vcmask 97280   ;;  %vm2583_vm7 = vcmask 93184  }
 0x138   : > { %5655 = vmatprep.subr.bf16.mxu1 %v6948_v2  ;;  %v1969_v14 = vpack.c.bf16 %v1968_v12, %v1968_v12  ;;  %v1260_v15 = vld [vmem:[%s6985_s21 + $0x48] sm:$0xff]  ;;  %v7381_v19 = vld [vmem:[%s6985_s21 + $0x18] sm:$0xff]  ;;  %v1259_v23 = vld [vmem:[%s6985_s21 + $0x40] sm:$0xff]  ;;  %v7461_v61 = vsub.s32 1, %v7453_v57  ;;  %v7464_v63 = vsub.s32 0, %v7453_v57  ;;  %s8245_s23 = sld [smem:[#allocation44_spill]] }
 0x139   : > { %v1264_v17 = vld [vmem:[%s6985_s21 + $0x68] sm:$0xff]  ;;  %v1582_v22 = vld [vmem:[%s6990_s25 + $0x78] sm:$0xff]  ;;  %v1579_v24 = vld [vmem:[%s6990_s25 + $0x60] sm:$0xff]  ;;  %s5294_s26 = sshll.u32 %s7445_s22, 2  ;;  %s8246_s1 = sld [smem:[#allocation46_spill]]  ;;  %vm2654_vm8 = vcmask 257024  }
 0x13a   : > { %1428 = vperm.xlu1 %6189, %v1266_v5   ;;  %1516 = vperm.xlu0 %6190, %v1263_v6   ;;  %v7377_v18 = vld [vmem:[%s6985_s21 + $0x28] sm:$0xff]  ;;  %v1577_v25 = vld [vmem:[%s6990_s25 + $0x50] sm:$0xff]  ;;  %v1575_v27 = vld [vmem:[%s6990_s25 + $0x40] sm:$0xff]  ;;  %s8247_s8 = sld [smem:[#allocation45_spill]]  ;;  %vm2794_vm9 = vcmask 523520   ;;  %vm2796_vm10 = vcmask 519424  }
 0x13b   : > { %5656 = vmatpush3.bf16.msra.mxu1 %v6217_v7  ;;  %v7387_v21 = vld [vmem:[%s6985_s21 + $0x8] sm:$0xff]  ;;  %v1573_v28 = vld [vmem:[%s6990_s25 + $0x30] sm:$0xff]  ;;  %v1571_v29 = vld [vmem:[%s6990_s25 + $0x20] sm:$0xff]  ;;  %s1240_s28 = scalar_lea.vmem %s8243_s4, %s5294_s26  ;;  %s8248_s14 = sld [smem:[#allocation49_spill]]  ;;  %vm2933_vm11 = vcmask 785920   ;;  %vm2935_vm12 = vcmask 781824  }
 0x13c   : > { %5657 = vmatprep.subr.bf16.mxu1 %v6948_v2  ;;  %v1580_v26 = vld [vmem:[%s6990_s25 + $0x68] sm:$0xff]  ;;  %v1578_v30 = vld [vmem:[%s6990_s25 + $0x58] sm:$0xff]  ;;  %v1257_v31 = vld [vmem:[%s6985_s21 + $0x30] sm:$0xff]  ;;  %s8249_s13 = sld [smem:[#allocation47_spill]]  ;;  %vm3072_vm13 = vcmask 1048320   ;;  %vm3074_vm14 = vcmask 1044224  }
 0x13d   : > { %v1569_v32 = vld [vmem:[%s6990_s25 + $0x10] sm:$0xff]  ;;  %v1568_v33 = vld [vmem:[%s6990_s25 + $0x8] sm:$0xff]  ;;  %v1734_v34 = vld [vmem:[%s8242_s5 + $0x78] sm:$0xff]  ;;  %s8250_s4 = sld [smem:[#allocation48_spill]]  ;;  %vm3197_vm15 = vcmask 1043456   ;;  %p8263_p3 = scmp.ne.s32.totalorder %s8222_s6, 0 }
 0x13e   : > { %6191 = vset.pattern.permute.xlu1 %v6946_v0  ;;  %1512 = vperm.xlu0 %6190, %v1262_v8   ;;  %v1732_v35 = vld [vmem:[%s8242_s5 + $0x68] sm:$0xff]  ;;  %v1730_v37 = vld [vmem:[%s8242_s5 + $0x58] sm:$0xff]  ;;  %v1255_v38 = vld [vmem:[%s6985_s21 + $0x20] sm:$0xff]  ;;  %s8251_s26 = sld [smem:[#allocation50_spill]] }
 0x13f   : > { %1528 = vperm.xlu1 %6191, %v1266_v5   ;;  %5658 = vmatpush3.bf16.msra.mxu1 %v6218_v9  ;;  %v1576_v36 = vld [vmem:[%s6990_s25 + $0x48] sm:$0xff]  ;;  %v1574_v42 = vld [vmem:[%s6990_s25 + $0x38] sm:$0xff]  ;;  %v1253_v45 = vld [vmem:[%s6985_s21 + $0x10] sm:$0xff] }
 0x140   : > { %5659 = vmatprep.subr.bf16.mxu1 %v6948_v2  ;;  %v1728_v39 = vld [vmem:[%s8242_s5 + $0x48] sm:$0xff]  ;;  %v1251_v60 = vld [vmem:[%s6985_s21] sm:$0xff] }
 0x141   : > { %v1572_v56 = vld [vmem:[%s6990_s25 + $0x28] sm:$0xff]  ;;  %v1250_v62 = vld [vmem:[%s1240_s28] sm:$0x7]  ;;  %s8252_s28 = sld [smem:[#allocation39_spill]] }
 0x142   : > { %6198 = vset.pattern.permute.xlu0 %v6947_v1  ;;  %v7473_v7 = vrot.slane %v1250_v62, %v7464_v63 }
 0x143   : > { %6192 = vset.pattern.permute.xlu1 %v6950_v13  ;;  %1408 = vperm.xlu0 %6198, %v1261_v10  }
 0x144   : > { %5660 = vmatpush3.bf16.msra.mxu1 %v6219_v11  ;;  %1329 = vperm.xlu1 %6192, %v1263_v6  }
 0x145   : > { %5665 = vmatprep.subr.bf16.mxu1 %v6948_v2 }
 0x147   : > { %5662 = vmatmul.mubr.msk.bf16.vlgmr.msra.gmra.mxu1 %vm2009_vm1, %v1969_v14  ;;  %1404 = vperm.xlu0 %6198, %v1260_v15  }
 0x148   : > { %6193 = vset.pattern.permute.xlu1 %v6947_v1  ;;  %5681 = vmatprep.mubr.msk.bf16.mxu1 %vm6949_vm0, %v6948_v2 }
 0x149   : > { %1416 = vperm.xlu1 %6193, %v1263_v6   ;;  %v1533_v6 = vsub.s32 2, %v7453_v57 }
 0x14b   : > { %1396 = vperm.xlu0 %6198, %v7370_v16   ;;  %v7479_v11 = vrot.slane %v1250_v62, %v1533_v6 }
 0x14d   : > { %1420 = vperm.xlu1 %6193, %v1264_v17  }
 0x14f   : > { %1388 = vperm.xlu0 %6198, %v7377_v18  }
 0x151   : > { %6194 = vset.pattern.permute.xlu1 %v6946_v0 }
 0x152   : > { %1520 = vperm.xlu1 %6194, %v1264_v17  }
 0x153   : > { %1380 = vperm.xlu0 %6198, %v7381_v19  }
 0x156   : > { %6195 = vset.pattern.permute.xlu1 %v6950_v13 }
 0x157   : > { %1655 = vperm.xlu1 %6195, %v1581_v20   ;;  %1372 = vperm.xlu0 %6198, %v7387_v21  }
 0x15b   : > { %1319 = vperm.xlu1 %6195, %v1261_v10   ;;  %6213 = vset.pattern.permute.xlu0 %v6950_v13 }
 0x15c   : > { %1339 = vperm.xlu0 %6213, %v1265_v3  }
 0x15f   : > { %1324 = vperm.xlu1 %6195, %v1262_v8  }
 0x160   : > { %1344 = vperm.xlu0 %6213, %v1266_v5   ;;  %v7469_v5 = vrot.slane %v1250_v62, %v7461_v61 }
 0x163   : > { %6196 = vset.pattern.permute.xlu1 %v6947_v1 }
 0x164   : > { %1412 = vperm.xlu1 %6196, %v1262_v8   ;;  %1334 = vperm.xlu0 %6213, %v1264_v17  }
 0x168   : > { %6197 = vset.pattern.permute.xlu1 %v6946_v0  ;;  %1660 = vperm.xlu0 %6213, %v1582_v22  }
 0x169   : > { %1508 = vperm.xlu1 %6197, %v1261_v10  }
 0x16c   : > { %1309 = vperm.xlu0 %6213, %v1259_v23  }
 0x16d   : > { %6199 = vset.pattern.permute.xlu1 %v6950_v13 }
 0x16e   : > { %1645 = vperm.xlu1 %6199, %v1579_v24  }
 0x170   : > { %1635 = vperm.xlu0 %6213, %v1577_v25  }
 0x172   : > { %1650 = vperm.xlu1 %6199, %v1580_v26  }
 0x174   : > { %1304 = vperm.xlu0 %6213, %v7370_v16  }
 0x176   : > { %1314 = vperm.xlu1 %6199, %v1260_v15  }
 0x178   : > { %1625 = vperm.xlu0 %6213, %v1575_v27   ;;  %v1570_v27 = vld [vmem:[%s6990_s25 + $0x18] sm:$0xff] }
 0x17a   : > { %6200 = vset.pattern.permute.xlu1 %v6947_v1 }
 0x17b   : > { %1400 = vperm.xlu1 %6200, %v1259_v23  }
 0x17c   : > { %1294 = vperm.xlu0 %6213, %v7377_v18  }
 0x17f   : > { %6201 = vset.pattern.permute.xlu1 %v6946_v0 }
 0x180   : > { %1500 = vperm.xlu1 %6201, %v1259_v23   ;;  %1615 = vperm.xlu0 %6213, %v1573_v28  }
 0x184   : > { %1504 = vperm.xlu1 %6201, %v1260_v15   ;;  %1284 = vperm.xlu0 %6213, %v7381_v19  }
 0x188   : > { %6202 = vset.pattern.permute.xlu1 %v6950_v13  ;;  %1605 = vperm.xlu0 %6213, %v1571_v29  }
 0x189   : > { %1640 = vperm.xlu1 %6202, %v1578_v30  }
 0x18c   : > { %1274 = vperm.xlu0 %6213, %v7387_v21  }
 0x18d   : > { %1299 = vperm.xlu1 %6202, %v1257_v31  }
 0x190   : > { %1595 = vperm.xlu0 %6213, %v1569_v32  }
 0x191   : > { %6203 = vset.pattern.permute.xlu1 %v6947_v1 }
 0x192   : > { %1392 = vperm.xlu1 %6203, %v1257_v31  }
 0x194   : > { %1590 = vperm.xlu0 %6213, %v1568_v33  }
 0x196   : > { %6204 = vset.pattern.permute.xlu1 %v6946_v0 }
 0x197   : > { %1492 = vperm.xlu1 %6204, %v1257_v31  }
 0x198   : > { %1812 = vperm.xlu0 %6213, %v1734_v34  }
 0x19b   : > { %1496 = vperm.xlu1 %6204, %v7370_v16  }
 0x19c   : > { %1802 = vperm.xlu0 %6213, %v1732_v35  }
 0x19f   : > { %6205 = vset.pattern.permute.xlu1 %v6950_v13 }
 0x1a0   : > { %1630 = vperm.xlu1 %6205, %v1576_v36   ;;  %1792 = vperm.xlu0 %6213, %v1730_v37   ;;  %v1567_v36 = vld [vmem:[%s6990_s25] sm:$0xff] }
 0x1a4   : > { %1289 = vperm.xlu1 %6205, %v1255_v38   ;;  %1782 = vperm.xlu0 %6213, %v1728_v39  }
 0x1a8   : > { %6206 = vset.pattern.permute.xlu1 %v6947_v1 }
 0x1a9   : > { %1384 = vperm.xlu1 %6206, %v1255_v38  }
 0x1ad   : > { %6207 = vset.pattern.permute.xlu1 %v6946_v0 }
 0x1ae   : > { %1484 = vperm.xlu1 %6207, %v1255_v38  }
 0x1b1   : > { %v1425_v40 = vpop.permute.xlu1 %1424  ;;  %v1525_v41 = vpop.permute.xlu0 %1524 }
 0x1b2   : > { %1488 = vperm.xlu1 %6207, %v7377_v18   ;;  %v1449_v10 = vmul.f32 %v7469_v5, %v1425_v40  ;;  %v1549_v14 = vmul.f32 %v7479_v11, %v1525_v41 }
 0x1b5   : > { %v1429_v43 = vpop.permute.xlu1 %1428  ;;  %v7429_v44 = vpop.permute.xlu0 %1516 }
 0x1b6   : > { %6208 = vset.pattern.permute.xlu1 %v6950_v13  ;;  %v1450_v18 = vmul.f32 %v7469_v5, %v1429_v43  ;;  %v1547_v33 = vmul.f32 %v7479_v11, %v7429_v44  ;;  %v1733_v43 = vld [vmem:[%s8242_s5 + $0x70] sm:$0xff] }
 0x1b7   : > { %1620 = vperm.xlu1 %6208, %v1574_v42  }
 0x1b9   : > { %v7433_v46 = vpop.permute.xlu0 %1512 }
 0x1ba   : > { %v1529_v47 = vpop.permute.xlu1 %1528 }
 0x1bb   : > { %1279 = vperm.xlu1 %6208, %v1253_v45   ;;  %v1550_v24 = vmul.f32 %v7479_v11, %v1529_v47  ;;  %v6220_v47 = vld [vmem:[%s8244_s0] sm:$0xff]  }
 0x1bc   : > { %5637 = vmatprep.mubr.bf16.mxu0 %v6220_v47 }
 0x1be   : > { %v7435_v48 = vpop.permute.xlu0 %1408 }
 0x1bf   : > { %v1330_v49 = vpop.permute.xlu1 %1329  ;;  %6209 = vset.pattern.permute.xlu1 %v6947_v1 }
 0x1c0   : > { %1376 = vperm.xlu1 %6209, %v1253_v45   ;;  %v1363_v29 = vmul.f32 %v7473_v7, %v1330_v49 }
 0x1c2   : > { %v7438_v50 = vpop.permute.xlu0 %1404 }
 0x1c4   : > { %v1417_v51 = vpop.permute.xlu1 %1416  ;;  %6210 = vset.pattern.permute.xlu1 %v6946_v0 }
 0x1c5   : > { %1476 = vperm.xlu1 %6210, %v1253_v45   ;;  %v1447_v25 = vmul.f32 %v7469_v5, %v1417_v51 }
 0x1c6   : > { %v7442_v52 = vpop.permute.xlu0 %1396 }
 0x1c8   : > { %v1421_v54 = vpop.permute.xlu1 %1420 }
 0x1c9   : > { %1480 = vperm.xlu1 %6210, %v7381_v19   ;;  %v1448_v34 = vmul.f32 %v7469_v5, %v1421_v54  ;;  %v1731_v54 = vld [vmem:[%s8242_s5 + $0x60] sm:$0xff] }
 0x1ca   : > { %v7448_v55 = vpop.permute.xlu0 %1388 }
 0x1cd   : > { %v1521_v58 = vpop.permute.xlu1 %1520  ;;  %6211 = vset.pattern.permute.xlu1 %v6950_v13 }
 0x1ce   : > { %1610 = vperm.xlu1 %6211, %v1572_v56   ;;  %v7457_v59 = vpop.permute.xlu0 %1380  ;;  %v1548_v41 = vmul.f32 %v7479_v11, %v1521_v58  ;;  %v1729_v58 = vld [vmem:[%s8242_s5 + $0x50] sm:$0xff] }
 0x1d2   : > { %v1656_v3 = vpop.permute.xlu1 %1655  ;;  %1269 = vperm.xlu1 %6211, %v1251_v60   ;;  %v7466_v4 = vpop.permute.xlu0 %1372 }
 0x1d6   : > { %v7475_v8 = vpop.permute.xlu1 %1319  ;;  %6212 = vset.pattern.permute.xlu1 %v6947_v1 }
 0x1d7   : > { %v1340_v9 = vpop.permute.xlu0 %1339  ;;  %1368 = vperm.xlu1 %6212, %v1251_v60  }
 0x1d8   : > { %v1365_v12 = vmul.f32 %v7473_v7, %v1340_v9  ;;  %v1727_v9 = vld [vmem:[%s8242_s5 + $0x40] sm:$0xff] }
 0x1da   : > { %v1465_v15 = vadd.f32 %v1449_v10, %v1365_v12  ;;  %v7483_v16 = vpop.permute.xlu1 %1324  ;;  %v1445_v12 = vmul.f32 %v7469_v5, %v7435_v48 }
 0x1db   : > { %v1345_v17 = vpop.permute.xlu0 %1344  ;;  %6214 = vset.pattern.permute.xlu1 %v6946_v0 }
 0x1dc   : > { %v1366_v1 = vmul.f32 %v7473_v7, %v1345_v17  ;;  %1468 = vperm.xlu1 %6214, %v1251_v60   ;;  %v1565_v19 = vadd.f32 %v1549_v14, %v1465_v15  ;;  %v1361_v14 = vmul.f32 %v7473_v7, %v7475_v8 }
 0x1de   : > { %v1466_v20 = vadd.f32 %v1450_v18, %v1366_v1  ;;  %v1677_v28 = vadd.f32 %v1656_v3, %v1565_v19  ;;  %v1362_v18 = vmul.f32 %v7473_v7, %v7483_v16  ;;  %v1546_v19 = vmul.f32 %v7479_v11, %v7433_v46 }
 0x1df   : > { %v1413_v22 = vpop.permute.xlu1 %1412  ;;  %v1335_v23 = vpop.permute.xlu0 %1334 }
 0x1e0   : > { %1472 = vperm.xlu1 %6214, %v7387_v21   ;;  %v1566_v26 = vadd.f32 %v1550_v24, %v1466_v20  ;;  %v1364_v30 = vmul.f32 %v7473_v7, %v1335_v23  ;;  %v1463_v21 = vadd.f32 %v1447_v25, %v1363_v29  ;;  %v1693_v37 = vmax.f32 %v1677_v28, 0.0 }
 0x1e1   : > { %v1446_v15 = vmul.f32 %v7469_v5, %v1413_v22  ;;  %v1461_v20 = vadd.f32 %v1445_v12, %v1361_v14 }
 0x1e2   : > { %v1464_v38 = vadd.f32 %v1448_v34, %v1364_v30  ;;  %v1563_v42 = vadd.f32 %v1547_v33, %v1463_v21 }
 0x1e3   : > { %v1661_v0 = vpop.permute.xlu0 %1660  ;;  %v1462_v23 = vadd.f32 %v1446_v15, %v1362_v18  ;;  %v1722_v15 = vld [vmem:[%s8242_s5 + $0x18] sm:$0xff] }
 0x1e4   : > { %v1678_v31 = vadd.f32 %v1661_v0, %v1566_v26  ;;  %v1509_v32 = vpop.permute.xlu1 %1508  ;;  %6215 = vset.pattern.permute.xlu1 %v6950_v13  ;;  %v1564_v45 = vadd.f32 %v1548_v41, %v1464_v38  ;;  %v5305_v0 = vld [vmem:[%s8245_s23] ss:$0 sm:$0xff]  ;;  %v1444_v41 = vmul.f32 %v7469_v5, %v7438_v50  ;;  %s7720_s23 = scalar_lea.vmem %s8252_s28, %s7445_s22  ;;  %s8169_s28 = smov 32  }
 0x1e5   : > { %1600 = vperm.xlu1 %6215, %v1570_v27   ;;  %v1545_v1 = vmul.f32 %v7479_v11, %v1509_v32  ;;  %v1562_v27 = vadd.f32 %v1546_v19, %v1462_v23 }
 0x1e6   : > { %v1694_v35 = vmax.f32 %v1678_v31, 0.0 }
 0x1e7   : > { %v1310_v10 = vpop.permute.xlu0 %1309  ;;  %v1561_v48 = vadd.f32 %v1545_v1, %v1461_v20 }
 0x1e8   : > { %v1718_v39 = vpack.c.bf16 %v1694_v35, %v1693_v37 }
 0x1e9   : > { %v1646_v40 = vpop.permute.xlu1 %1645  ;;  %1585 = vperm.xlu1 %6215, %v1567_v36   ;;  %v1359_v36 = vmul.f32 %v7473_v7, %v1310_v10  ;;  %v1724_v10 = vld [vmem:[%s8242_s5 + $0x28] sm:$0xff] }
 0x1ea   : > { %5621 = vmatprep.subr.bf16.mxu0 %v1718_v39  ;;  %v1675_v44 = vadd.f32 %v1646_v40, %v1563_v42 }
 0x1eb   : > { %5622 = vmatpush3.bf16.msra.mxu0 %v1718_v39  ;;  %v1636_v25 = vpop.permute.xlu0 %1635 }
 0x1ec   : > { %v1691_v56 = vmax.f32 %v1675_v44, 0.0  ;;  %v1673_v26 = vadd.f32 %v1636_v25, %v1561_v48  ;;  %v1720_v25 = vld [vmem:[%s8242_s5 + $0x8] sm:$0xff]  ;;  %v1726_v48 = vld [vmem:[%s8242_s5 + $0x38] sm:$0xff] }
 0x1ed   : > { %v1651_v49 = vpop.permute.xlu1 %1650  ;;  %1807 = vperm.xlu1 %6215, %v1733_v43  }
 0x1ee   : > { %v1676_v51 = vadd.f32 %v1651_v49, %v1564_v45  ;;  %v1689_v22 = vmax.f32 %v1673_v26, 0.0 }
 0x1ef   : > { %v1305_v38 = vpop.permute.xlu0 %1304 }
 0x1f0   : > { %v1692_v60 = vmax.f32 %v1676_v51, 0.0  ;;  %v1358_v18 = vmul.f32 %v7473_v7, %v1305_v38 }
 0x1f1   : > { %v1315_v62 = vpop.permute.xlu1 %1314  ;;  %1797 = vperm.xlu1 %6215, %v1731_v54  }
 0x1f2   : > { %v1717_v3 = vpack.c.bf16 %v1692_v60, %v1691_v56  ;;  %v1360_v42 = vmul.f32 %v7473_v7, %v1315_v62 }
 0x1f3   : > { %v1626_v49 = vpop.permute.xlu0 %1625 }
 0x1f4   : > { %5623 = vmatprep.subr.bf16.mxu0 %v1717_v3  ;;  %v1460_v51 = vadd.f32 %v1444_v41, %v1360_v42  ;;  %v6229_v42 = vld [vmem:[%s8246_s1 + $0x30] sm:$0xff]  }
 0x1f5   : > { %1787 = vperm.xlu1 %6215, %v1729_v58   ;;  %5624 = vmatpush3.bf16.msra.mxu0 %v1717_v3 }
 0x1f6   : > { %v1401_v6 = vpop.permute.xlu1 %1400 }
 0x1f7   : > { %v1443_v37 = vmul.f32 %v7469_v5, %v1401_v6  ;;  %v1295_v23 = vpop.permute.xlu0 %1294 }
 0x1f9   : > { %1777 = vperm.xlu1 %6215, %v1727_v9   ;;  %v1459_v43 = vadd.f32 %v1443_v37, %v1359_v36  ;;  %v1725_v9 = vld [vmem:[%s8242_s5 + $0x30] sm:$0xff]  ;;  %v6228_v37 = vld [vmem:[%s8246_s1 + $0x38] sm:$0xff]  }
 0x1fa   : > { %5666 = vmatpush3.bf16.msra.mxu1 %v6228_v37 }
 0x1fb   : > { %v1501_v17 = vpop.permute.xlu1 %1500  ;;  %5667 = vmatprep.subr.bf16.mxu1 %v6948_v2 }
 0x1fc   : > { %v1543_v39 = vmul.f32 %v7479_v11, %v1501_v17  ;;  %v1442_v17 = vmul.f32 %v7469_v5, %v7442_v52  ;;  %v1723_v52 = vld [vmem:[%s8242_s5 + $0x20] sm:$0xff] }
 0x1fe   : > { %v1559_v45 = vadd.f32 %v1543_v39, %v1459_v43  ;;  %v1458_v26 = vadd.f32 %v1442_v17, %v1358_v18  ;;  %5668 = vmatpush3.bf16.msra.mxu1 %v6229_v42  ;;  %v6233_v17 = vld [vmem:[%s8246_s1 + $0x10] sm:$0xff]  }
 0x1ff   : > { %v1505_v24 = vpop.permute.xlu1 %1504  ;;  %5669 = vmatprep.subr.bf16.mxu1 %v6948_v2 }
 0x200   : > { %v1544_v44 = vmul.f32 %v7479_v11, %v1505_v24  ;;  %v1671_v54 = vadd.f32 %v1626_v49, %v1559_v45  ;;  %v1356_v45 = vmul.f32 %v7473_v7, %v1295_v23  ;;  %v6230_v49 = vld [vmem:[%s8246_s1 + $0x28] sm:$0xff]  }
 0x202   : > { %v1560_v56 = vadd.f32 %v1544_v44, %v1460_v51  ;;  %v1687_v58 = vmax.f32 %v1671_v54, 0.0  ;;  %v1440_v44 = vmul.f32 %v7469_v5, %v7448_v55  ;;  %5670 = vmatpush3.bf16.msra.mxu1 %v6230_v49  ;;  %v6221_v49 = vld [vmem:[%s8244_s0 + $0x8] sm:$0xff]  }
 0x203   : > { %5671 = vmatprep.subr.bf16.mxu1 %v6948_v2 }
 0x204   : > { %v1641_v28 = vpop.permute.xlu1 %1640 }
 0x205   : > { %v1674_v8 = vadd.f32 %v1641_v28, %v1562_v27 }
 0x207   : > { %v1690_v29 = vmax.f32 %v1674_v8, 0.0  ;;  %v2047_v30 = vpop.f32.mrf.mxu1 }
 0x208   : > { %v7516_v31 = vadd.f32 %v5305_v0, %v2047_v30  ;;  %v1300_v16 = vpop.permute.xlu1 %1299  ;;  %v1616_v0 = vpop.permute.xlu0 %1615 }
 0x209   : > { %v1716_v32 = vpack.c.bf16 %v1690_v29, %v1689_v22  ;;  %v5663_v33 = vpop.f32.mrf.mxu1  ;;  %v1357_v1 = vmul.f32 %v7473_v7, %v1300_v16 }
 0x20a   : > { %v2059_v46 = vmul.f32 %v7516_v31, %v7516_v31 }
 0x20b   : > { %5625 = vmatprep.subr.bf16.mxu0 %v1716_v32  ;;  %v2050_v21 = vpop.f32.mrf.mxu1 }
 0x20c   : > { %2060 = vadd.xlane.f32.xlu0 %v2059_v46  ;;  %5626 = vmatpush3.bf16.msra.mxu0 %v1716_v32  ;;  %v1721_v32 = vld [vmem:[%s8242_s5 + $0x10] sm:$0xff]  ;;  %v1285_v43 = vpop.permute.xlu0 %1284 }
 0x20d   : > { %v1393_v34 = vpop.permute.xlu1 %1392  ;;  %v5664_v35 = vpop.f32.mrf.mxu1 }
 0x20e   : > { %v1441_v14 = vmul.f32 %v7469_v5, %v1393_v34  ;;  %v1719_v35 = vld [vmem:[%s8242_s5] sm:$0xff] }
 0x210   : > { %v1457_v24 = vadd.f32 %v1441_v14, %v1357_v1  ;;  %v6234_v1 = vld [vmem:[%s8246_s1 + $0x8] sm:$0xff]  }
 0x212   : > { %v1493_v40 = vpop.permute.xlu1 %1492 }
 0x213   : > { %v1541_v19 = vmul.f32 %v7479_v11, %v1493_v40 }
 0x215   : > { %v1557_v27 = vadd.f32 %v1541_v19, %v1457_v24 }
 0x216   : > { %v1497_v47 = vpop.permute.xlu1 %1496 }
 0x217   : > { %v1542_v28 = vmul.f32 %v7479_v11, %v1497_v47  ;;  %v1669_v22 = vadd.f32 %v1616_v0, %v1557_v27  ;;  %v1438_v27 = vmul.f32 %v7469_v5, %v7457_v59 }
 0x219   : > { %v1558_v29 = vadd.f32 %v1542_v28, %v1458_v26  ;;  %v1685_v46 = vmax.f32 %v1669_v22, 0.0  ;;  %v1436_v28 = vmul.f32 %v7469_v5, %v7466_v4 }
 0x21b   : > { %v1631_v60 = vpop.permute.xlu1 %1630 }
 0x21c   : > { %v1672_v3 = vadd.f32 %v1631_v60, %v1560_v56  ;;  %v1456_v60 = vadd.f32 %v1440_v44, %v1356_v45 }
 0x21d   : > { %2055 = vadd.xlane.f32.xlu1 %v7516_v31 }
 0x21e   : > { %v1688_v50 = vmax.f32 %v1672_v3, 0.0  ;;  %v6231_v3 = vld [vmem:[%s8246_s1 + $0x20] sm:$0xff]  }
 0x21f   : > { %v1290_v6 = vpop.permute.xlu1 %1289  ;;  %5672 = vmatpush3.bf16.msra.mxu1 %v6231_v3  ;;  %v6226_v3 = vld [vmem:[%s8244_s0 + $0x30] sm:$0xff]  }
 0x220   : > { %v1715_v62 = vpack.c.bf16 %v1688_v50, %v1687_v58  ;;  %v1355_v39 = vmul.f32 %v7473_v7, %v1290_v6  ;;  %v1606_v58 = vpop.permute.xlu0 %1605  ;;  %5673 = vmatprep.subr.bf16.mxu1 %v6948_v2 }
 0x222   : > { %1767 = vperm.xlu0 %6213, %v1725_v9   ;;  %5627 = vmatprep.subr.bf16.mxu0 %v1715_v62 }
 0x223   : > { %5628 = vmatpush3.bf16.msra.mxu0 %v1715_v62  ;;  %v6232_v62 = vld [vmem:[%s8246_s1 + $0x18] sm:$0xff]  }
 0x224   : > { %v1385_v12 = vpop.permute.xlu1 %1384  ;;  %5674 = vmatpush3.bf16.msra.mxu1 %v6232_v62 }
 0x225   : > { %v1439_v38 = vmul.f32 %v7469_v5, %v1385_v12  ;;  %5675 = vmatprep.subr.bf16.mxu1 %v6948_v2 }
 0x226   : > { %1762 = vperm.xlu0 %6213, %v1724_v10  }
 0x227   : > { %v1455_v47 = vadd.f32 %v1439_v38, %v1355_v39 }
 0x228   : > { %5676 = vmatpush3.bf16.msra.mxu1 %v6233_v17 }
 0x229   : > { %v1485_v20 = vpop.permute.xlu1 %1484  ;;  %5677 = vmatprep.subr.bf16.mxu1 %v6948_v2 }
 0x22a   : > { %1752 = vperm.xlu0 %6213, %v1722_v15   ;;  %v1539_v40 = vmul.f32 %v7479_v11, %v1485_v20  ;;  %v1275_v20 = vpop.permute.xlu0 %1274 }
 0x22c   : > { %v1555_v51 = vadd.f32 %v1539_v40, %v1455_v47  ;;  %5678 = vmatpush3.bf16.msra.mxu1 %v6234_v1 }
 0x22d   : > { %v1489_v8 = vpop.permute.xlu1 %1488  ;;  %5679 = vmatprep.subr.bf16.mxu1 %v6948_v2 }
 0x22e   : > { %1742 = vperm.xlu0 %6213, %v1720_v25   ;;  %1772 = vperm.xlu1 %6215, %v1726_v48   ;;  %v1540_v54 = vmul.f32 %v7479_v11, %v1489_v8  ;;  %v1667_v55 = vadd.f32 %v1606_v58, %v1555_v51  ;;  %v6235_v25 = vld [vmem:[%s8246_s1] sm:$0xff]   ;;  %v1354_v8 = vmul.f32 %v7473_v7, %v1285_v43  ;;  %v6222_v51 = vld [vmem:[%s8244_s0 + $0x10] sm:$0xff]   ;;  %v6227_v58 = vld [vmem:[%s8244_s0 + $0x38] sm:$0xff]   ;;  %s8256_s1 = sld [smem:[#allocation55_spill]] }
 0x230   : > { %v1556_v50 = vadd.f32 %v1540_v54, %v1456_v60  ;;  %v1683_v12 = vmax.f32 %v1667_v55, 0.0  ;;  %5680 = vmatpush3.bf16.msra.mxu1 %v6235_v25  ;;  %v6223_v54 = vld [vmem:[%s8244_s0 + $0x18] sm:$0xff]   ;;  %v6225_v60 = vld [vmem:[%s8244_s0 + $0x28] sm:$0xff]  }
 0x232   : > { %v1621_v30 = vpop.permute.xlu1 %1620  ;;  %1757 = vperm.xlu1 %6215, %v1723_v52   ;;  %v1352_v52 = vmul.f32 %v7473_v7, %v1275_v20 }
 0x233   : > { %v1670_v16 = vadd.f32 %v1621_v30, %v1558_v29  ;;  %v1596_v30 = vpop.permute.xlu0 %1595 }
 0x235   : > { %v1686_v33 = vmax.f32 %v1670_v16, 0.0 }
 0x236   : > { %v1280_v21 = vpop.permute.xlu1 %1279  ;;  %1747 = vperm.xlu1 %6215, %v1721_v32   ;;  %v1454_v32 = vadd.f32 %v1438_v27, %v1354_v8 }
 0x237   : > { %v1714_v34 = vpack.c.bf16 %v1686_v33, %v1685_v46  ;;  %v1353_v23 = vmul.f32 %v7473_v7, %v1280_v21  ;;  %v1452_v33 = vadd.f32 %v1436_v28, %v1352_v52  ;;  %v1591_v39 = vpop.permute.xlu0 %1590  ;;  %v5312_v28 = vld [vmem:[#allocation9] ss:$0 sm:$0xff] }
 0x239   : > { %5629 = vmatprep.subr.bf16.mxu0 %v1714_v34 }
 0x23a   : > { %1737 = vperm.xlu1 %6215, %v1719_v35   ;;  %5630 = vmatpush3.bf16.msra.mxu0 %v1714_v34 }
 0x23b   : > { %v1377_v36 = vpop.permute.xlu1 %1376  ;;  %v7589_v55 = vpop.permute.xlu0 %1812 }
 0x23c   : > { %v1437_v19 = vmul.f32 %v7469_v5, %v1377_v36 }
 0x23e   : > { %v1453_v26 = vadd.f32 %v1437_v19, %v1353_v23 }
 0x240   : > { %v1477_v41 = vpop.permute.xlu1 %1476 }
 0x241   : > { %v1537_v24 = vmul.f32 %v7479_v11, %v1477_v41 }
 0x243   : > { %v1553_v0 = vadd.f32 %v1537_v24, %v1453_v26  ;;  %v5311_v26 = vld [vmem:[%s8247_s8] ss:$0 sm:$0xff]  ;;  %s8167_s8 = smov 96  }
 0x244   : > { %v1481_v56 = vpop.permute.xlu1 %1480 }
 0x245   : > { %v1538_v22 = vmul.f32 %v7479_v11, %v1481_v56  ;;  %v1665_v59 = vadd.f32 %v1596_v30, %v1553_v0  ;;  %v6224_v56 = vld [vmem:[%s8244_s0 + $0x20] sm:$0xff]   ;;  %s8255_s0 = smov 32  }
 0x246   : > { %v6241_v30 = vld [vmem:[%s8248_s14 + $0x64] ss:$8 sps:$4 sm:$0xff]  }
 0x247   : > { %v1554_v35 = vadd.f32 %v1538_v22, %v1454_v32  ;;  %v1681_v43 = vmax.f32 %v1665_v59, 0.0  ;;  %v6236_v22 = vld [vmem:[%s8248_s14 + $0x70] ss:$8 sps:$4 sm:$0xff]   ;;  %v6250_v59 = vld [vmem:[%s8248_s14 + $0x34] ss:$8 sps:$4 sm:$0xff]  }
 0x248   : > { %v6242_v32 = vld [vmem:[%s8248_s14 + $0x50] ss:$8 sps:$4 sm:$0xff]  }
 0x249   : > { %v1611_v6 = vpop.permute.xlu1 %1610 }
 0x24a   : > { %v1668_v9 = vadd.f32 %v1611_v6, %v1556_v50  ;;  %v7593_v6 = vpop.permute.xlu0 %1802 }
 0x24c   : > { %v1684_v10 = vmax.f32 %v1668_v9, 0.0 }
 0x24d   : > { %v1270_v14 = vpop.permute.xlu1 %1269 }
 0x24e   : > { %v1713_v15 = vpack.c.bf16 %v1684_v10, %v1683_v12  ;;  %v1351_v21 = vmul.f32 %v7473_v7, %v1270_v14  ;;  %v7597_v62 = vpop.permute.xlu0 %1792 }
 0x250   : > { %5631 = vmatprep.subr.bf16.mxu0 %v1713_v15 }
 0x251   : > { %5632 = vmatpush3.bf16.msra.mxu0 %v1713_v15 }
 0x252   : > { %v1369_v18 = vpop.permute.xlu1 %1368  ;;  %v7601_v12 = vpop.permute.xlu0 %1782 }
 0x253   : > { %v1435_v46 = vmul.f32 %v7469_v5, %v1369_v18 }
 0x255   : > { %v1451_v37 = vadd.f32 %v1435_v46, %v1351_v21  ;;  %v6245_v46 = vld [vmem:[%s8248_s14 + $0x40] ss:$8 sps:$4 sm:$0xff]   ;;  %v6248_v21 = vld [vmem:[%s8248_s14 + $0x30] ss:$8 sps:$4 sm:$0xff]  }
 0x257   : > { %v1469_v48 = vpop.permute.xlu1 %1468 }
 0x258   : > { %v1535_v4 = vmul.f32 %v7479_v11, %v1469_v48 }
 0x25a   : > { %v1551_v42 = vadd.f32 %v1535_v4, %v1451_v37 }
 0x25b   : > { %v1473_v29 = vpop.permute.xlu1 %1472 }
 0x25c   : > { %v1536_v16 = vmul.f32 %v7479_v11, %v1473_v29  ;;  %v6238_v29 = vld [vmem:[%s8248_s14 + $0x74] ss:$8 sps:$4 sm:$0xff]  }
 0x25d   : > { %2363 = vmatprep.subr.bf16.mxu1 %v6238_v29  ;;  %v5313_v29 = vld [vmem:[%s8249_s13] ss:$0 sm:$0xff]  ;;  %s8173_s13 = smov 64  }
 0x25e   : > { %v1552_v34 = vadd.f32 %v1536_v16, %v1452_v33  ;;  %v6244_v16 = vld [vmem:[%s8248_s14 + $0x54] ss:$8 sps:$4 sm:$0xff]   ;;  %v6247_v33 = vld [vmem:[%s8248_s14 + $0x44] ss:$8 sps:$4 sm:$0xff]  }
 0x260   : > { %v1601_v36 = vpop.permute.xlu1 %1600  ;;  %v1664_v40 = vadd.f32 %v1591_v39, %v1552_v34 }
 0x261   : > { %v1666_v38 = vadd.f32 %v1601_v36, %v1554_v35 }
 0x262   : > { %v1680_v11 = vmax.f32 %v1664_v40, 0.0 }
 0x263   : > { %v1682_v41 = vmax.f32 %v1666_v38, 0.0 }
 0x264   : > { %v1586_v44 = vpop.permute.xlu1 %1585 }
 0x265   : > { %v1663_v5 = vadd.f32 %v1586_v44, %v1551_v42  ;;  %v1712_v45 = vpack.c.bf16 %v1682_v41, %v1681_v43 }
 0x267   : > { %v1679_v7 = vmax.f32 %v1663_v5, 0.0  ;;  %5633 = vmatprep.subr.bf16.mxu0 %v1712_v45 }
 0x268   : > { %5634 = vmatpush3.bf16.msra.mxu0 %v1712_v45  ;;  %v7591_v50 = vpop.permute.xlu1 %1807 }
 0x269   : > { %v1711_v47 = vpack.c.bf16 %v1680_v11, %v1679_v7 }
 0x26b   : > { %5635 = vmatprep.subr.bf16.mxu0 %v1711_v47 }
 0x26c   : > { %5636 = vmatpush3.bf16.msra.mxu0 %v1711_v47  ;;  %v7595_v9 = vpop.permute.xlu1 %1797 }
 0x26d   : > { %5685 = vmatprep.subr.bf16.mxu0 %v6948_v2 }
 0x26f   : > { %5638 = vmatmul.mubr.bf16.vlgmr.msra.gmra.mxu0 %v6221_v49 }
 0x270   : > { %5641 = vmatprep.mubr.bf16.mxu0 %v6222_v51  ;;  %v7599_v10 = vpop.permute.xlu1 %1787 }
 0x274   : > { %v7603_v14 = vpop.permute.xlu1 %1777 }
 0x277   : > { %5642 = vmatmul.mubr.bf16.gmra.mxu0 %v6223_v54 }
 0x278   : > { %5645 = vmatprep.mubr.bf16.mxu0 %v6224_v56 }
 0x27f   : > { %5646 = vmatmul.mubr.bf16.gmra.mxu0 %v6225_v60 }
 0x280   : > { %5649 = vmatprep.mubr.bf16.mxu0 %v6226_v3 }
 0x287   : > { %5650 = vmatmul.mubr.bf16.gmra.mxu0 %v6227_v58 }
 0x288   : > { %5701 = vmatprep.mubr.msk.bf16.mxu0 %vm6949_vm0, %v6948_v2 }
 0x295   : > { %v2061_v15 = vpop.xlane.xlu0 %2060 }
 0x296   : > { %v2062_v18 = vmul.f32 0.0078125, %v2061_v15 }
 0x29d   : > { %v1768_v4 = vpop.permute.xlu0 %1767 }
 0x2a1   : > { %v1763_v35 = vpop.permute.xlu0 %1762 }
 0x2a5   : > { %v1753_v37 = vpop.permute.xlu0 %1752 }
 0x2a6   : > { %v2056_v17 = vpop.xlane.xlu1 %2055 }
 0x2a7   : > { %v2058_v1 = vmul.f32 0.0078125, %v2056_v17 }
 0x2a9   : > { %v2063_v19 = vmul.f32 %v2058_v1, %v2058_v1  ;;  %v2066_v25 = vsub.f32 %v7516_v31, %v2058_v1  ;;  %v6239_v31 = vld [vmem:[%s8248_s14 + $0x60] ss:$8 sps:$4 sm:$0xff]   ;;  %v1743_v42 = vpop.permute.xlu0 %1742 }
 0x2aa   : > { %v1773_v34 = vpop.permute.xlu1 %1772 }
 0x2ab   : > { %v2064_v20 = vsub.f32 %v2062_v18, %v2063_v19 }
 0x2ad   : > { %v2065_v23 = vmax.f32 %v2064_v20, 0.0 }
 0x2ae   : > { %v1758_v36 = vpop.permute.xlu1 %1757 }
 0x2af   : > { %v2067_v24 = vadd.f32 1e-12, %v2065_v23 }
 0x2b1   : > { %6348 = vrsqrt.f32 %v2067_v24 }
 0x2b2   : > { %v1748_v38 = vpop.permute.xlu1 %1747 }
 0x2b6   : > { %v1738_v5 = vpop.permute.xlu1 %1737 }
 0x2be   : > { %v6349_v48 = vpop.eup %6348 }
 0x2bf   : > { %v2069_v27 = vmul.f32 %v6349_v48, %v2066_v25 }
 0x2c1   : > { %v2076_v8 = vmul.f32 %v5311_v26, %v2069_v27 }
 0x2c3   : > { %v2083_v52 = vadd.f32 %v5312_v28, %v2076_v8 }
 0x2c5   : > { %v2084_v0 = vpack.c.bf16 %v2083_v52, %v2083_v52 }
 0x2c7   : > { %5682 = vmatmul.mubr.bf16.vlgmr.msra.gmra.mxu1 %v2084_v0 }
 0x2c8   : > { %2395 = vmatprep.mubr.bf16.mxu1 %v6950_v13  ;;  %2364 = vmatpush1.bf16.msra.mxu1 %v6236_v22 }
 0x2c9   : > { %2365 = vmatprep.subr.bf16.mxu1 %v6241_v30 }
 0x2cc   : > { %2366 = vmatpush1.bf16.msra.mxu1 %v6239_v31 }
 0x2cd   : > { %2367 = vmatprep.subr.bf16.mxu1 %v6244_v16 }
 0x2d0   : > { %2368 = vmatpush1.bf16.msra.mxu1 %v6242_v32 }
 0x2d1   : > { %2369 = vmatprep.subr.bf16.mxu1 %v6247_v33 }
 0x2d4   : > { %2370 = vmatpush1.bf16.msra.mxu1 %v6245_v46  ;;  %v6253_v46 = vld [vmem:[%s8248_s14 + $0x24] ss:$8 sps:$4 sm:$0xff]  }
 0x2d5   : > { %2371 = vmatprep.subr.bf16.mxu1 %v6250_v59  ;;  %v6251_v59 = vld [vmem:[%s8248_s14 + $0x20] ss:$8 sps:$4 sm:$0xff]  }
 0x2d8   : > { %2372 = vmatpush1.bf16.msra.mxu1 %v6248_v21  ;;  %v6254_v21 = vld [vmem:[%s8248_s14 + $0x10] ss:$8 sps:$4 sm:$0xff]  }
 0x2d9   : > { %2373 = vmatprep.subr.bf16.mxu1 %v6253_v46 }
 0x2dc   : > { %2374 = vmatpush1.bf16.msra.mxu1 %v6251_v59 }
 0x32f   : > { %v5639_v39 = vpop.f32.mrf.mxu0 }
 0x330   : > { %v1906_v43 = vadd.f32 %v5639_v39, %v1748_v38  ;;  %v7671_v39 = vld [vmem:[%s8250_s4] sm:$0xff] }
 0x331   : > { %v1897_v40 = vpop.f32.mrf.mxu0 }
 0x332   : > { %v1898_v7 = vadd.f32 %v1897_v40, %v1738_v5  ;;  %v7674_v40 = vld [vmem:[%s8250_s4 + $0x8] sm:$0xf]  ;;  %v6260_v5 = vld [vmem:[%s8251_s26 + $0x38] sm:$0xff]   ;;  %s8258_s4 = smov 64  }
 0x333   : > { %v5640_v41 = vpop.f32.mrf.mxu0 }
 0x334   : > { %v1909_v44 = vadd.f32 %v5640_v41, %v1753_v37 }
 0x335   : > { %v1900_v45 = vpop.f32.mrf.mxu0 }
 0x336   : > { %v7618_v11 = vpack.c.bf16 %v1909_v44, %v1906_v43  ;;  %v1901_v47 = vadd.f32 %v1900_v45, %v1743_v42 }
 0x337   : > { %v5643_v49 = vpop.f32.mrf.mxu0 }
 0x338   : > { %v7620_v51 = vpack.c.bf16 %v1901_v47, %v1898_v7  ;;  %v1922_v52 = vadd.f32 %v5643_v49, %v1768_v4  ;;  %v6257_v4 = vld [vmem:[%s8248_s14] ss:$8 sps:$4 sm:$0xff]   ;;  %v6261_v7 = vld [vmem:[%s8251_s26 + $0x30] sm:$0xff]  }
 0x339   : > { %v1913_v54 = vpop.f32.mrf.mxu0  ;;  %v6262_v47 = vld [vmem:[%s8251_s26 + $0x28] sm:$0xff]   ;;  %v6263_v49 = vld [vmem:[%s8251_s26 + $0x20] sm:$0xff]  }
 0x33a   : > { %v1914_v22 = vadd.f32 %v1913_v54, %v1758_v36  ;;  %v6264_v54 = vld [vmem:[%s8251_s26 + $0x18] sm:$0xff]  }
 0x33b   : > { %v5644_v56 = vpop.f32.mrf.mxu0 }
 0x33d   : > { %v1916_v60 = vpop.f32.mrf.mxu0 }
 0x33e   : > { %v1917_v0 = vadd.f32 %v1916_v60, %v1763_v35  ;;  %v6266_v60 = vld [vmem:[%s8251_s26 + $0x8] sm:$0xff]  }
 0x33f   : > { %v5647_v3 = vpop.f32.mrf.mxu0 }
 0x341   : > { %v1929_v58 = vpop.f32.mrf.mxu0 }
 0x343   : > { %v5648_v15 = vpop.f32.mrf.mxu0 }
 0x345   : > { %v1932_v17 = vpop.f32.mrf.mxu0 }
 0x347   : > { %v5651_v18 = vpop.f32.mrf.mxu0 }
 0x348   : > { %v1954_v20 = vadd.f32 %v5651_v18, %v7591_v50  ;;  %v1941_v50 = vadd.f32 %v5648_v15, %v7597_v62  ;;  %v1925_v62 = vadd.f32 %v5644_v56, %v1773_v34  ;;  %v6259_v34 = vld [vmem:[%s8248_s14 + $0x4] ss:$8 sps:$4 sm:$0xff]   ;;  %v6265_v56 = vld [vmem:[%s8251_s26 + $0x10] sm:$0xff]  }
 0x349   : > { %v1945_v1 = vpop.f32.mrf.mxu0 }
 0x34a   : > { %v1946_v26 = vadd.f32 %v1945_v1, %v7595_v9  ;;  %v1930_v9 = vadd.f32 %v1929_v58, %v7603_v14  ;;  %v2199_v14 = vand.u32 127, %v1347_v53  ;;  %v6951_v53 = vmov 1.0|1.0  }
 0x34b   : > { %v5652_v19 = vpop.f32.mrf.mxu0 }
 0x34c   : > { %v1957_v23 = vadd.f32 %v5652_v19, %v7589_v55  ;;  %v1938_v55 = vadd.f32 %v5647_v3, %v7599_v10  ;;  %v7646_v10 = vpack.c.bf16 %v1925_v62, %v1922_v52  ;;  %vm2200_vm2 = vcmp.eq.s32.totalorder %v7453_v57, %v2199_v14  ;;  %v6256_v57 = vld [vmem:[%s8248_s14 + $0x14] ss:$8 sps:$4 sm:$0xff]   ;;  %v6267_v3 = vld [vmem:[%s8251_s26] sm:$0xff]  }
 0x34d   : > { %v1948_v25 = vpop.f32.mrf.mxu0  ;;  %vm5322_vm3 = vmpackc.low %vm2200_vm2, %vm2200_vm2  ;;  %2375 = vmatprep.subr.bf16.mxu1 %v6256_v57  ;;  %v5341_v52 = vld [vmem:[#allocation12] ss:$0 sm:$0xff] }
 0x34e   : > { %v7624_v24 = vpack.c.bf16 %v1957_v23, %v1954_v20  ;;  %v1949_v48 = vadd.f32 %v1948_v25, %v7593_v6  ;;  %v7636_v28 = vpack.c.bf16 %v1941_v50, %v1938_v55  ;;  %v1933_v6 = vadd.f32 %v1932_v17, %v7601_v12  ;;  %2376 = vmatpush1.bf16.msra.mxu1 %v6254_v21  ;;  %v2271_v17 = vld [vmem:[#allocation10] sm:$0x3] }
 0x34f   : > { %v7650_v12 = vpack.c.bf16 %v1917_v0, %v1914_v22  ;;  %2377 = vmatprep.subr.bf16.mxu1 %v6259_v34  ;;  %v2280_v1 = vrot.slane %v2271_v17, %v7461_v61 }
 0x350   : > { %5686 = vmatpush3.bf16.xpose.msra.mxu0 %v7624_v24  ;;  %v7630_v27 = vpack.c.bf16 %v1949_v48, %v1946_v26  ;;  %v7642_v8 = vpack.c.bf16 %v1933_v6, %v1930_v9  ;;  %v2276_v26 = vrot.slane %v2271_v17, %v7464_v63 }
 0x351   : > { %5687 = vmatprep.subr.bf16.mxu0 %v6948_v2 }
 0x352   : > { %2378 = vmatpush1.bf16.msra.mxu1 %v6257_v4 }
 0x353   : > { %5705 = vmatprep.subr.bf16.mxu1 %v6948_v2 }
 0x358   : > { %5688 = vmatpush3.bf16.xpose.msra.mxu0 %v7630_v27 }
 0x359   : > { %5689 = vmatprep.subr.bf16.mxu0 %v6948_v2 }
 0x360   : > { %5690 = vmatpush3.bf16.xpose.msra.mxu0 %v7636_v28 }
 0x361   : > { %5691 = vmatprep.subr.bf16.mxu0 %v6948_v2 }
 0x368   : > { %5692 = vmatpush3.bf16.xpose.msra.mxu0 %v7642_v8 }
 0x369   : > { %5693 = vmatprep.subr.bf16.mxu0 %v6948_v2 }
 0x370   : > { %5694 = vmatpush3.bf16.xpose.msra.mxu0 %v7646_v10 }
 0x371   : > { %5695 = vmatprep.subr.bf16.mxu0 %v6948_v2 }
 0x378   : > { %5696 = vmatpush3.bf16.xpose.msra.mxu0 %v7650_v12 }
 0x379   : > { %5697 = vmatprep.subr.bf16.mxu0 %v6948_v2 }
 0x380   : > { %5698 = vmatpush3.bf16.xpose.msra.mxu0 %v7618_v11 }
 0x381   : > { %5699 = vmatprep.subr.bf16.mxu0 %v6948_v2 }
 0x387   : > { %v2190_v30 = vpop.f32.mrf.mxu1 }
 0x388   : > { %5700 = vmatpush3.bf16.xpose.msra.mxu0 %v7620_v51  ;;  %v2191_v31 = vadd.f32 %v5313_v29, %v2190_v30 }
 0x389   : > { %v5683_v16 = vpop.f32.mrf.mxu1  ;;  %5731 = vmatprep.subr.bf16.mxu0 %v6948_v2 }
 0x38a   : > { %2243 = vst [vmem:[#allocation2] sm:$0xf] %v2191_v31 }
 0x38b   : > { %v2193_v32 = vpop.f32.mrf.mxu1 }
 0x38c   : > { %v2249_v32 = vld [vmem:[%s7720_s23] sm:$0x1] }
 0x38d   : > { %v5684_v33 = vpop.f32.mrf.mxu1 }
 0x38e   : > { %v5324_v33 = vadd.f32 -1.0, %v2249_v32 }
 0x38f   : > { %5702 = vmatmul.mubr.msk.bf16.vlgmr.msra.gmra.mxu0 %vm5322_vm3, %v6951_v53 }
 0x390   : > { %5733 = vmatprep.mubr.msk.bf16.mxu0 %vm6949_vm0, %v6948_v2  ;;  %v2251_v53 = vmul.f32 1e+09, %v5324_v33 }
 0x392   : > { %v7724_v46 = vrot.slane %v2251_v53, %v7464_v63 }
 0x44f   : > { %v2237_v35 = vpop.f32.mrf.mxu0 }
 0x450   : > { %2244 = vst [vmem:[#allocation2 + $0x4] sm:$0xff] %v2237_v35 }
 0x451   : > { %v5703_v36 = vpop.f32.mrf.mxu0 }
 0x453   : > { %v2240_v37 = vpop.f32.mrf.mxu0 }
 0x455   : > { %v5704_v38 = vpop.f32.mrf.mxu0 }
 0x457   : > { %v7676_v41 = vld [vmem:[#allocation2] sm:$0xff]  ;;  %v7678_v42 = vld [vmem:[#allocation2 + $0x8] sm:$0xf] }
 0x458   : > { %v2252_v43 = vadd.f32 %v7671_v39, %v7676_v41  ;;  %v2253_v44 = vadd.f32 %v7674_v40, %v7678_v42  ;;  %v2406_v58 = vpack.c.bf16 %v7678_v42, %v7676_v41 }
 0x45a   : > { %v2254_v45 = vpack.c.bf16 %v2253_v44, %v2252_v43 }
 0x45c   : > { %2396 = vmatmul.mubr.bf16.vlgmr.msra.gmra.mxu1 %v2254_v45 }
 0x45d   : > { %5706 = vmatpush3.bf16.msra.mxu1 %v6260_v5  ;;  %5721 = vmatprep.mubr.msk.bf16.mxu1 %vm6949_vm0, %v6948_v2 }
 0x45e   : > { %5707 = vmatprep.subr.bf16.mxu1 %v6948_v2 }
 0x461   : > { %5708 = vmatpush3.bf16.msra.mxu1 %v6261_v7 }
 0x462   : > { %5709 = vmatprep.subr.bf16.mxu1 %v6948_v2 }
 0x465   : > { %5710 = vmatpush3.bf16.msra.mxu1 %v6262_v47 }
 0x466   : > { %5711 = vmatprep.subr.bf16.mxu1 %v6948_v2 }
 0x469   : > { %5712 = vmatpush3.bf16.msra.mxu1 %v6263_v49 }
 0x46a   : > { %5713 = vmatprep.subr.bf16.mxu1 %v6948_v2 }
 0x46d   : > { %5714 = vmatpush3.bf16.msra.mxu1 %v6264_v54 }
 0x46e   : > { %5715 = vmatprep.subr.bf16.mxu1 %v6948_v2 }
 0x471   : > { %5716 = vmatpush3.bf16.msra.mxu1 %v6265_v56 }
 0x472   : > { %5717 = vmatprep.subr.bf16.mxu1 %v6948_v2 }
 0x475   : > { %5718 = vmatpush3.bf16.msra.mxu1 %v6266_v60 }
 0x476   : > { %5719 = vmatprep.subr.bf16.mxu1 %v6948_v2 }
 0x479   : > { %5720 = vmatpush3.bf16.msra.mxu1 %v6267_v3 }
 0x47a   : > { %5725 = vmatprep.subr.bf16.mxu1 %v6948_v2 }
 0x47c   : > { %5722 = vmatmul.mubr.bf16.vlgmr.msra.gmra.mxu1 %v2406_v58 }
 0x47d   : > { %5727 = vmatprep.mubr.msk.bf16.mxu1 %vm6949_vm0, %v6948_v2 }
 0x51c   : > { %v2397_v15 = vpop.f32.mrf.mxu1 }
 0x51d   : > { %v2398_v6 = vadd.f32 %v2397_v15, %v2276_v26 }
 0x51e   : > { %v2399_v18 = vpop.f32.mrf.mxu1 }
 0x51f   : > { %v2400_v23 = vadd.f32 %v2399_v18, %v2280_v1 }
 0x520   : > { %v2401_v19 = vpop.f32.mrf.mxu1 }
 0x521   : > { %v2402_v55 = vadd.f32 %v2401_v19, %v2276_v26 }
 0x522   : > { %v2403_v20 = vpop.f32.mrf.mxu1 }
 0x523   : > { %v2404_v25 = vadd.f32 %v2403_v20, %v2280_v1  ;;  %v2519_v9 = vpack.c.bf16 %v2402_v55, %v2398_v6 }
 0x525   : > { %v2520_v48 = vpack.c.bf16 %v2404_v25, %v2400_v23 }
 0x527   : > { %v2526_v50 = vsel %vm2521_vm4, %v2520_v48, 0 }
 0x528   : > { %5726 = vmatpush3.bf16.xpose.msra.mxu1 %v2526_v50 }
 0x529   : > { %5743 = vmatprep.subr.bf16.mxu1 %v6948_v2 }
 0x52f   : > { %5728 = vmatmul.mubr.msk.bf16.vlgmr.msra.gmra.mxu1 %vm2521_vm4, %v2519_v9 }
 0x530   : > { %5745 = vmatprep.mubr.msk.bf16.mxu1 %vm6949_vm0, %v6948_v2 }
 0x53c   : > { %v2512_v62 = vpop.f32.mrf.mxu1 }
 0x53d   : > { %v2513_v14 = vadd.f32 %v5341_v52, %v2512_v62 }
 0x53e   : > { %v5723_v0 = vpop.f32.mrf.mxu1 }
 0x540   : > { %v2515_v22 = vpop.f32.mrf.mxu1 }
 0x541   : > { %v2516_v29 = vadd.f32 %v5341_v52, %v2515_v22 }
 0x542   : > { %v5724_v30 = vpop.f32.mrf.mxu1 }
 0x543   : > { %v7713_v31 = vpack.c.bf16 %v2516_v29, %v2513_v14 }
 0x545   : > { %v2610_v16 = vsel %vm2608_vm5, %v7713_v31, 0 }
 0x546   : > { %5732 = vmatpush3.bf16.msra.mxu0 %v2610_v16 }
 0x547   : > { %5737 = vmatprep.subr.bf16.mxu0 %v6948_v2 }
 0x5ef   : > { %v2562_v59 = vpop.f32.mrf.mxu1 }
 0x5f0   : > { %v2569_v57 = vmul.f32 0.17677669, %v2562_v59 }
 0x5f1   : > { %v5729_v21 = vpop.f32.mrf.mxu1 }
 0x5f2   : > { %v2577_v4 = vadd.f32 %v7724_v46, %v2569_v57 }
 0x5f3   : > { %v2565_v34 = vpop.f32.mrf.mxu1 }
 0x5f4   : > { %v2570_v35 = vmul.f32 0.17677669, %v2565_v34  ;;  %v2580_v36 = vsel %vm2579_vm6, %v2577_v4, -inf }
 0x5f5   : > { %2581 = vmax.xlane.f32.xlu1 %v2580_v36  ;;  %v5730_v37 = vpop.f32.mrf.mxu1 }
 0x5f6   : > { %v2578_v38 = vadd.f32 %v7724_v46, %v2570_v35 }
 0x5f8   : > { %v2584_v43 = vsel %vm2583_vm7, %v2578_v38, -inf }
 0x5f9   : > { %2585 = vmax.xlane.f32.xlu0 %v2584_v43 }
 0x67e   : > { %v2582_v44 = vpop.xlane.xlu1 %2581 }
 0x67f   : > { %v2587_v5 = vsub.f32 %v2577_v4, %v2582_v44 }
 0x681   : > { %v2589_v45 = vmul.f32 1.442695, %v2587_v5 }
 0x682   : > { %v2586_v7 = vpop.xlane.xlu0 %2585 }
 0x683   : > { %6350 = vpow2.f32 %v2589_v45  ;;  %v2588_v47 = vsub.f32 %v2578_v38, %v2586_v7 }
 0x685   : > { %v2591_v49 = vmul.f32 1.442695, %v2588_v47 }
 0x687   : > { %6352 = vpow2.f32 %v2591_v49 }
 0x690   : > { %v6351_v54 = vpop.eup %6350 }
 0x691   : > { %v2593_v56 = vsel %vm2579_vm6, %v6351_v54, 0.0 }
 0x692   : > { %2594 = vadd.xlane.f32.xlu0 %v2593_v56 }
 0x694   : > { %v6353_v60 = vpop.eup %6352 }
 0x695   : > { %v2596_v3 = vsel %vm2583_vm7, %v6353_v60, 0.0 }
 0x696   : > { %2597 = vadd.xlane.f32.xlu1 %v2596_v3 }
 0x6a7   : > { %2657 = vrot.lane.b32.xlu1 %v2519_v9, %s8167_s8 }
 0x6a8   : > { %2660 = vrot.lane.b32.xlu0 %v2520_v48, %s8167_s8  ;;  %s8253_s8 = sld [smem:[#allocation51_spill]] }
 0x6ab   : > { %2800 = vrot.lane.b32.xlu1 %v2520_v48, %s8173_s13 }
 0x6ac   : > { %2798 = vrot.lane.b32.xlu0 %v2519_v9, %s8173_s13 }
 0x6ae   : > { %v6268_v62 = vld [vmem:[%s8253_s8 + $0x38] sm:$0xff]   ;;  %v6269_v0 = vld [vmem:[%s8253_s8 + $0x30] sm:$0xff]   ;;  %v6270_v22 = vld [vmem:[%s8253_s8 + $0x28] sm:$0xff]  }
 0x6af   : > { %2939 = vrot.lane.b32.xlu1 %v2520_v48, %s8169_s28  ;;  %v6271_v14 = vld [vmem:[%s8253_s8 + $0x20] sm:$0xff]   ;;  %v6272_v29 = vld [vmem:[%s8253_s8 + $0x18] sm:$0xff]   ;;  %v6273_v30 = vld [vmem:[%s8253_s8 + $0x10] sm:$0xff]  }
 0x6b0   : > { %2937 = vrot.lane.b32.xlu0 %v2519_v9, %s8169_s28  ;;  %v6274_v16 = vld [vmem:[%s8253_s8 + $0x8] sm:$0xff]   ;;  %v6275_v32 = vld [vmem:[%s8253_s8] sm:$0xff]   ;;  %s8254_s28 = smov 96   ;;  %s6956_s8 = smov [#allocation27]  }
 0x6b1   : > { %s6807_s9 = sshll.u32 %s6956_s8, 4  ;;  %s6808_s9 = int_to_ptr.vmem [resolvable:$false] %s6807_s9 }
 0x71b   : > { %v2595_v58 = vpop.xlane.xlu0 %2594 }
 0x71c   : > { %6354 = vrcp.f32 %v2595_v58 }
 0x71f   : > { %v2598_v15 = vpop.xlane.xlu1 %2597  ;;  %v2661_v20 = vpop.permute.xlu0 %2660 }
 0x720   : > { %6356 = vrcp.f32 %v2598_v15  ;;  %v2666_v26 = vsel %vm2521_vm4, %v2661_v20, 0 }
 0x723   : > { %v2658_v25 = vpop.permute.xlu1 %2657  ;;  %v2799_v6 = vpop.permute.xlu0 %2798 }
 0x727   : > { %v2801_v48 = vpop.permute.xlu1 %2800  ;;  %v2938_v52 = vpop.permute.xlu0 %2937 }
 0x728   : > { %v2806_v50 = vsel %vm2521_vm4, %v2801_v48, 0 }
 0x729   : > { %v6355_v17 = vpop.eup %6354 }
 0x72a   : > { %v2601_v1 = vmul.f32 %v6355_v17, %v6351_v54 }
 0x72b   : > { %v2940_v55 = vpop.permute.xlu1 %2939 }
 0x72c   : > { %v2945_v9 = vsel %vm2521_vm4, %v2940_v55, 0 }
 0x72d   : > { %v6357_v18 = vpop.eup %6356 }
 0x72e   : > { %v2602_v19 = vmul.f32 %v6357_v18, %v6353_v60 }
 0x730   : > { %v2603_v23 = vpack.c.bf16 %v2602_v19, %v2601_v1 }
 0x732   : > { %5734 = vmatmul.mubr.msk.bf16.vlgmr.msra.gmra.mxu0 %vm2579_vm6, %v2603_v23 }
 0x733   : > { %5738 = vmatpush3.bf16.xpose.msra.mxu0 %v2666_v26  ;;  %5739 = vmatprep.mubr.msk.bf16.mxu0 %vm6949_vm0, %v6948_v2 }
 0x734   : > { %5749 = vmatprep.subr.bf16.mxu0 %v6948_v2 }
 0x73a   : > { %5740 = vmatmul.mubr.msk.bf16.vlgmr.msra.gmra.mxu0 %vm2521_vm4, %v2658_v25 }
 0x73b   : > { %5750 = vmatpush3.bf16.xpose.msra.mxu0 %v2806_v50  ;;  %5751 = vmatprep.mubr.msk.bf16.mxu0 %vm6949_vm0, %v6948_v2 }
 0x73c   : > { %5761 = vmatprep.subr.bf16.mxu0 %v6948_v2 }
 0x742   : > { %5752 = vmatmul.mubr.msk.bf16.vlgmr.msra.gmra.mxu0 %vm2521_vm4, %v2799_v6 }
 0x743   : > { %5762 = vmatpush3.bf16.xpose.msra.mxu0 %v2945_v9  ;;  %5763 = vmatprep.mubr.msk.bf16.mxu0 %vm6949_vm0, %v6948_v2 }
 0x744   : > { %5773 = vmatprep.subr.bf16.mxu0 %v6948_v2 }
 0x74a   : > { %5764 = vmatmul.mubr.msk.bf16.vlgmr.msra.gmra.mxu0 %vm2521_vm4, %v2938_v52 }
 0x74b   : > { %5774 = vmatpush3.bf16.msra.mxu0 %v6268_v62  ;;  %5789 = vmatprep.mubr.msk.bf16.mxu0 %vm6949_vm0, %v6948_v2 }
 0x74c   : > { %5775 = vmatprep.subr.bf16.mxu0 %v6948_v2 }
 0x74f   : > { %5776 = vmatpush3.bf16.msra.mxu0 %v6269_v0 }
 0x750   : > { %5777 = vmatprep.subr.bf16.mxu0 %v6948_v2 }
 0x753   : > { %5778 = vmatpush3.bf16.msra.mxu0 %v6270_v22 }
 0x754   : > { %5779 = vmatprep.subr.bf16.mxu0 %v6948_v2 }
 0x757   : > { %5780 = vmatpush3.bf16.msra.mxu0 %v6271_v14 }
 0x758   : > { %5781 = vmatprep.subr.bf16.mxu0 %v6948_v2 }
 0x75b   : > { %5782 = vmatpush3.bf16.msra.mxu0 %v6272_v29 }
 0x75c   : > { %5783 = vmatprep.subr.bf16.mxu0 %v6948_v2 }
 0x75f   : > { %5784 = vmatpush3.bf16.msra.mxu0 %v6273_v30 }
 0x760   : > { %5785 = vmatprep.subr.bf16.mxu0 %v6948_v2 }
 0x763   : > { %5786 = vmatpush3.bf16.msra.mxu0 %v6274_v16 }
 0x764   : > { %5787 = vmatprep.subr.bf16.mxu0 %v6948_v2 }
 0x767   : > { %5788 = vmatpush3.bf16.msra.mxu0 %v6275_v32 }
 0x768   : > { %5813 = vmatprep.subr.bf16.mxu0 %v7624_v24 }
 0x7f2   : > { %v2646_v33 = vpop.f32.mrf.mxu0 }
 0x7f3   : > { %2653 = vst.msk [vmem:[#allocation3] sm:$0xff] %vm2521_vm4, %v2646_v33 }
 0x7f4   : > { %v5735_v53 = vpop.f32.mrf.mxu0 }
 0x7f6   : > { %v2649_v59 = vpop.f32.mrf.mxu0 }
 0x7f7   : > { %2655 = vst.msk [vmem:[#allocation3 + $0x8] sm:$0xf] %vm2654_vm8, %v2649_v59 }
 0x7f8   : > { %v5736_v57 = vpop.f32.mrf.mxu0 }
 0x7fa   : > { %v2702_v21 = vpop.f32.mrf.mxu0 }
 0x7fb   : > { %v2709_v4 = vmul.f32 0.17677669, %v2702_v21 }
 0x7fc   : > { %v5741_v34 = vpop.f32.mrf.mxu0 }
 0x7fd   : > { %v2711_v35 = vadd.f32 %v2709_v4, %v7724_v46 }
 0x7fe   : > { %v2705_v36 = vpop.f32.mrf.mxu0 }
 0x7ff   : > { %v2710_v37 = vmul.f32 0.17677669, %v2705_v36  ;;  %v2713_v38 = vsel %vm2579_vm6, %v2711_v35, -inf }
 0x800   : > { %2714 = vmax.xlane.f32.xlu1 %v2713_v38  ;;  %v5742_v43 = vpop.f32.mrf.mxu0 }
 0x801   : > { %v2712_v44 = vadd.f32 %v2710_v37, %v7724_v46 }
 0x802   : > { %v2842_v5 = vpop.f32.mrf.mxu0 }
 0x803   : > { %v2849_v45 = vmul.f32 0.17677669, %v2842_v5  ;;  %v2716_v7 = vsel %vm2583_vm7, %v2712_v44, -inf }
 0x804   : > { %2717 = vmax.xlane.f32.xlu0 %v2716_v7  ;;  %v5753_v47 = vpop.f32.mrf.mxu0 }
 0x805   : > { %v2851_v49 = vadd.f32 %v2849_v45, %v7724_v46 }
 0x806   : > { %v2845_v54 = vpop.f32.mrf.mxu0 }
 0x807   : > { %v2850_v56 = vmul.f32 0.17677669, %v2845_v54  ;;  %v2853_v60 = vsel %vm2579_vm6, %v2851_v49, -inf }
 0x808   : > { %2854 = vmax.xlane.f32.xlu0 %v2853_v60  ;;  %v5754_v3 = vpop.f32.mrf.mxu0 }
 0x809   : > { %v2852_v58 = vadd.f32 %v2850_v56, %v7724_v46 }
 0x80a   : > { %v2981_v15 = vpop.f32.mrf.mxu0 }
 0x80b   : > { %v2988_v17 = vmul.f32 0.17677669, %v2981_v15  ;;  %v2856_v18 = vsel %vm2583_vm7, %v2852_v58, -inf }
 0x80c   : > { %2857 = vmax.xlane.f32.xlu1 %v2856_v18  ;;  %v5765_v1 = vpop.f32.mrf.mxu0 }
 0x80d   : > { %v2990_v19 = vadd.f32 %v2988_v17, %v7724_v46 }
 0x80e   : > { %v2984_v20 = vpop.f32.mrf.mxu0 }
 0x80f   : > { %v2989_v23 = vmul.f32 0.17677669, %v2984_v20  ;;  %v2992_v25 = vsel %vm2579_vm6, %v2990_v19, -inf }
 0x810   : > { %2993 = vmax.xlane.f32.xlu0 %v2992_v25  ;;  %v5766_v26 = vpop.f32.mrf.mxu0 }
 0x811   : > { %v2991_v48 = vadd.f32 %v2989_v23, %v7724_v46 }
 0x813   : > { %v2995_v50 = vsel %vm2583_vm7, %v2991_v48, -inf }
 0x814   : > { %2996 = vmax.xlane.f32.xlu1 %v2995_v50 }
 0x889   : > { %v2715_v55 = vpop.xlane.xlu1 %2714 }
 0x88a   : > { %v2719_v6 = vsub.f32 %v2711_v35, %v2715_v55 }
 0x88c   : > { %v2721_v9 = vmul.f32 1.442695, %v2719_v6 }
 0x88d   : > { %v2718_v62 = vpop.xlane.xlu0 %2717 }
 0x88e   : > { %6358 = vpow2.f32 %v2721_v9  ;;  %v2720_v52 = vsub.f32 %v2712_v44, %v2718_v62 }
 0x890   : > { %v2723_v0 = vmul.f32 1.442695, %v2720_v52 }
 0x891   : > { %v2855_v22 = vpop.xlane.xlu0 %2854 }
 0x892   : > { %6360 = vpow2.f32 %v2723_v0  ;;  %v2859_v14 = vsub.f32 %v2851_v49, %v2855_v22 }
 0x894   : > { %v2861_v29 = vmul.f32 1.442695, %v2859_v14 }
 0x895   : > { %v2858_v30 = vpop.xlane.xlu1 %2857 }
 0x896   : > { %6362 = vpow2.f32 %v2861_v29  ;;  %v2860_v16 = vsub.f32 %v2852_v58, %v2858_v30 }
 0x898   : > { %v2863_v32 = vmul.f32 1.442695, %v2860_v16 }
 0x899   : > { %v2994_v33 = vpop.xlane.xlu0 %2993 }
 0x89a   : > { %6364 = vpow2.f32 %v2863_v32  ;;  %v2998_v46 = vsub.f32 %v2990_v19, %v2994_v33 }
 0x89b   : > { %v6359_v53 = vpop.eup %6358 }
 0x89c   : > { %v3000_v59 = vmul.f32 1.442695, %v2998_v46  ;;  %v2725_v57 = vsel %vm2579_vm6, %v6359_v53, 0.0 }
 0x89d   : > { %2726 = vadd.xlane.f32.xlu0 %v2725_v57  ;;  %v2997_v44 = vpop.xlane.xlu1 %2996 }
 0x89e   : > { %6366 = vpow2.f32 %v3000_v59  ;;  %v2999_v5 = vsub.f32 %v2991_v48, %v2997_v44 }
 0x89f   : > { %v6361_v21 = vpop.eup %6360 }
 0x8a0   : > { %v2728_v4 = vsel %vm2583_vm7, %v6361_v21, 0.0  ;;  %v3002_v45 = vmul.f32 1.442695, %v2999_v5 }
 0x8a1   : > { %2729 = vadd.xlane.f32.xlu1 %v2728_v4 }
 0x8a2   : > { %6368 = vpow2.f32 %v3002_v45 }
 0x8a3   : > { %v6363_v34 = vpop.eup %6362 }
 0x8a4   : > { %v2865_v35 = vsel %vm2579_vm6, %v6363_v34, 0.0 }
 0x8a5   : > { %2866 = vadd.xlane.f32.xlu0 %v2865_v35 }
 0x8a7   : > { %v6365_v36 = vpop.eup %6364 }
 0x8a8   : > { %v2868_v37 = vsel %vm2583_vm7, %v6365_v36, 0.0 }
 0x8a9   : > { %2869 = vadd.xlane.f32.xlu1 %v2868_v37 }
 0x8ab   : > { %v6367_v38 = vpop.eup %6366 }
 0x8ac   : > { %v3004_v43 = vsel %vm2579_vm6, %v6367_v38, 0.0 }
 0x8ad   : > { %3005 = vadd.xlane.f32.xlu0 %v3004_v43 }
 0x8af   : > { %v6369_v7 = vpop.eup %6368 }
 0x8b0   : > { %v3007_v47 = vsel %vm2583_vm7, %v6369_v7, 0.0 }
 0x8ba   : > { %2876 = vrot.lane.b32.xlu1 %v7713_v31, %s8173_s13 }
 0x8c3   : > { %2737 = vrot.lane.b32.xlu0 %v7713_v31, %s8254_s28 }
 0x8de   : > { %3008 = vadd.xlane.f32.xlu1 %v3007_v47  ;;  %v6276_v47 = vld [vmem:[%s8256_s1] sm:$0xff]  }
 0x8ef   : > { %3015 = vrot.lane.b32.xlu1 %v7713_v31, %s8255_s0 }
 0x926   : > { %v2727_v49 = vpop.xlane.xlu0 %2726 }
 0x927   : > { %6370 = vrcp.f32 %v2727_v49 }
 0x92a   : > { %v2730_v54 = vpop.xlane.xlu1 %2729 }
 0x92b   : > { %6372 = vrcp.f32 %v2730_v54  ;;  %v6277_v54 = vld [vmem:[%s8256_s1 + $0x8] sm:$0xff]  }
 0x92e   : > { %v2867_v56 = vpop.xlane.xlu0 %2866 }
 0x92f   : > { %6374 = vrcp.f32 %v2867_v56  ;;  %v5358_v56 = vld [vmem:[#allocation13] ss:$0 sm:$0xff] }
 0x932   : > { %v2870_v60 = vpop.xlane.xlu1 %2869 }
 0x933   : > { %6376 = vrcp.f32 %v2870_v60 }
 0x934   : > { %v6371_v58 = vpop.eup %6370 }
 0x935   : > { %v2733_v19 = vmul.f32 %v6371_v58, %v6359_v53 }
 0x936   : > { %v3006_v3 = vpop.xlane.xlu0 %3005  ;;  %v2877_v20 = vpop.permute.xlu1 %2876 }
 0x937   : > { %v2882_v25 = vsel %vm2608_vm5, %v2877_v20, 0  ;;  %6378 = vrcp.f32 %v3006_v3 }
 0x938   : > { %v6373_v15 = vpop.eup %6372 }
 0x939   : > { %v2734_v17 = vmul.f32 %v6373_v15, %v6361_v21 }
 0x93a   : > { %v2738_v18 = vpop.permute.xlu0 %2737 }
 0x93b   : > { %v2743_v1 = vsel %vm2608_vm5, %v2738_v18, 0  ;;  %v2735_v23 = vpack.c.bf16 %v2734_v17, %v2733_v19 }
 0x93c   : > { %5744 = vmatpush3.bf16.msra.mxu1 %v2743_v1  ;;  %v6375_v31 = vpop.eup %6374 }
 0x93d   : > { %5755 = vmatprep.subr.bf16.mxu1 %v6948_v2  ;;  %v2873_v50 = vmul.f32 %v6375_v31, %v6363_v34 }
 0x93f   : > { %5746 = vmatmul.mubr.msk.bf16.vlgmr.msra.gmra.mxu1 %vm2579_vm6, %v2735_v23 }
 0x940   : > { %v6377_v26 = vpop.eup %6376  ;;  %5756 = vmatpush3.bf16.msra.mxu1 %v2882_v25  ;;  %5757 = vmatprep.mubr.msk.bf16.mxu1 %vm6949_vm0, %v6948_v2  ;;  %v6278_v25 = vld [vmem:[#allocation15 + $0x38] sm:$0xff]  }
 0x941   : > { %v2874_v48 = vmul.f32 %v6377_v26, %v6365_v36  ;;  %5767 = vmatprep.subr.bf16.mxu1 %v6948_v2 }
 0x943   : > { %v2875_v55 = vpack.c.bf16 %v2874_v48, %v2873_v50  ;;  %v6280_v50 = vld [vmem:[#allocation15 + $0x28] sm:$0xff]  }
 0x944   : > { %v6379_v52 = vpop.eup %6378 }
 0x945   : > { %v3012_v22 = vmul.f32 %v6379_v52, %v6367_v38  ;;  %v6283_v52 = vld [vmem:[#allocation15 + $0x10] sm:$0xff]  }
 0x947   : > { %5758 = vmatmul.mubr.msk.bf16.vlgmr.msra.gmra.mxu1 %vm2579_vm6, %v2875_v55 }
 0x948   : > { %5769 = vmatprep.mubr.msk.bf16.mxu1 %vm6949_vm0, %v6948_v2 }
 0x967   : > { %v3009_v6 = vpop.xlane.xlu1 %3008 }
 0x968   : > { %6380 = vrcp.f32 %v3009_v6 }
 0x96b   : > { %v3016_v9 = vpop.permute.xlu1 %3015 }
 0x96c   : > { %v3021_v62 = vsel %vm2608_vm5, %v3016_v9, 0  ;;  %v6281_v9 = vld [vmem:[#allocation15 + $0x20] sm:$0xff]  }
 0x96d   : > { %5768 = vmatpush3.bf16.msra.mxu1 %v3021_v62  ;;  %v6282_v62 = vld [vmem:[#allocation15 + $0x18] sm:$0xff]  }
 0x96e   : > { %5793 = vmatprep.subr.bf16.mxu1 %v6948_v2 }
 0x975   : > { %v6381_v0 = vpop.eup %6380 }
 0x976   : > { %v3013_v14 = vmul.f32 %v6381_v0, %v6369_v7  ;;  %v6284_v0 = vld [vmem:[#allocation15 + $0x8] sm:$0xff]  }
 0x978   : > { %v3014_v29 = vpack.c.bf16 %v3013_v14, %v3012_v22  ;;  %v6285_v22 = vld [vmem:[#allocation15] sm:$0xff]  }
 0x97a   : > { %5770 = vmatmul.mubr.msk.bf16.vlgmr.msra.gmra.mxu1 %vm2579_vm6, %v3014_v29 }
 0x97b   : > { %5809 = vmatprep.mubr.msk.bf16.mxu1 %vm6949_vm0, %v6948_v2  ;;  %5794 = vmatpush3.bf16.msra.mxu1 %v6278_v25 }
 0x97c   : > { %5795 = vmatprep.subr.bf16.mxu1 %v6948_v2 }
 0x9ff   : > { %v2779_v30 = vpop.f32.mrf.mxu1 }
 0xa00   : > { %2788 = vrot.lane.b32.xlu0 %v2779_v30, %s8255_s0 }
 0xa01   : > { %v5747_v16 = vpop.f32.mrf.mxu1 }
 0xa03   : > { %v2782_v32 = vpop.f32.mrf.mxu1 }
 0xa04   : > { %2790 = vrot.lane.b32.xlu1 %v2782_v32, %s8255_s0 }
 0xa05   : > { %v5748_v33 = vpop.f32.mrf.mxu1 }
 0xa07   : > { %v2918_v46 = vpop.f32.mrf.mxu1 }
 0xa08   : > { %2927 = vrot.lane.b32.xlu0 %v2918_v46, %s8173_s13 }
 0xa09   : > { %v5759_v53 = vpop.f32.mrf.mxu1 }
 0xa0b   : > { %v2921_v59 = vpop.f32.mrf.mxu1 }
 0xa0c   : > { %2929 = vrot.lane.b32.xlu1 %v2921_v59, %s8173_s13  ;;  %s8257_s13 = sld [smem:[#allocation56_spill]] }
 0xa0d   : > { %v5760_v57 = vpop.f32.mrf.mxu1 }
 0xa12   : > { %v3387_v26 = vld [vmem:[%s8257_s13 + $0x10] sm:$0xff]  ;;  %v3385_v48 = vld [vmem:[%s8257_s13] sm:$0xff]  ;;  %v3388_v55 = vld [vmem:[%s8257_s13 + $0x18] sm:$0xff] }
 0xa13   : > { %v3386_v6 = vld [vmem:[%s8257_s13 + $0x8] sm:$0xff] }
 0xa3a   : > { %v3057_v21 = vpop.f32.mrf.mxu1 }
 0xa3b   : > { %3066 = vrot.lane.b32.xlu0 %v3057_v21, %s8254_s28 }
 0xa3c   : > { %v5771_v4 = vpop.f32.mrf.mxu1 }
 0xa3e   : > { %v3060_v34 = vpop.f32.mrf.mxu1 }
 0xa3f   : > { %3068 = vrot.lane.b32.xlu1 %v3060_v34, %s8254_s28 }
 0xa40   : > { %v5772_v35 = vpop.f32.mrf.mxu1 }
 0xa72   : > { %v2789_v36 = vpop.permute.xlu0 %2788 }
 0xa73   : > { %2795 = vst.msk [vmem:[#allocation3] sm:$0xff] %vm2794_vm9, %v2789_v36 }
 0xa76   : > { %v2791_v37 = vpop.permute.xlu1 %2790 }
 0xa77   : > { %2797 = vst.msk [vmem:[#allocation3 + $0x8] sm:$0xf] %vm2796_vm10, %v2791_v37 }
 0xa7a   : > { %v2928_v38 = vpop.permute.xlu0 %2927 }
 0xa7b   : > { %2934 = vst.msk [vmem:[#allocation3] sm:$0xff] %vm2933_vm11, %v2928_v38 }
 0xa7e   : > { %v2930_v43 = vpop.permute.xlu1 %2929 }
 0xa7f   : > { %2936 = vst.msk [vmem:[#allocation3 + $0x8] sm:$0xf] %vm2935_vm12, %v2930_v43 }
 0xaad   : > { %v3067_v44 = vpop.permute.xlu0 %3066 }
 0xaae   : > { %3073 = vst.msk [vmem:[#allocation3] sm:$0xff] %vm3072_vm13, %v3067_v44 }
 0xab1   : > { %v3069_v5 = vpop.permute.xlu1 %3068 }
 0xab2   : > { %3075 = vst.msk [vmem:[#allocation3 + $0x8] sm:$0xf] %vm3074_vm14, %v3069_v5  ;;  %v5367_v5 = vld [vmem:[#allocation24] ss:$0 sm:$0xff] }
 0xab5   : > { %v3076_v45 = vld [vmem:[#allocation3] sm:$0xff] }
 0xab9   : > { %v3077_v7 = vld [vmem:[#allocation3 + $0x8] sm:$0xf] }
 0xaba   : > { %v3078_v49 = vpack.c.bf16 %v3077_v7, %v3076_v45 }
 0xabc   : > { %5790 = vmatmul.mubr.bf16.vlgmr.msra.gmra.mxu0 %v3078_v49 }
 0xabd   : > { %5814 = vmatpush3.bf16.msra.mxu0 %v7624_v24  ;;  %5829 = vmatprep.mubr.bf16.mxu0 %v6276_v47 }
 0xabe   : > { %5815 = vmatprep.subr.bf16.mxu0 %v7630_v27 }
 0xac1   : > { %5816 = vmatpush3.bf16.msra.mxu0 %v7630_v27 }
 0xac2   : > { %5817 = vmatprep.subr.bf16.mxu0 %v7636_v28 }
 0xac5   : > { %5818 = vmatpush3.bf16.msra.mxu0 %v7636_v28 }
 0xac6   : > { %5819 = vmatprep.subr.bf16.mxu0 %v7642_v8 }
 0xac9   : > { %5820 = vmatpush3.bf16.msra.mxu0 %v7642_v8 }
 0xaca   : > { %5821 = vmatprep.subr.bf16.mxu0 %v7646_v10 }
 0xacd   : > { %5822 = vmatpush3.bf16.msra.mxu0 %v7646_v10 }
 0xace   : > { %5823 = vmatprep.subr.bf16.mxu0 %v7650_v12 }
 0xad1   : > { %5824 = vmatpush3.bf16.msra.mxu0 %v7650_v12 }
 0xad2   : > { %5825 = vmatprep.subr.bf16.mxu0 %v7618_v11 }
 0xad5   : > { %5826 = vmatpush3.bf16.msra.mxu0 %v7618_v11 }
 0xad6   : > { %5827 = vmatprep.subr.bf16.mxu0 %v7620_v51 }
 0xad9   : > { %5828 = vmatpush3.bf16.msra.mxu0 %v7620_v51 }
 0xada   : > { %5917 = vmatprep.subr.bf16.mxu0 %v6948_v2 }
 0xadc   : > { %5830 = vmatmul.mubr.bf16.vlgmr.msra.gmra.mxu0 %v6277_v54 }
 0xb7c   : > { %v3184_v60 = vpop.f32.mrf.mxu0 }
 0xb7d   : > { %v3185_v3 = vadd.f32 %v5358_v56, %v3184_v60  ;;  %v5368_v60 = vld [vmem:[#allocation25] ss:$0 sm:$0xff] }
 0xb7e   : > { %v5791_v58 = vpop.f32.mrf.mxu0 }
 0xb7f   : > { %v7844_v15 = vadd.f32 %v3185_v3, %v7676_v41 }
 0xb80   : > { %v3187_v17 = vpop.f32.mrf.mxu0 }
 0xb81   : > { %v3188_v18 = vadd.f32 %v5358_v56, %v3187_v17  ;;  %3195 = vadd.xlane.f32.xlu0 %v7844_v15  ;;  %v3203_v20 = vmul.f32 %v7844_v15, %v7844_v15 }
 0xb82   : > { %v5792_v1 = vpop.f32.mrf.mxu0 }
 0xb83   : > { %v7848_v19 = vadd.f32 %v3188_v18, %v7678_v42  ;;  %v6279_v42 = vld [vmem:[#allocation15 + $0x30] sm:$0xff]  }
 0xb84   : > { %5796 = vmatpush3.bf16.msra.mxu1 %v6279_v42 }
 0xb85   : > { %3205 = vadd.xlane.f32.xlu0 %v3203_v20  ;;  %v3198_v23 = vsel %vm3197_vm15, %v7848_v19, 0.0  ;;  %v3204_v41 = vmul.f32 %v7848_v19, %v7848_v19  ;;  %5797 = vmatprep.subr.bf16.mxu1 %v6948_v2 }
 0xb86   : > { %3199 = vadd.xlane.f32.xlu1 %v3198_v23 }
 0xb87   : > { %v3207_v31 = vsel %vm3197_vm15, %v3204_v41, 0.0 }
 0xb88   : > { %5798 = vmatpush3.bf16.msra.mxu1 %v6280_v50 }
 0xb89   : > { %3208 = vadd.xlane.f32.xlu0 %v3207_v31  ;;  %5799 = vmatprep.subr.bf16.mxu1 %v6948_v2 }
 0xb8c   : > { %5800 = vmatpush3.bf16.msra.mxu1 %v6281_v9  ;;  %v6288_v9 = vld [vmem:[%s8256_s1 + $0x20] sm:$0xff]  }
 0xb8d   : > { %5801 = vmatprep.subr.bf16.mxu1 %v6948_v2 }
 0xb90   : > { %5802 = vmatpush3.bf16.msra.mxu1 %v6282_v62  ;;  %v6289_v62 = vld [vmem:[%s8256_s1 + $0x28] sm:$0xff]  }
 0xb91   : > { %5803 = vmatprep.subr.bf16.mxu1 %v6948_v2 }
 0xb94   : > { %5804 = vmatpush3.bf16.msra.mxu1 %v6283_v52  ;;  %v6290_v52 = vld [vmem:[%s8256_s1 + $0x30] sm:$0xff]  }
 0xb95   : > { %5805 = vmatprep.subr.bf16.mxu1 %v6948_v2 }
 0xb97   : > { %3429 = vperm.xlu1 %6215, %v3387_v26  }
 0xb98   : > { %5806 = vmatpush3.bf16.msra.mxu1 %v6284_v0  ;;  %v6291_v0 = vld [vmem:[%s8256_s1 + $0x38] sm:$0xff]  }
 0xb99   : > { %5807 = vmatprep.subr.bf16.mxu1 %v6948_v2 }
 0xb9b   : > { %3419 = vperm.xlu1 %6215, %v3385_v48  }
 0xb9c   : > { %5808 = vmatpush3.bf16.msra.mxu1 %v6285_v22  ;;  %v5831_v45 = vpop.f32.mrf.mxu0  ;;  %v6292_v22 = vld [vmem:[%s8256_s1 + $0x40] sm:$0xff]  }
 0xb9d   : > { %5861 = vmatprep.subr.bf16.mxu1 %v6948_v2 }
 0xb9e   : > { %v3707_v49 = vpop.f32.mrf.mxu0 }
 0xb9f   : > { %3434 = vperm.xlu0 %6213, %v3388_v55   ;;  %3424 = vperm.xlu1 %6215, %v3386_v6   ;;  %v6287_v6 = vld [vmem:[%s8256_s1 + $0x18] sm:$0xff]  }
 0xba0   : > { %v5832_v17 = vpop.f32.mrf.mxu0 }
 0xba2   : > { %v3710_v31 = vpop.f32.mrf.mxu0 }
 0xc0a   : > { %v3196_v14 = vpop.xlane.xlu0 %3195 }
 0xc0b   : > { %v3201_v29 = vmul.f32 0.0078125, %v3196_v14  ;;  %v6293_v14 = vld [vmem:[%s8256_s1 + $0x48] sm:$0xff]  }
 0xc0d   : > { %v3212_v16 = vmul.f32 %v3201_v29, %v3201_v29  ;;  %v3218_v38 = vsub.f32 %v7844_v15, %v3201_v29 }
 0xc0e   : > { %v3206_v30 = vpop.xlane.xlu0 %3205 }
 0xc0f   : > { %v3210_v32 = vmul.f32 0.0078125, %v3206_v30  ;;  %v3200_v33 = vpop.xlane.xlu1 %3199  ;;  %v5369_v30 = vld [vmem:[#allocation16] ss:$0 sm:$0xff] }
 0xc10   : > { %v3202_v46 = vmul.f32 0.0078125, %v3200_v33 }
 0xc11   : > { %v3214_v53 = vsub.f32 %v3210_v32, %v3212_v16 }
 0xc12   : > { %v3213_v59 = vmul.f32 %v3202_v46, %v3202_v46  ;;  %v3209_v57 = vpop.xlane.xlu0 %3208  ;;  %v3219_v47 = vsub.f32 %v7848_v19, %v3202_v46 }
 0xc13   : > { %v3216_v21 = vmax.f32 %v3214_v53, 0.0  ;;  %v3211_v4 = vmul.f32 0.0078125, %v3209_v57  ;;  %v3430_v43 = vpop.permute.xlu1 %3429 }
 0xc14   : > { %v3716_v26 = vadd.f32 %v5831_v45, %v3430_v43  ;;  %v3401_v43 = vld [vmem:[%s8257_s13 + $0x80] sm:$0xff]  ;;  %v3392_v45 = vld [vmem:[%s8257_s13 + $0x38] sm:$0xff] }
 0xc15   : > { %v3220_v34 = vadd.f32 1e-05, %v3216_v21  ;;  %v3215_v35 = vsub.f32 %v3211_v4, %v3213_v59 }
 0xc17   : > { %6382 = vrsqrt.f32 %v3220_v34  ;;  %v3217_v36 = vmax.f32 %v3215_v35, 0.0  ;;  %v3420_v3 = vpop.permute.xlu1 %3419 }
 0xc18   : > { %v3708_v55 = vadd.f32 %v3707_v49, %v3420_v3 }
 0xc19   : > { %v3221_v37 = vadd.f32 1e-05, %v3217_v36 }
 0xc1a   : > { %v3435_v18 = vpop.permute.xlu0 %3434 }
 0xc1b   : > { %6384 = vrsqrt.f32 %v3221_v37  ;;  %v3719_v15 = vadd.f32 %v5832_v17, %v3435_v18  ;;  %v3425_v41 = vpop.permute.xlu1 %3424 }
 0xc1c   : > { %v3711_v50 = vadd.f32 %v3710_v31, %v3425_v41 }
 0xc1d   : > { %v3835_v48 = vpack.c.bf16 %v3719_v15, %v3716_v26 }
 0xc24   : > { %v6383_v44 = vpop.eup %6382 }
 0xc25   : > { %v3224_v7 = vmul.f32 %v6383_v44, %v3218_v38  ;;  %v3403_v38 = vld [vmem:[%s8257_s13 + $0x90] sm:$0xff]  ;;  %v3402_v44 = vld [vmem:[%s8257_s13 + $0x88] sm:$0xff] }
 0xc27   : > { %v3230_v54 = vmul.f32 %v5367_v5, %v3224_v7  ;;  %v3391_v7 = vld [vmem:[%s8257_s13 + $0x30] sm:$0xff] }
 0xc28   : > { %v6385_v56 = vpop.eup %6384 }
 0xc29   : > { %v3225_v58 = vmul.f32 %v6385_v56, %v3219_v47  ;;  %v7871_v20 = vadd.f32 %v5368_v60, %v3230_v54  ;;  %v3390_v47 = vld [vmem:[%s8257_s13 + $0x28] sm:$0xff] }
 0xc2b   : > { %v3231_v1 = vmul.f32 %v5367_v5, %v3225_v58  ;;  %v3238_v19 = vadd.f32 %v7871_v20, %v7671_v39  ;;  %v3834_v39 = vpack.c.bf16 %v3711_v50, %v3708_v55  ;;  %v3404_v5 = vld [vmem:[%s8257_s13 + $0x98] sm:$0xff] }
 0xc2d   : > { %v7873_v23 = vadd.f32 %v5368_v60, %v3231_v1 }
 0xc2f   : > { %v3239_v25 = vadd.f32 %v7873_v23, %v7674_v40  ;;  %v6286_v40 = vld [vmem:[%s8256_s1 + $0x10] sm:$0xff]  }
 0xc30   : > { %5833 = vmatprep.mubr.bf16.mxu0 %v6286_v40 }
 0xc31   : > { %v3240_v42 = vpack.c.bf16 %v3239_v25, %v3238_v19  ;;  %5834 = vmatmul.mubr.bf16.gmra.mxu0 %v6287_v6 }
 0xc32   : > { %5837 = vmatprep.mubr.bf16.mxu0 %v6288_v9 }
 0xc33   : > { %5810 = vmatmul.mubr.bf16.vlgmr.msra.gmra.mxu1 %v3240_v42 }
 0xc34   : > { %5862 = vmatpush3.bf16.msra.mxu1 %v3835_v48  ;;  %5865 = vmatprep.mubr.msk.bf16.mxu1 %vm6949_vm0, %v6948_v2 }
 0xc35   : > { %5863 = vmatprep.subr.bf16.mxu1 %v6948_v2 }
 0xc38   : > { %5864 = vmatpush3.bf16.msra.mxu1 %v3834_v39 }
 0xc39   : > { %5869 = vmatprep.subr.bf16.mxu1 %v6948_v2  ;;  %5838 = vmatmul.mubr.bf16.gmra.mxu0 %v6289_v62 }
 0xc3a   : > { %5841 = vmatprep.mubr.bf16.mxu0 %v6290_v52 }
 0xc41   : > { %5842 = vmatmul.mubr.bf16.gmra.mxu0 %v6291_v0 }
 0xc42   : > { %5845 = vmatprep.mubr.bf16.mxu0 %v6292_v22 }
 0xc49   : > { %5846 = vmatmul.mubr.bf16.gmra.mxu0 %v6293_v14 }
 0xcf1   : > { %v5835_v49 = vpop.f32.mrf.mxu0 }
 0xcf3   : > { %v3346_v29 = vpop.f32.mrf.mxu1  ;;  %v7905_v54 = vpop.f32.mrf.mxu0 }
 0xcf4   : > { %v3347_v33 = vadd.f32 %v5369_v30, %v3346_v29 }
 0xcf5   : > { %v5811_v16 = vpop.f32.mrf.mxu1  ;;  %v5836_v56 = vpop.f32.mrf.mxu0 }
 0xcf7   : > { %v3349_v32 = vpop.f32.mrf.mxu1  ;;  %v7907_v60 = vpop.f32.mrf.mxu0 }
 0xcf8   : > { %v3350_v46 = vadd.f32 %v5369_v30, %v3349_v32 }
 0xcf9   : > { %v5812_v53 = vpop.f32.mrf.mxu1  ;;  %v7909_v3 = vpop.f32.mrf.mxu0 }
 0xcfa   : > { %v7891_v59 = vpack.c.bf16 %v3350_v46, %v3347_v33 }
 0xcfb   : > { %v7911_v58 = vpop.f32.mrf.mxu0 }
 0xcfc   : > { %5866 = vmatmul.mubr.msk.bf16.vlgmr.msra.gmra.mxu1 %vm2521_vm4, %v7891_v59 }
 0xcfd   : > { %5873 = vmatprep.mubr.msk.bf16.mxu1 %vm6949_vm0, %v6948_v2  ;;  %v7913_v17 = vpop.f32.mrf.mxu0 }
 0xcff   : > { %v7915_v18 = vpop.f32.mrf.mxu0 }
 0xd01   : > { %v7917_v1 = vpop.f32.mrf.mxu0 }
 0xd03   : > { %v7919_v15 = vpop.f32.mrf.mxu0 }
 0xd05   : > { %v7921_v41 = vpop.f32.mrf.mxu0 }
 0xd07   : > { %v7923_v26 = vpop.f32.mrf.mxu0 }
 0xd09   : > { %v5847_v55 = vpop.f32.mrf.mxu0 }
 0xd0b   : > { %v3771_v40 = vpop.f32.mrf.mxu0 }
 0xd0d   : > { %v5848_v9 = vpop.f32.mrf.mxu0 }
 0xd0f   : > { %v3774_v14 = vpop.f32.mrf.mxu0 }
 0xdbc   : > { %v3888_v57 = vpop.f32.mrf.mxu1 }
 0xdbd   : > { %v3895_v21 = vmul.f32 0.17677669, %v3888_v57  ;;  %v3389_v57 = vld [vmem:[%s8257_s13 + $0x20] sm:$0xff] }
 0xdbe   : > { %v5867_v4 = vpop.f32.mrf.mxu1 }
 0xdbf   : > { %3897 = vmax.xlane.f32.xlu1 %v3895_v21  ;;  %v6295_v4 = vld [vmem:[%s8256_s1 + $0x58] sm:$0xff]  }
 0xdc0   : > { %v3891_v34 = vpop.f32.mrf.mxu1 }
 0xdc1   : > { %v3896_v35 = vmul.f32 0.17677669, %v3891_v34 }
 0xdc2   : > { %v5868_v36 = vpop.f32.mrf.mxu1 }
 0xdc3   : > { %v3899_v37 = vsel %vm3197_vm15, %v3896_v35, -inf }
 0xdc4   : > { %3900 = vmax.xlane.f32.xlu0 %v3899_v37 }
 0xdd0   : > { %3509 = vperm.xlu1 %6215, %v3403_v38  }
 0xdd4   : > { %3499 = vperm.xlu1 %6215, %v3401_v43  }
 0xdd8   : > { %3504 = vperm.xlu1 %6215, %v3402_v44  }
 0xdda   : > { %3514 = vperm.xlu0 %6213, %v3404_v5  }
 0xddc   : > { %3454 = vperm.xlu1 %6215, %v3392_v45  }
 0xdde   : > { %3449 = vperm.xlu0 %6213, %v3391_v7  }
 0xde0   : > { %3444 = vperm.xlu1 %6215, %v3390_v47  }
 0xe48   : > { %v3898_v31 = vpop.xlane.xlu1 %3897 }
 0xe49   : > { %v3902_v19 = vsub.f32 %v3895_v21, %v3898_v31  ;;  %v6294_v21 = vld [vmem:[%s8256_s1 + $0x50] sm:$0xff]  }
 0xe4a   : > { %5849 = vmatprep.mubr.bf16.mxu0 %v6294_v21 }
 0xe4b   : > { %v3904_v25 = vmul.f32 1.442695, %v3902_v19  ;;  %5850 = vmatmul.mubr.bf16.gmra.mxu0 %v6295_v4 }
 0xe4c   : > { %v3510_v42 = vpop.permute.xlu1 %3509 }
 0xe4d   : > { %6386 = vpow2.f32 %v3904_v25  ;;  %v3901_v48 = vpop.xlane.xlu0 %3900  ;;  %v3780_v52 = vadd.f32 %v5847_v55, %v3510_v42 }
 0xe4e   : > { %v3903_v50 = vsub.f32 %v3896_v35, %v3901_v48 }
 0xe50   : > { %v3906_v39 = vmul.f32 1.442695, %v3903_v50  ;;  %v3500_v6 = vpop.permute.xlu1 %3499 }
 0xe51   : > { %v3772_v32 = vadd.f32 %v3771_v40, %v3500_v6 }
 0xe52   : > { %6388 = vpow2.f32 %v3906_v39 }
 0xe54   : > { %v3505_v29 = vpop.permute.xlu1 %3504 }
 0xe55   : > { %v3515_v62 = vpop.permute.xlu0 %3514  ;;  %v3775_v16 = vadd.f32 %v3774_v14, %v3505_v29  ;;  %v3408_v14 = vld [vmem:[%s8257_s13 + $0xb8] sm:$0xff]  ;;  %v3406_v29 = vld [vmem:[%s8257_s13 + $0xa8] sm:$0xff] }
 0xe56   : > { %v3783_v0 = vadd.f32 %v5848_v9, %v3515_v62 }
 0xe57   : > { %v3842_v46 = vpack.c.bf16 %v3775_v16, %v3772_v32  ;;  %v3396_v16 = vld [vmem:[%s8257_s13 + $0x58] sm:$0xff]  ;;  %v3395_v32 = vld [vmem:[%s8257_s13 + $0x50] sm:$0xff] }
 0xe58   : > { %v3843_v22 = vpack.c.bf16 %v3783_v0, %v3780_v52  ;;  %v3455_v37 = vpop.permute.xlu1 %3454 }
 0xe59   : > { %v3450_v34 = vpop.permute.xlu0 %3449  ;;  %v3735_v44 = vadd.f32 %v5836_v56, %v3455_v37 }
 0xe5a   : > { %v6387_v30 = vpop.eup %6386  ;;  %5870 = vmatpush3.bf16.xpose.msra.mxu1 %v3843_v22  ;;  %v3732_v5 = vadd.f32 %v5835_v49, %v3450_v34  ;;  %v3407_v22 = vld [vmem:[%s8257_s13 + $0xb0] sm:$0xff] }
 0xe5b   : > { %3908 = vadd.xlane.f32.xlu0 %v6387_v30  ;;  %5871 = vmatprep.subr.bf16.mxu1 %v6948_v2 }
 0xe5c   : > { %v3445_v31 = vpop.permute.xlu1 %3444  ;;  %v3837_v25 = vpack.c.bf16 %v3735_v44, %v3732_v5 }
 0xe5d   : > { %v3727_v48 = vadd.f32 %v7907_v60, %v3445_v31 }
 0xe5f   : > { %v6389_v33 = vpop.eup %6388 }
 0xe60   : > { %v3910_v53 = vsel %vm3197_vm15, %v6389_v33, 0.0 }
 0xe61   : > { %3911 = vadd.xlane.f32.xlu0 %v3910_v53 }
 0xe62   : > { %5872 = vmatpush3.bf16.xpose.msra.mxu1 %v3842_v46 }
 0xe63   : > { %5877 = vmatprep.subr.bf16.mxu1 %v6948_v2 }
 0xe77   : > { %3439 = vperm.xlu0 %6213, %v3389_v57  }
 0xe7b   : > { %3962 = vrot.lane.b32.xlu0 %v7891_v59, %s8254_s28 }
 0xee4   : > { %v3909_v35 = vpop.xlane.xlu0 %3908 }
 0xee5   : > { %6390 = vrcp.f32 %v3909_v35 }
 0xeea   : > { %v3912_v36 = vpop.xlane.xlu0 %3911 }
 0xeeb   : > { %6392 = vrcp.f32 %v3912_v36 }
 0xef2   : > { %v6391_v38 = vpop.eup %6390  ;;  %v3440_v45 = vpop.permute.xlu0 %3439 }
 0xef3   : > { %v3915_v7 = vmul.f32 %v6391_v38, %v6387_v30  ;;  %v3724_v42 = vadd.f32 %v7905_v54, %v3440_v45  ;;  %v3405_v30 = vld [vmem:[%s8257_s13 + $0xa0] sm:$0xff] }
 0xef5   : > { %v3836_v50 = vpack.c.bf16 %v3727_v48, %v3724_v42 }
 0xef6   : > { %v3963_v49 = vpop.permute.xlu0 %3962 }
 0xef8   : > { %v6393_v43 = vpop.eup %6392 }
 0xef9   : > { %v3916_v47 = vmul.f32 %v6393_v43, %v6389_v33 }
 0xefb   : > { %v3917_v19 = vpack.c.bf16 %v3916_v47, %v3915_v7 }
 0xefd   : > { %5874 = vmatmul.mubr.bf16.vlgmr.msra.gmra.mxu1 %v3917_v19 }
 0xefe   : > { %5878 = vmatpush3.bf16.msra.mxu1 %v3837_v25  ;;  %5881 = vmatprep.mubr.msk.bf16.mxu1 %vm6949_vm0, %v6948_v2 }
 0xeff   : > { %5879 = vmatprep.subr.bf16.mxu1 %v6948_v2 }
 0xf02   : > { %5880 = vmatpush3.bf16.msra.mxu1 %v3836_v50 }
 0xf03   : > { %5885 = vmatprep.subr.bf16.mxu1 %v6948_v2 }
 0xf05   : > { %5882 = vmatmul.mubr.msk.bf16.vlgmr.msra.gmra.mxu1 %vm2521_vm4, %v3963_v49  ;;  %v3394_v49 = vld [vmem:[%s8257_s13 + $0x48] sm:$0xff] }
 0xf06   : > { %5889 = vmatprep.mubr.msk.bf16.mxu1 %vm6949_vm0, %v6948_v2 }
 0xf0b   : > { %v5851_v33 = vpop.f32.mrf.mxu0 }
 0xf0d   : > { %v3787_v21 = vpop.f32.mrf.mxu0 }
 0xf0f   : > { %v5852_v35 = vpop.f32.mrf.mxu0 }
 0xf11   : > { %v3790_v45 = vpop.f32.mrf.mxu0 }
 0xfbd   : > { %v3952_v54 = vpop.f32.mrf.mxu1 }
 0xfbe   : > { %3959 = vst.msk [vmem:[#allocation3] sm:$0xff] %vm2521_vm4, %v3952_v54  ;;  %v3393_v54 = vld [vmem:[%s8257_s13 + $0x40] sm:$0xff] }
 0xfbf   : > { %v5875_v56 = vpop.f32.mrf.mxu1 }
 0xfc0   : > { %v6296_v56 = vld [vmem:[%s8256_s1 + $0x60] sm:$0xff]  }
 0xfc1   : > { %v3955_v60 = vpop.f32.mrf.mxu1  ;;  %5853 = vmatprep.mubr.bf16.mxu0 %v6296_v56 }
 0xfc2   : > { %3960 = vst.msk [vmem:[#allocation3 + $0x8] sm:$0xf] %vm2654_vm8, %v3955_v60  ;;  %v6297_v60 = vld [vmem:[%s8256_s1 + $0x68] sm:$0xff]  }
 0xfc3   : > { %v5876_v55 = vpop.f32.mrf.mxu1  ;;  %5854 = vmatmul.mubr.bf16.gmra.mxu0 %v6297_v60 }
 0xfc5   : > { %v4001_v39 = vpop.f32.mrf.mxu1 }
 0xfc6   : > { %v4008_v40 = vmul.f32 0.17677669, %v4001_v39 }
 0xfc7   : > { %v5883_v6 = vpop.f32.mrf.mxu1 }
 0xfc8   : > { %4010 = vmax.xlane.f32.xlu0 %v4008_v40 }
 0xfc9   : > { %v4004_v9 = vpop.f32.mrf.mxu1 }
 0xfca   : > { %v4009_v62 = vmul.f32 0.17677669, %v4004_v9 }
 0xfcb   : > { %v5884_v52 = vpop.f32.mrf.mxu1 }
 0xfcc   : > { %v4012_v0 = vsel %vm3197_vm15, %v4009_v62, -inf }
 0xfcd   : > { %4013 = vmax.xlane.f32.xlu1 %v4012_v0 }
 0xfde   : > { %3529 = vperm.xlu0 %6213, %v3407_v22   ;;  %3534 = vperm.xlu1 %6215, %v3408_v14  }
 0xfe2   : > { %3524 = vperm.xlu0 %6213, %v3406_v29   ;;  %3519 = vperm.xlu1 %6215, %v3405_v30  }
 0xfe6   : > { %3474 = vperm.xlu0 %6213, %v3396_v16   ;;  %3469 = vperm.xlu1 %6215, %v3395_v32  }
0x1051   : > { %v4011_v46 = vpop.xlane.xlu0 %4010 }
0x1052   : > { %v4015_v53 = vsub.f32 %v4008_v40, %v4011_v46 }
0x1054   : > { %v4017_v57 = vmul.f32 1.442695, %v4015_v53 }
0x1056   : > { %6394 = vpow2.f32 %v4017_v57  ;;  %v4014_v4 = vpop.xlane.xlu1 %4013 }
0x1057   : > { %v4016_v34 = vsub.f32 %v4009_v62, %v4014_v4 }
0x1059   : > { %v4019_v36 = vmul.f32 1.442695, %v4016_v34  ;;  %v3530_v37 = vpop.permute.xlu0 %3529 }
0x105a   : > { %v3796_v38 = vadd.f32 %v5851_v33, %v3530_v37  ;;  %v3535_v43 = vpop.permute.xlu1 %3534 }
0x105b   : > { %6396 = vpow2.f32 %v4019_v36  ;;  %v3799_v44 = vadd.f32 %v5852_v35, %v3535_v43  ;;  %v3411_v43 = vld [vmem:[%s8257_s13 + $0xd0] sm:$0xff] }
0x105d   : > { %v3845_v5 = vpack.c.bf16 %v3799_v44, %v3796_v38  ;;  %v3525_v7 = vpop.permute.xlu0 %3524  ;;  %v3409_v44 = vld [vmem:[%s8257_s13 + $0xc0] sm:$0xff] }
0x105e   : > { %v3520_v47 = vpop.permute.xlu1 %3519  ;;  %v3791_v31 = vadd.f32 %v3790_v45, %v3525_v7  ;;  %v3412_v45 = vld [vmem:[%s8257_s13 + $0xd8] sm:$0xff] }
0x105f   : > { %5886 = vmatpush3.bf16.xpose.msra.mxu1 %v3845_v5  ;;  %v3788_v19 = vadd.f32 %v3787_v21, %v3520_v47  ;;  %v3410_v5 = vld [vmem:[%s8257_s13 + $0xc8] sm:$0xff]  ;;  %v3400_v7 = vld [vmem:[%s8257_s13 + $0x78] sm:$0xff]  ;;  %v3399_v47 = vld [vmem:[%s8257_s13 + $0x70] sm:$0xff] }
0x1060   : > { %5887 = vmatprep.subr.bf16.mxu1 %v6948_v2 }
0x1061   : > { %v3844_v42 = vpack.c.bf16 %v3791_v31, %v3788_v19  ;;  %v3475_v55 = vpop.permute.xlu0 %3474  ;;  %v3398_v31 = vld [vmem:[%s8257_s13 + $0x68] sm:$0xff] }
0x1062   : > { %v3470_v39 = vpop.permute.xlu1 %3469  ;;  %v3751_v52 = vadd.f32 %v7913_v17, %v3475_v55 }
0x1063   : > { %v6395_v25 = vpop.eup %6394  ;;  %v3748_v0 = vadd.f32 %v7909_v3, %v3470_v39 }
0x1064   : > { %4021 = vadd.xlane.f32.xlu0 %v6395_v25 }
0x1065   : > { %v3839_v32 = vpack.c.bf16 %v3751_v52, %v3748_v0 }
0x1067   : > { %5888 = vmatpush3.bf16.xpose.msra.mxu1 %v3844_v42 }
0x1068   : > { %v6397_v48 = vpop.eup %6396  ;;  %5893 = vmatprep.subr.bf16.mxu1 %v6948_v2 }
0x1069   : > { %v4023_v50 = vsel %vm3197_vm15, %v6397_v48, 0.0 }
0x106a   : > { %4024 = vadd.xlane.f32.xlu1 %v4023_v50 }
0x107a   : > { %3464 = vperm.xlu0 %6213, %v3394_v49  }
0x107b   : > { %3459 = vperm.xlu1 %6215, %v3393_v54  }
0x107f   : > { %4082 = vrot.lane.b32.xlu1 %v7891_v59, %s8258_s4 }
0x1083   : > { %v5855_v54 = vpop.f32.mrf.mxu0 }
0x1085   : > { %v3803_v60 = vpop.f32.mrf.mxu0 }
0x1087   : > { %v5856_v39 = vpop.f32.mrf.mxu0 }
0x1089   : > { %v3806_v52 = vpop.f32.mrf.mxu0 }
0x10ed   : > { %v4022_v40 = vpop.xlane.xlu0 %4021 }
0x10ee   : > { %6398 = vrcp.f32 %v4022_v40 }
0x10f3   : > { %v4025_v6 = vpop.xlane.xlu1 %4024 }
0x10f4   : > { %6400 = vrcp.f32 %v4025_v6 }
0x10f5   : > { %v3465_v30 = vpop.permute.xlu0 %3464 }
0x10f6   : > { %v3743_v46 = vadd.f32 %v7915_v18, %v3465_v30 }
0x10f7   : > { %v3460_v22 = vpop.permute.xlu1 %3459 }
0x10f8   : > { %v3740_v33 = vadd.f32 %v7911_v58, %v3460_v22 }
0x10fa   : > { %v3838_v17 = vpack.c.bf16 %v3743_v46, %v3740_v33  ;;  %v3397_v33 = vld [vmem:[%s8257_s13 + $0x60] sm:$0xff]  ;;  %v6298_v46 = vld [vmem:[%s8256_s1 + $0x70] sm:$0xff]  }
0x10fb   : > { %v6399_v9 = vpop.eup %6398  ;;  %v4083_v3 = vpop.permute.xlu1 %4082  ;;  %5857 = vmatprep.mubr.bf16.mxu0 %v6298_v46 }
0x10fc   : > { %v4028_v14 = vmul.f32 %v6399_v9, %v6395_v25 }
0x1101   : > { %v6401_v62 = vpop.eup %6400 }
0x1102   : > { %v4029_v29 = vmul.f32 %v6401_v62, %v6397_v48 }
0x1104   : > { %v4030_v16 = vpack.c.bf16 %v4029_v29, %v4028_v14 }
0x1106   : > { %5890 = vmatmul.mubr.bf16.vlgmr.msra.gmra.mxu1 %v4030_v16 }
0x1107   : > { %5894 = vmatpush3.bf16.msra.mxu1 %v3839_v32  ;;  %5897 = vmatprep.mubr.msk.bf16.mxu1 %vm6949_vm0, %v6948_v2 }
0x1108   : > { %5895 = vmatprep.subr.bf16.mxu1 %v6948_v2 }
0x110b   : > { %5896 = vmatpush3.bf16.msra.mxu1 %v3838_v17  ;;  %v6299_v17 = vld [vmem:[%s8256_s1 + $0x78] sm:$0xff]  }
0x110c   : > { %5901 = vmatprep.subr.bf16.mxu1 %v6948_v2  ;;  %5858 = vmatmul.mubr.bf16.gmra.mxu0 %v6299_v17 }
0x110d   : > { %5921 = vmatprep.mubr.msk.bf16.mxu0 %vm6949_vm0, %v6948_v2 }
0x110e   : > { %5898 = vmatmul.mubr.msk.bf16.vlgmr.msra.gmra.mxu1 %vm2521_vm4, %v4083_v3 }
0x110f   : > { %5905 = vmatprep.mubr.msk.bf16.mxu1 %vm6949_vm0, %v6948_v2 }
0x11c6   : > { %v7971_v58 = vpop.f32.mrf.mxu1 }
0x11c8   : > { %v5891_v18 = vpop.f32.mrf.mxu1 }
0x11ca   : > { %v7973_v53 = vpop.f32.mrf.mxu1 }
0x11cc   : > { %v5892_v57 = vpop.f32.mrf.mxu1 }
0x11ce   : > { %v4121_v21 = vpop.f32.mrf.mxu1 }
0x11cf   : > { %v4128_v4 = vmul.f32 0.17677669, %v4121_v21 }
0x11d0   : > { %v5899_v34 = vpop.f32.mrf.mxu1 }
0x11d1   : > { %4130 = vmax.xlane.f32.xlu1 %v4128_v4 }
0x11d2   : > { %v4124_v35 = vpop.f32.mrf.mxu1 }
0x11d3   : > { %v4129_v36 = vmul.f32 0.17677669, %v4124_v35 }
0x11d4   : > { %v5900_v37 = vpop.f32.mrf.mxu1 }
0x11d5   : > { %v4132_v38 = vsel %vm3197_vm15, %v4129_v36, -inf }
0x11d6   : > { %4133 = vmax.xlane.f32.xlu0 %v4132_v38 }
0x11e2   : > { %3549 = vperm.xlu1 %6215, %v3411_v43  }
0x11e6   : > { %3539 = vperm.xlu1 %6215, %v3409_v44  }
0x11ea   : > { %3544 = vperm.xlu1 %6215, %v3410_v5  }
0x11ec   : > { %3554 = vperm.xlu0 %6213, %v3412_v45  }
0x11ee   : > { %3494 = vperm.xlu1 %6215, %v3400_v7  }
0x11f0   : > { %3489 = vperm.xlu0 %6213, %v3399_v47  }
0x11f2   : > { %3484 = vperm.xlu1 %6215, %v3398_v31  }
0x125a   : > { %v4131_v19 = vpop.xlane.xlu1 %4130 }
0x125b   : > { %v4135_v25 = vsub.f32 %v4128_v4, %v4131_v19 }
0x125d   : > { %v4137_v42 = vmul.f32 1.442695, %v4135_v25 }
0x125e   : > { %v3550_v48 = vpop.permute.xlu1 %3549 }
0x125f   : > { %6402 = vpow2.f32 %v4137_v42  ;;  %v4134_v50 = vpop.xlane.xlu0 %4133  ;;  %v3812_v6 = vadd.f32 %v5855_v54, %v3550_v48 }
0x1260   : > { %v4136_v49 = vsub.f32 %v4129_v36, %v4134_v50 }
0x1262   : > { %v4139_v56 = vmul.f32 1.442695, %v4136_v49  ;;  %v3540_v55 = vpop.permute.xlu1 %3539 }
0x1263   : > { %v3804_v29 = vadd.f32 %v3803_v60, %v3540_v55  ;;  %v3416_v60 = vld [vmem:[%s8257_s13 + $0xf8] sm:$0xff]  ;;  %v5859_v55 = vpop.f32.mrf.mxu0 }
0x1264   : > { %6404 = vpow2.f32 %v4139_v56  ;;  %v3415_v56 = vld [vmem:[%s8257_s13 + $0xf0] sm:$0xff] }
0x1266   : > { %v3545_v0 = vpop.permute.xlu1 %3544 }
0x1267   : > { %v3555_v40 = vpop.permute.xlu0 %3554  ;;  %v3807_v14 = vadd.f32 %v3806_v52, %v3545_v0 }
0x1268   : > { %v3815_v9 = vadd.f32 %v5856_v39, %v3555_v40 }
0x1269   : > { %v3846_v16 = vpack.c.bf16 %v3807_v14, %v3804_v29 }
0x126a   : > { %v3847_v62 = vpack.c.bf16 %v3815_v9, %v3812_v6  ;;  %v3495_v21 = vpop.permute.xlu1 %3494  ;;  %v3819_v9 = vpop.f32.mrf.mxu0 }
0x126b   : > { %v3490_v3 = vpop.permute.xlu0 %3489  ;;  %v3767_v35 = vadd.f32 %v7921_v41, %v3495_v21 }
0x126c   : > { %v6403_v22 = vpop.eup %6402  ;;  %5902 = vmatpush3.bf16.xpose.msra.mxu1 %v3847_v62  ;;  %v3764_v36 = vadd.f32 %v7917_v1, %v3490_v3  ;;  %v5860_v0 = vpop.f32.mrf.mxu0  ;;  %v3414_v3 = vld [vmem:[%s8257_s13 + $0xe8] sm:$0xff] }
0x126d   : > { %4141 = vadd.xlane.f32.xlu0 %v6403_v22  ;;  %5903 = vmatprep.subr.bf16.mxu1 %v6948_v2 }
0x126e   : > { %v3485_v43 = vpop.permute.xlu1 %3484  ;;  %v3841_v5 = vpack.c.bf16 %v3767_v35, %v3764_v36 }
0x126f   : > { %v3759_v7 = vadd.f32 %v7923_v26, %v3485_v43 }
0x1271   : > { %v6405_v30 = vpop.eup %6404 }
0x1272   : > { %v4143_v32 = vsel %vm3197_vm15, %v6405_v30, 0.0 }
0x1273   : > { %4144 = vadd.xlane.f32.xlu0 %v4143_v32 }
0x1274   : > { %5904 = vmatpush3.bf16.xpose.msra.mxu1 %v3846_v16 }
0x1275   : > { %5909 = vmatprep.subr.bf16.mxu1 %v6948_v2 }
0x1289   : > { %3479 = vperm.xlu0 %6213, %v3397_v33  }
0x128d   : > { %4202 = vrot.lane.b32.xlu0 %v7891_v59, %s8255_s0 }
0x12f6   : > { %v4142_v18 = vpop.xlane.xlu0 %4141 }
0x12f7   : > { %6406 = vrcp.f32 %v4142_v18  ;;  %v3413_v18 = vld [vmem:[%s8257_s13 + $0xe0] sm:$0xff]  ;;  %s6809_s13 = scalar_lea.vmem %s6808_s9, 32 }
0x12fc   : > { %v4145_v57 = vpop.xlane.xlu0 %4144 }
0x12fd   : > { %6408 = vrcp.f32 %v4145_v57 }
0x1304   : > { %v6407_v4 = vpop.eup %6406  ;;  %v3480_v59 = vpop.permute.xlu0 %3479 }
0x1305   : > { %v4148_v37 = vmul.f32 %v6407_v4, %v6403_v22  ;;  %v3756_v45 = vadd.f32 %v7919_v15, %v3480_v59 }
0x1307   : > { %v3840_v41 = vpack.c.bf16 %v3759_v7, %v3756_v45 }
0x1308   : > { %v4203_v1 = vpop.permute.xlu0 %4202 }
0x130a   : > { %v6409_v34 = vpop.eup %6408 }
0x130b   : > { %v4149_v38 = vmul.f32 %v6409_v34, %v6405_v30  ;;  %v3822_v34 = vpop.f32.mrf.mxu0 }
0x130d   : > { %v4150_v44 = vpack.c.bf16 %v4149_v38, %v4148_v37 }
0x130f   : > { %5906 = vmatmul.mubr.bf16.vlgmr.msra.gmra.mxu1 %v4150_v44 }
0x1310   : > { %5910 = vmatpush3.bf16.msra.mxu1 %v3841_v5  ;;  %5913 = vmatprep.mubr.msk.bf16.mxu1 %vm6949_vm0, %v6948_v2 }
0x1311   : > { %5911 = vmatprep.subr.bf16.mxu1 %v6948_v2 }
0x1314   : > { %5912 = vmatpush3.bf16.msra.mxu1 %v3840_v41 }
0x1315   : > { %5925 = vmatprep.subr.bf16.mxu1 %v6948_v2 }
0x1317   : > { %5914 = vmatmul.mubr.msk.bf16.vlgmr.msra.gmra.mxu1 %vm2521_vm4, %v4203_v1  ;;  %v6300_v1 = vld [vmem:[#allocation18 + $0x38] sm:$0xff]  }
0x1318   : > { %5941 = vmatprep.mubr.msk.bf16.mxu1 %vm6949_vm0, %v6948_v2  ;;  %5926 = vmatpush3.bf16.msra.mxu1 %v6300_v1 }
0x1319   : > { %5927 = vmatprep.subr.bf16.mxu1 %v6948_v2 }
0x13cf   : > { %v4185_v15 = vpop.f32.mrf.mxu1 }
0x13d1   : > { %v5907_v26 = vpop.f32.mrf.mxu1 }
0x13d2   : > { %v6302_v26 = vld [vmem:[#allocation18 + $0x28] sm:$0xff]  }
0x13d3   : > { %v4188_v47 = vpop.f32.mrf.mxu1 }
0x13d5   : > { %v5908_v31 = vpop.f32.mrf.mxu1 }
0x13d6   : > { %v6304_v31 = vld [vmem:[#allocation18 + $0x18] sm:$0xff]  }
0x13d7   : > { %v4241_v19 = vpop.f32.mrf.mxu1 }
0x13d8   : > { %v4248_v25 = vmul.f32 0.17677669, %v4241_v19  ;;  %v6306_v19 = vld [vmem:[#allocation18 + $0x8] sm:$0xff]  }
0x13d9   : > { %v5915_v42 = vpop.f32.mrf.mxu1 }
0x13da   : > { %4250 = vmax.xlane.f32.xlu0 %v4248_v25 }
0x13db   : > { %v4244_v48 = vpop.f32.mrf.mxu1 }
0x13dc   : > { %v4249_v50 = vmul.f32 0.17677669, %v4244_v48 }
0x13dd   : > { %v5916_v49 = vpop.f32.mrf.mxu1 }
0x13de   : > { %v4252_v54 = vsel %vm3197_vm15, %v4249_v50, -inf }
0x13df   : > { %4253 = vmax.xlane.f32.xlu1 %v4252_v54 }
0x13f0   : > { %3569 = vperm.xlu0 %6213, %v3415_v56   ;;  %3574 = vperm.xlu1 %6215, %v3416_v60  }
0x1463   : > { %v4251_v39 = vpop.xlane.xlu0 %4250 }
0x1464   : > { %v4255_v40 = vsub.f32 %v4248_v25, %v4251_v39  ;;  %v6307_v25 = vld [vmem:[#allocation18] sm:$0xff]  }
0x1466   : > { %v4257_v6 = vmul.f32 1.442695, %v4255_v40  ;;  %v5398_v40 = vld [vmem:[#allocation19] ss:$0 sm:$0xff] }
0x1468   : > { %6410 = vpow2.f32 %v4257_v6  ;;  %v4254_v62 = vpop.xlane.xlu1 %4253 }
0x1469   : > { %v4256_v52 = vsub.f32 %v4249_v50, %v4254_v62 }
0x146b   : > { %v4259_v22 = vmul.f32 1.442695, %v4256_v52  ;;  %v3570_v14 = vpop.permute.xlu0 %3569 }
0x146c   : > { %v3828_v29 = vadd.f32 %v5859_v55, %v3570_v14  ;;  %v3575_v30 = vpop.permute.xlu1 %3574 }
0x146d   : > { %6412 = vpow2.f32 %v4259_v22  ;;  %v3831_v16 = vadd.f32 %v5860_v0, %v3575_v30 }
0x146f   : > { %v3849_v32 = vpack.c.bf16 %v3831_v16, %v3828_v29 }
0x1471   : > { %5918 = vmatpush3.bf16.xpose.msra.mxu0 %v3849_v32 }
0x1472   : > { %5919 = vmatprep.subr.bf16.mxu0 %v6948_v2 }
0x1475   : > { %v6411_v33 = vpop.eup %6410 }
0x1476   : > { %4261 = vadd.xlane.f32.xlu0 %v6411_v33 }
0x147a   : > { %v6413_v46 = vpop.eup %6412 }
0x147b   : > { %v4263_v17 = vsel %vm3197_vm15, %v6413_v46, 0.0 }
0x147c   : > { %4264 = vadd.xlane.f32.xlu1 %v4263_v17 }
0x148c   : > { %3564 = vperm.xlu0 %6213, %v3414_v3  }
0x148d   : > { %3559 = vperm.xlu1 %6215, %v3413_v18  }
0x1490   : > { %4076 = vrot.lane.b32.xlu0 %v7973_v53, %s8255_s0 }
0x1491   : > { %4074 = vrot.lane.b32.xlu1 %v7971_v58, %s8255_s0  ;;  %s8259_s0 = sld [smem:[#allocation57_spill]] }
0x1494   : > { %4196 = vrot.lane.b32.xlu0 %v4188_v47, %s8258_s4  ;;  %v6303_v47 = vld [vmem:[#allocation18 + $0x20] sm:$0xff]  }
0x1495   : > { %4194 = vrot.lane.b32.xlu1 %v4185_v15, %s8258_s4  ;;  %v6301_v15 = vld [vmem:[#allocation18 + $0x30] sm:$0xff]   ;;  %s8260_s4 = sld [smem:[#allocation58_spill]] }
0x1496   : > { %5928 = vmatpush3.bf16.msra.mxu1 %v6301_v15 }
0x1497   : > { %5929 = vmatprep.subr.bf16.mxu1 %v6948_v2  ;;  %v6311_v17 = vld [vmem:[%s8259_s0 + $0x60] ss:$8 sps:$4 sm:$0xff]   ;;  %v6316_v3 = vld [vmem:[%s8259_s0 + $0x54] ss:$8 sps:$4 sm:$0xff]   ;;  %v6314_v18 = vld [vmem:[%s8259_s0 + $0x50] ss:$8 sps:$4 sm:$0xff]  }
0x149a   : > { %5930 = vmatpush3.bf16.msra.mxu1 %v6302_v26 }
0x149b   : > { %5931 = vmatprep.subr.bf16.mxu1 %v6948_v2  ;;  %v6339_v1 = vld [vmem:[%s8260_s4 + $0x20] sm:$0xff]   ;;  %v6340_v15 = vld [vmem:[%s8260_s4 + $0x58] sm:$0xff]  }
0x149c   : > { %v6341_v26 = vld [vmem:[%s8260_s4 + $0x18] sm:$0xff]  }
0x149e   : > { %5932 = vmatpush3.bf16.msra.mxu1 %v6303_v47 }
0x149f   : > { %5933 = vmatprep.subr.bf16.mxu1 %v6948_v2 }
0x14a2   : > { %5934 = vmatpush3.bf16.msra.mxu1 %v6304_v31 }
0x14a3   : > { %5935 = vmatprep.subr.bf16.mxu1 %v6948_v2 }
0x14ff   : > { %v4262_v57 = vpop.xlane.xlu0 %4261 }
0x1500   : > { %6414 = vrcp.f32 %v4262_v57  ;;  %v6317_v57 = vld [vmem:[%s8259_s0 + $0x40] ss:$8 sps:$4 sm:$0xff]  }
0x1505   : > { %v4265_v21 = vpop.xlane.xlu1 %4264 }
0x1506   : > { %6416 = vrcp.f32 %v4265_v21  ;;  %v6319_v21 = vld [vmem:[%s8259_s0 + $0x44] ss:$8 sps:$4 sm:$0xff]  }
0x1507   : > { %v3565_v4 = vpop.permute.xlu0 %3564 }
0x1508   : > { %v3823_v36 = vadd.f32 %v3822_v34, %v3565_v4  ;;  %v6322_v4 = vld [vmem:[%s8259_s0 + $0x34] ss:$8 sps:$4 sm:$0xff]   ;;  %v6320_v34 = vld [vmem:[%s8259_s0 + $0x30] ss:$8 sps:$4 sm:$0xff]  }
0x1509   : > { %v3560_v35 = vpop.permute.xlu1 %3559 }
0x150a   : > { %v3820_v59 = vadd.f32 %v3819_v9, %v3560_v35  ;;  %v6325_v35 = vld [vmem:[%s8259_s0 + $0x24] ss:$8 sps:$4 sm:$0xff]  }
0x150b   : > { %v4077_v37 = vpop.permute.xlu0 %4076 }
0x150c   : > { %v3848_v38 = vpack.c.bf16 %v3823_v36, %v3820_v59  ;;  %4081 = vst.msk [vmem:[#allocation3 + $0x8] sm:$0xf] %vm2796_vm10, %v4077_v37  ;;  %v6323_v36 = vld [vmem:[%s8259_s0 + $0x20] ss:$8 sps:$4 sm:$0xff]   ;;  %v6328_v59 = vld [vmem:[%s8259_s0 + $0x14] ss:$8 sps:$4 sm:$0xff]  }
0x150d   : > { %v4075_v53 = vpop.permute.xlu1 %4074  ;;  %v6415_v43 = vpop.eup %6414  ;;  %v6326_v37 = vld [vmem:[%s8259_s0 + $0x10] ss:$8 sps:$4 sm:$0xff]  }
0x150e   : > { %4080 = vst.msk [vmem:[#allocation3] sm:$0xff] %vm2794_vm9, %v4075_v53  ;;  %5920 = vmatpush3.bf16.xpose.msra.mxu0 %v3848_v38  ;;  %v4268_v45 = vmul.f32 %v6415_v43, %v6411_v33  ;;  %v6308_v33 = vld [vmem:[%s8259_s0 + $0x70] ss:$8 sps:$4 sm:$0xff]   ;;  %v6331_v38 = vld [vmem:[%s8259_s0 + $0x4] ss:$8 sps:$4 sm:$0xff]  }
0x150f   : > { %v4197_v58 = vpop.permute.xlu0 %4196  ;;  %v6329_v53 = vld [vmem:[%s8259_s0] ss:$8 sps:$4 sm:$0xff]   ;;  %v6333_v43 = vld [vmem:[%s8260_s4 + $0x38] sm:$0xff]  }
0x1510   : > { %4201 = vst.msk [vmem:[#allocation3 + $0x8] sm:$0xf] %vm2935_vm12, %v4197_v58  ;;  %v6332_v58 = vld [vmem:[%s8260_s4 + $0x78] sm:$0xff]  }
0x1511   : > { %v4195_v44 = vpop.permute.xlu1 %4194 }
0x1512   : > { %4200 = vst.msk [vmem:[#allocation3] sm:$0xff] %vm2933_vm11, %v4195_v44  ;;  %v6334_v44 = vld [vmem:[%s8260_s4 + $0x70] sm:$0xff]  }
0x1513   : > { %v6417_v5 = vpop.eup %6416 }
0x1514   : > { %v4269_v7 = vmul.f32 %v6417_v5, %v6413_v46  ;;  %v6313_v46 = vld [vmem:[%s8259_s0 + $0x64] ss:$8 sps:$4 sm:$0xff]   ;;  %v6335_v5 = vld [vmem:[%s8260_s4 + $0x30] sm:$0xff]  }
0x1516   : > { %v4270_v41 = vpack.c.bf16 %v4269_v7, %v4268_v45  ;;  %v6336_v45 = vld [vmem:[%s8260_s4 + $0x68] sm:$0xff]  }
0x1517   : > { %v6337_v7 = vld [vmem:[%s8260_s4 + $0x28] sm:$0xff]  }
0x1518   : > { %5922 = vmatmul.mubr.bf16.vlgmr.msra.gmra.mxu0 %v4270_v41  ;;  %v6338_v41 = vld [vmem:[%s8260_s4 + $0x60] sm:$0xff]  }
0x1519   : > { %4624 = vmatprep.mubr.bf16.mxu0 %v6950_v13  ;;  %v6305_v13 = vld [vmem:[#allocation18 + $0x10] sm:$0xff]  }
0x151a   : > { %5936 = vmatpush3.bf16.msra.mxu1 %v6305_v13 }
0x151b   : > { %5937 = vmatprep.subr.bf16.mxu1 %v6948_v2 }
0x151e   : > { %5938 = vmatpush3.bf16.msra.mxu1 %v6306_v19 }
0x151f   : > { %5939 = vmatprep.subr.bf16.mxu1 %v6948_v2 }
0x1522   : > { %5940 = vmatpush3.bf16.msra.mxu1 %v6307_v25 }
0x1523   : > { %5590 = vmatprep.subr.bf16.mxu1 %v6332_v58 }
0x15d8   : > { %v4305_v42 = vpop.f32.mrf.mxu0 }
0x15d9   : > { %4314 = vrot.lane.b32.xlu1 %v4305_v42, %s8254_s28 }
0x15da   : > { %v5923_v48 = vpop.f32.mrf.mxu0 }
0x15dc   : > { %v4308_v50 = vpop.f32.mrf.mxu0 }
0x15dd   : > { %4316 = vrot.lane.b32.xlu0 %v4308_v50, %s8254_s28  ;;  %s5450_s28 = sshll.u32 %s7445_s22, 4 }
0x15de   : > { %v5924_v49 = vpop.f32.mrf.mxu0 }
0x164b   : > { %v4315_v54 = vpop.permute.xlu1 %4314 }
0x164c   : > { %4320 = vst.msk [vmem:[#allocation3] sm:$0xff] %vm3072_vm13, %v4315_v54 }
0x164f   : > { %v4317_v56 = vpop.permute.xlu0 %4316 }
0x1650   : > { %4321 = vst.msk [vmem:[#allocation3 + $0x8] sm:$0xf] %vm3074_vm14, %v4317_v56 }
0x1653   : > { %v4322_v60 = vld [vmem:[#allocation3] sm:$0xff] }
0x1657   : > { %v4323_v55 = vld [vmem:[#allocation3 + $0x8] sm:$0xf] }
0x1658   : > { %v4324_v39 = vpack.c.bf16 %v4323_v55, %v4322_v60 }
0x165a   : > { %5942 = vmatmul.mubr.bf16.vlgmr.msra.gmra.mxu1 %v4324_v39 }
0x165b   : > { %5591 = vmatpush3.bf16.msra.mxu1 %v6333_v43  ;;  %v5425_v43 = vld [vmem:[#allocation22] ss:$0 sm:$0xff] }
0x165c   : > { %5592 = vmatprep.subr.bf16.mxu1 %v6334_v44 }
0x165f   : > { %5593 = vmatpush3.bf16.msra.mxu1 %v6335_v5 }
0x1660   : > { %5594 = vmatprep.subr.bf16.mxu1 %v6336_v45 }
0x1663   : > { %5595 = vmatpush3.bf16.msra.mxu1 %v6337_v7 }
0x1664   : > { %5596 = vmatprep.subr.bf16.mxu1 %v6338_v41 }
0x1667   : > { %5597 = vmatpush3.bf16.msra.mxu1 %v6339_v1 }
0x1668   : > { %5598 = vmatprep.subr.bf16.mxu1 %v6340_v15 }
0x166b   : > { %5599 = vmatpush3.bf16.msra.mxu1 %v6341_v26 }
0x171a   : > { %v4430_v6 = vpop.f32.mrf.mxu1 }
0x171b   : > { %v4431_v9 = vadd.f32 %v5398_v40, %v4430_v6 }
0x171c   : > { %v5943_v62 = vpop.f32.mrf.mxu1 }
0x171d   : > { %v8034_v52 = vadd.f32 %v4431_v9, %v7871_v20 }
0x171e   : > { %v4433_v0 = vpop.f32.mrf.mxu1 }
0x171f   : > { %v4434_v22 = vadd.f32 %v5398_v40, %v4433_v0  ;;  %4441 = vadd.xlane.f32.xlu1 %v8034_v52  ;;  %v4448_v32 = vmul.f32 %v8034_v52, %v8034_v52  ;;  %v5407_v0 = vld [vmem:[#allocation24 + $0x1] ss:$0 sm:$0xff] }
0x1720   : > { %v5944_v14 = vpop.f32.mrf.mxu1 }
0x1721   : > { %v8038_v29 = vadd.f32 %v4434_v22, %v7873_v23  ;;  %v6310_v23 = vld [vmem:[%s8259_s0 + $0x74] ss:$8 sps:$4 sm:$0xff]  }
0x1722   : > { %4592 = vmatprep.subr.bf16.mxu0 %v6310_v23 }
0x1723   : > { %v4443_v30 = vsel %vm3197_vm15, %v8038_v29, 0.0  ;;  %v4449_v16 = vmul.f32 %v8038_v29, %v8038_v29  ;;  %4593 = vmatpush1.bf16.msra.mxu0 %v6308_v33 }
0x1724   : > { %4444 = vadd.xlane.f32.xlu0 %v4443_v30  ;;  %4594 = vmatprep.subr.bf16.mxu0 %v6313_v46 }
0x1725   : > { %v4452_v20 = vsel %vm3197_vm15, %v4449_v16, 0.0 }
0x1726   : > { %4453 = vadd.xlane.f32.xlu1 %v4452_v20 }
0x1727   : > { %4595 = vmatpush1.bf16.msra.mxu0 %v6311_v17 }
0x1728   : > { %4450 = vadd.xlane.f32.xlu0 %v4448_v32  ;;  %4596 = vmatprep.subr.bf16.mxu0 %v6316_v3  ;;  %v5408_v32 = vld [vmem:[#allocation25 + $0x1] ss:$0 sm:$0xff] }
0x172b   : > { %4597 = vmatpush1.bf16.msra.mxu0 %v6314_v18 }
0x172c   : > { %4598 = vmatprep.subr.bf16.mxu0 %v6319_v21 }
0x172f   : > { %4599 = vmatpush1.bf16.msra.mxu0 %v6317_v57 }
0x1730   : > { %4600 = vmatprep.subr.bf16.mxu0 %v6322_v4 }
0x1733   : > { %4601 = vmatpush1.bf16.msra.mxu0 %v6320_v34 }
0x1734   : > { %4602 = vmatprep.subr.bf16.mxu0 %v6325_v35 }
0x1737   : > { %4603 = vmatpush1.bf16.msra.mxu0 %v6323_v36 }
0x1738   : > { %4604 = vmatprep.subr.bf16.mxu0 %v6328_v59 }
0x173b   : > { %4605 = vmatpush1.bf16.msra.mxu0 %v6326_v37 }
0x173c   : > { %4606 = vmatprep.subr.bf16.mxu0 %v6331_v38 }
0x173f   : > { %4607 = vmatpush1.bf16.msra.mxu0 %v6329_v53 }
0x1740   : > { %5945 = vmatprep.subr.bf16.mxu0 %v6948_v2 }
0x17a8   : > { %v4442_v47 = vpop.xlane.xlu1 %4441 }
0x17a9   : > { %v4446_v13 = vmul.f32 0.0078125, %v4442_v47 }
0x17ab   : > { %v4457_v49 = vmul.f32 %v4446_v13, %v4446_v13  ;;  %v4463_v22 = vsub.f32 %v8034_v52, %v4446_v13  ;;  %v6347_v52 = vld [vmem:[%s8260_s4] sm:$0xff]  }
0x17ad   : > { %v4445_v31 = vpop.xlane.xlu0 %4444 }
0x17ae   : > { %v4447_v19 = vmul.f32 0.0078125, %v4445_v31 }
0x17af   : > { %v4454_v25 = vpop.xlane.xlu1 %4453 }
0x17b0   : > { %v4458_v42 = vmul.f32 %v4447_v19, %v4447_v19  ;;  %v4456_v48 = vmul.f32 0.0078125, %v4454_v25  ;;  %v4464_v9 = vsub.f32 %v8038_v29, %v4447_v19  ;;  %v6436_v19 = vld [vmem:[%s7720_s23] sm:$0x1]  ;;  %s8261_s23 = sld [smem:[#allocation40_spill]] }
0x17b1   : > { %v4451_v50 = vpop.xlane.xlu0 %4450 }
0x17b2   : > { %v4460_v54 = vsub.f32 %v4456_v48, %v4458_v42  ;;  %v4455_v56 = vmul.f32 0.0078125, %v4451_v50 }
0x17b4   : > { %v4462_v60 = vmax.f32 %v4460_v54, 0.0  ;;  %v4459_v55 = vsub.f32 %v4455_v56, %v4457_v49 }
0x17b6   : > { %v4466_v39 = vadd.f32 1e-05, %v4462_v60  ;;  %v4461_v40 = vmax.f32 %v4459_v55, 0.0  ;;  %s1248_s0 = scalar_lea.vmem %s8261_s23, %s5450_s28  ;;  %s8262_s28 = sld [smem:[#allocation61_spill]] }
0x17b8   : > { %6418 = vrsqrt.f32 %v4466_v39  ;;  %v4465_v6 = vadd.f32 1e-05, %v4461_v40 }
0x17ba   : > { %6420 = vrsqrt.f32 %v4465_v6 }
0x17c5   : > { %v6419_v62 = vpop.eup %6418 }
0x17c6   : > { %v4470_v14 = vmul.f32 %v6419_v62, %v4464_v9 }
0x17c7   : > { %v6421_v30 = vpop.eup %6420 }
0x17c8   : > { %v4469_v16 = vmul.f32 %v6421_v30, %v4463_v22  ;;  %v4476_v20 = vmul.f32 %v5407_v0, %v4470_v14 }
0x17ca   : > { %v4475_v23 = vmul.f32 %v5407_v0, %v4469_v16  ;;  %v4482_v46 = vadd.f32 %v5408_v32, %v4476_v20 }
0x17cc   : > { %v4481_v33 = vadd.f32 %v5408_v32, %v4475_v23 }
0x17ce   : > { %v4483_v17 = vpack.c.bf16 %v4482_v46, %v4481_v33 }
0x17d0   : > { %4625 = vmatmul.mubr.bf16.vlgmr.msra.gmra.mxu0 %v4483_v17 }
0x17d1   : > { %5946 = vmatpush3.bf16.msra.mxu0 %v7624_v24  ;;  %5961 = vmatprep.mubr.msk.bf16.mxu0 %vm6949_vm0, %v6948_v2  ;;  %v6342_v24 = vld [vmem:[%s8260_s4 + $0x50] sm:$0xff]   ;;  %vm4929_vm0 = vcmask 90112  }
0x17d2   : > { %5947 = vmatprep.subr.bf16.mxu0 %v6948_v2  ;;  %5600 = vmatprep.subr.bf16.mxu1 %v6342_v24  ;;  %v4930_v25 = vsel %vm4929_vm0, %v6436_v19, 0.0 }
0x17d5   : > { %5948 = vmatpush3.bf16.msra.mxu0 %v7630_v27  ;;  %v6343_v27 = vld [vmem:[%s8260_s4 + $0x10] sm:$0xff]  }
0x17d6   : > { %5949 = vmatprep.subr.bf16.mxu0 %v6948_v2  ;;  %5601 = vmatpush3.bf16.msra.mxu1 %v6343_v27  ;;  %v5442_v27 = vld [vmem:[#allocation24 + $0x2] ss:$0 sm:$0xff] }
0x17d9   : > { %5950 = vmatpush3.bf16.msra.mxu0 %v7636_v28  ;;  %v6344_v28 = vld [vmem:[%s8260_s4 + $0x48] sm:$0xff]  }
0x17da   : > { %5951 = vmatprep.subr.bf16.mxu0 %v6948_v2  ;;  %5602 = vmatprep.subr.bf16.mxu1 %v6344_v28 }
0x17dd   : > { %5952 = vmatpush3.bf16.msra.mxu0 %v7642_v8  ;;  %v6345_v8 = vld [vmem:[%s8260_s4 + $0x8] sm:$0xff]  }
0x17de   : > { %5953 = vmatprep.subr.bf16.mxu0 %v6948_v2  ;;  %5603 = vmatpush3.bf16.msra.mxu1 %v6345_v8  ;;  %v5443_v8 = vld [vmem:[#allocation25 + $0x2] ss:$0 sm:$0xff] }
0x17e1   : > { %5954 = vmatpush3.bf16.msra.mxu0 %v7646_v10  ;;  %v6346_v10 = vld [vmem:[%s8260_s4 + $0x40] sm:$0xff]   ;;  %s4993_s4 = scalar_lea.sflag [#allocation6], %s7312_s12 }
0x17e2   : > { %5955 = vmatprep.subr.bf16.mxu0 %v6948_v2  ;;  %5604 = vmatprep.subr.bf16.mxu1 %v6346_v10 }
0x17e3   : > { %5605 = vmatpush3.bf16.msra.mxu1 %v6347_v52 }
0x17e5   : > { %5956 = vmatpush3.bf16.msra.mxu0 %v7650_v12  ;;  %v4500_v12 = vld [vmem:[#allocation21] sm:$0x3] }
0x17e6   : > { %5957 = vmatprep.subr.bf16.mxu0 %v6948_v2 }
0x17e9   : > { %5958 = vmatpush3.bf16.msra.mxu0 %v7618_v11  ;;  %v4509_v11 = vrot.slane %v4500_v12, %v7461_v61 }
0x17ea   : > { %5959 = vmatprep.subr.bf16.mxu0 %v6948_v2  ;;  %v4505_v2 = vrot.slane %v4500_v12, %v7464_v63 }
0x17ed   : > { %5960 = vmatpush3.bf16.msra.mxu0 %v7620_v51 }
0x1890   : > { %v4626_v29 = vpop.f32.mrf.mxu0 }
0x1891   : > { %v4627_v21 = vadd.f32 %v4626_v29, %v4505_v2 }
0x1892   : > { %v4628_v3 = vpop.f32.mrf.mxu0 }
0x1893   : > { %v4629_v18 = vadd.f32 %v4628_v3, %v4509_v11  ;;  %v4635_v37 = vmax.f32 %v4627_v21, 0.0 }
0x1894   : > { %v4630_v51 = vpop.f32.mrf.mxu0 }
0x1895   : > { %v4631_v57 = vadd.f32 %v4630_v51, %v4505_v2  ;;  %v4636_v36 = vmax.f32 %v4629_v18, 0.0 }
0x1896   : > { %v4632_v4 = vpop.f32.mrf.mxu0 }
0x1897   : > { %v4633_v34 = vadd.f32 %v4632_v4, %v4509_v11  ;;  %v4637_v35 = vmax.f32 %v4631_v57, 0.0  ;;  %v4907_v4 = vld [vmem:[%s1248_s0] sm:$0xff] }
0x1899   : > { %v4638_v59 = vmax.f32 %v4633_v34, 0.0  ;;  %v4639_v53 = vpack.c.bf16 %v4637_v35, %v4635_v37  ;;  %v4908_v34 = vld [vmem:[%s1248_s0 + $0x8] sm:$0xf]  ;;  %s6955_s0 = smov 1.0  }
0x189b   : > { %v4640_v38 = vpack.c.bf16 %v4638_v59, %v4636_v36 }
0x189d   : > { %4808 = vmatprep.mubr.bf16.mxu1 %v4640_v38 }
0x189e   : > { %4809 = vmatmul.mubr.bf16.vlgmr.msra.gmra.mxu1 %v4639_v53 }
0x195e   : > { %v5606_v58 = vpop.f32.mrf.mxu1 }
0x1960   : > { %v5607_v61 = vpop.f32.mrf.mxu1 }
0x1961   : > { %v5608_v44 = vadd.f32 %v5607_v61, %v5606_v58 }
0x1962   : > { %v5609_v63 = vpop.f32.mrf.mxu1 }
0x1963   : > { %v4811_v5 = vadd.f32 %v5608_v44, %v5425_v43 }
0x1964   : > { %v5610_v45 = vpop.f32.mrf.mxu1 }
0x1965   : > { %v5611_v7 = vadd.f32 %v5610_v45, %v5609_v63  ;;  %v4817_v41 = vadd.f32 %v4811_v5, %v4481_v33 }
0x1967   : > { %v4814_v1 = vadd.f32 %v5611_v7, %v5425_v43  ;;  %4821 = vadd.xlane.f32.xlu1 %v4817_v41  ;;  %v4828_v26 = vmul.f32 %v4817_v41, %v4817_v41 }
0x1969   : > { %v4818_v15 = vadd.f32 %v4814_v1, %v4482_v46 }
0x196b   : > { %4830 = vadd.xlane.f32.xlu1 %v4828_v26  ;;  %v4823_v47 = vsel %vm3197_vm15, %v4818_v15, 0.0  ;;  %v4829_v31 = vmul.f32 %v4818_v15, %v4818_v15 }
0x196c   : > { %4824 = vadd.xlane.f32.xlu0 %v4823_v47 }
0x196d   : > { %v4832_v13 = vsel %vm3197_vm15, %v4829_v31, 0.0  ;;  %v5444_v31 = vld [vmem:[#allocation24 + $0x3] ss:$0 sm:$0xff] }
0x1970   : > { %4833 = vadd.xlane.f32.xlu0 %v4832_v13 }
0x1974   : > { %4931 = vadd.xlane.f32.xlu0 %v4930_v25 }
0x19f0   : > { %v4822_v42 = vpop.xlane.xlu1 %4821 }
0x19f1   : > { %v4826_v48 = vmul.f32 0.0078125, %v4822_v42  ;;  %v5445_v42 = vld [vmem:[#allocation25 + $0x3] ss:$0 sm:$0xff] }
0x19f3   : > { %v4837_v49 = vmul.f32 %v4826_v48, %v4826_v48  ;;  %v4843_v46 = vsub.f32 %v4817_v41, %v4826_v48 }
0x19f4   : > { %v4831_v50 = vpop.xlane.xlu1 %4830 }
0x19f5   : > { %v4835_v54 = vmul.f32 0.0078125, %v4831_v50  ;;  %v4825_v56 = vpop.xlane.xlu0 %4824 }
0x19f6   : > { %v4827_v60 = vmul.f32 0.0078125, %v4825_v56 }
0x19f7   : > { %v4839_v55 = vsub.f32 %v4835_v54, %v4837_v49 }
0x19f8   : > { %v4838_v6 = vmul.f32 %v4827_v60, %v4827_v60  ;;  %v4844_v52 = vsub.f32 %v4818_v15, %v4827_v60 }
0x19f9   : > { %v4841_v39 = vmax.f32 %v4839_v55, 0.0  ;;  %v4834_v40 = vpop.xlane.xlu0 %4833 }
0x19fa   : > { %v4836_v9 = vmul.f32 0.0078125, %v4834_v40 }
0x19fb   : > { %v4845_v62 = vadd.f32 1e-05, %v4841_v39 }
0x19fc   : > { %v4840_v0 = vsub.f32 %v4836_v9, %v4838_v6 }
0x19fd   : > { %6422 = vrsqrt.f32 %v4845_v62  ;;  %v4932_v14 = vpop.xlane.xlu0 %4931 }
0x19fe   : > { %v4842_v22 = vmax.f32 %v4840_v0, 0.0  ;;  %v4933_v30 = vrot.slane %v4932_v14, 4 }
0x1a00   : > { %v4846_v16 = vadd.f32 1e-05, %v4842_v22  ;;  %v4934_v20 = vadd.f32 %v4933_v30, %v4932_v14 }
0x1a02   : > { %6424 = vrsqrt.f32 %v4846_v16  ;;  %v4935_v32 = vrot.slane %v4934_v20, 2 }
0x1a04   : > { %v4936_v23 = vadd.f32 %v4935_v32, %v4934_v20 }
0x1a06   : > { %v4937_v33 = vrot.slane %v4936_v23, 1 }
0x1a08   : > { %v4938_v17 = vadd.f32 %v4937_v33, %v4936_v23 }
0x1a0a   : > { %v6423_v24 = vpop.eup %6422  ;;  %5965 = vpush %v4938_v17 }
0x1a0b   : > { %v4849_v28 = vmul.f32 %v6423_v24, %v4843_v46 }
0x1a0d   : > { %v4855_v10 = vmul.f32 %v5442_v27, %v4849_v28 }
0x1a0f   : > { %v6425_v12 = vpop.eup %6424  ;;  %v4861_v29 = vadd.f32 %v5443_v8, %v4855_v10 }
0x1a10   : > { %v4850_v11 = vmul.f32 %v6425_v12, %v4844_v52 }
0x1a11   : > { %4865 = vadd.xlane.f32.xlu0 %v4861_v29  ;;  %v4872_v3 = vmul.f32 %v4861_v29, %v4861_v29 }
0x1a12   : > { %v4856_v2 = vmul.f32 %v5442_v27, %v4850_v11 }
0x1a14   : > { %v4862_v51 = vadd.f32 %v5443_v8, %v4856_v2 }
0x1a15   : > { %4874 = vadd.xlane.f32.xlu0 %v4872_v3 }
0x1a16   : > { %v4867_v18 = vsel %vm3197_vm15, %v4862_v51, 0.0  ;;  %v4873_v57 = vmul.f32 %v4862_v51, %v4862_v51 }
0x1a17   : > { %4868 = vadd.xlane.f32.xlu1 %v4867_v18 }
0x1a18   : > { %v4876_v21 = vsel %vm3197_vm15, %v4873_v57, 0.0 }
0x1a1b   : > { %4877 = vadd.xlane.f32.xlu1 %v4876_v21 }
0x1a2b   : > { %4911 = vperm.xlu0 %6213, %v4907_v4  }
0x1a2c   : > { %4916 = vperm.xlu1 %6215, %v4908_v34  }
0x1a3b   : > { %s5966_s22 = spop %5965 }
0x1a3c   : > { %s4940_s23 = smax.f32 %s6955_s0, %s5966_s22  ;;  %s5447_s22 = sshll.u32 %s7153_s18, 4 }
0x1a3d   : > { %v4941_v39 = vstv %s4940_s23  ;;  %s1236_s0 = scalar_lea.vmem [#allocation27], %s7312_s12  ;;  %s8112_s1 = scalar_lea.hbm %s8262_s28, %s5447_s22 }
0x1a3e   : > { %s5005_s23 = sshll.u32 %s1236_s0, 4  ;;  %s5006_s23 = int_to_ptr.vmem [resolvable:$true] %s5005_s23 }
0x1a3f   : > { %s6803_s5 = scalar_lea.vmem %s5006_s23, 16  ;;  %p6810_p11 = scmp.lt.s32.totalorder %s5006_s23, %s6808_s9 }
0x1a40   : > { %p6804_p1 = scmp.ne.s32.totalorder %s5006_s23, %s6803_s5  ;;  %p6811_p12 = scmp.lt.s32.totalorder %s6809_s13, %s6803_s5 }
0x1a42   : > { %p6805_p7 = pnand %p6804_p1, %p8263_p3  ;;  %p6812_p0 = por %p6811_p12, %p6810_p11 }
0x1a44   : > { %p6806_p9 = pneg %p6805_p7 }
0x1a46   : > { %p6813_p10 = pnand %p6812_p0, %p6806_p9 }
0x1a9a   : > { %v4866_v35 = vpop.xlane.xlu0 %4865 }
0x1a9b   : > { %v4870_v36 = vmul.f32 0.0078125, %v4866_v35 }
0x1a9d   : > { %v4881_v37 = vmul.f32 %v4870_v36, %v4870_v36  ;;  %v4887_v26 = vsub.f32 %v4861_v29, %v4870_v36 }
0x1a9e   : > { %v4875_v59 = vpop.xlane.xlu0 %4874 }
0x1a9f   : > { %v4879_v38 = vmul.f32 0.0078125, %v4875_v59 }
0x1aa0   : > { %v4869_v53 = vpop.xlane.xlu1 %4868 }
0x1aa1   : > { %v4883_v58 = vsub.f32 %v4879_v38, %v4881_v37  ;;  %v4871_v43 = vmul.f32 0.0078125, %v4869_v53 }
0x1aa3   : > { %v4885_v61 = vmax.f32 %v4883_v58, 0.0  ;;  %v4882_v5 = vmul.f32 %v4871_v43, %v4871_v43  ;;  %v4888_v13 = vsub.f32 %v4862_v51, %v4871_v43 }
0x1aa4   : > { %v4878_v44 = vpop.xlane.xlu1 %4877 }
0x1aa5   : > { %v4889_v63 = vadd.f32 1e-05, %v4885_v61  ;;  %v4880_v45 = vmul.f32 0.0078125, %v4878_v44 }
0x1aa6   : > { %v4912_v60 = vpop.permute.xlu0 %4911 }
0x1aa7   : > { %6426 = vrsqrt.f32 %v4889_v63  ;;  %v4884_v7 = vsub.f32 %v4880_v45, %v4882_v5 }
0x1aa8   : > { %v4917_v56 = vpop.permute.xlu1 %4916 }
0x1aa9   : > { %v4886_v41 = vmax.f32 %v4884_v7, 0.0 }
0x1aab   : > { %v4890_v1 = vadd.f32 1e-05, %v4886_v41 }
0x1aad   : > { %6428 = vrsqrt.f32 %v4890_v1 }
0x1aae   : > { %6430 = vrcp.f32 %v4941_v39 }
0x1ab4   : > { %v6427_v15 = vpop.eup %6426 }
0x1ab5   : > { %v4893_v47 = vmul.f32 %v6427_v15, %v4887_v26 }
0x1ab7   : > { %v4899_v25 = vmul.f32 %v5444_v31, %v4893_v47 }
0x1ab9   : > { %v4905_v49 = vadd.f32 %v5445_v42, %v4899_v25 }
0x1aba   : > { %v6429_v19 = vpop.eup %6428 }
0x1abb   : > { %v4894_v48 = vmul.f32 %v6429_v19, %v4888_v13  ;;  %v4919_v40 = vmul.f32 %v4912_v60, %v4905_v49  ;;  %v6431_v20 = vpop.eup %6430 }
0x1abd   : > { %v4900_v50 = vmul.f32 %v5444_v31, %v4894_v48 }
0x1abf   : > { %v4906_v54 = vadd.f32 %v5445_v42, %v4900_v50 }
0x1ac1   : > { %v4920_v55 = vmul.f32 %v4917_v56, %v4906_v54 }
0x1ac3   : > { %v4921_v6 = vsel %vm3197_vm15, %v4920_v55, 0.0 }
0x1ac4   : > { %v4922_v9 = vadd.f32 %v4921_v6, %v4919_v40 }
0x1ac6   : > { %v4923_v62 = vrot.slane %v4922_v9, 4 }
0x1ac8   : > { %v4924_v0 = vadd.f32 %v4923_v62, %v4922_v9 }
0x1aca   : > { %v4925_v22 = vrot.slane %v4924_v0, 2 }
0x1acc   : > { %v4926_v14 = vadd.f32 %v4925_v22, %v4924_v0 }
0x1ace   : > { %v4927_v30 = vrot.slane %v4926_v14, 1 }
0x1ad0   : > { %v4928_v16 = vadd.f32 %v4927_v30, %v4926_v14 }
0x1ad2   : > { %v4943_v32 = vmul.f32 %v6431_v20, %v4928_v16 }
0x1ad4   : > { %v4944_v23 = vpack.c.bf16 %v4943_v32, %v4943_v32 }
0x1ad6   : > { %5962 = vmatmul.mubr.bf16.vlgmr.msra.gmra.mxu0 %v4944_v23 }
0x1b96   : > { %v4979_v33 = vpop.f32.mrf.mxu0 }
0x1b97   : > { %v5446_v46 = vmul.f32 -1.442695, %v4979_v33 }
0x1b98   : > { %v5963_v17 = vpop.f32.mrf.mxu0 }
0x1b99   : > { %6432 = vpow2.f32 %v5446_v46 }
0x1b9a   : > { %v4982_v24 = vpop.f32.mrf.mxu0 }
0x1b9c   : > { %v5964_v27 = vpop.f32.mrf.mxu0 }
0x1ba6   : > { %v6433_v28 = vpop.eup %6432 }
0x1ba7   : > { %v4988_v8 = vadd.f32 1.0, %v6433_v28 }
0x1ba9   : > { %6434 = vrcp.f32 %v4988_v8 }
0x1bb6   : > { %v6435_v10 = vpop.eup %6434 }
0x1bb7   : > { %4991 = vst [vmem:[%s1236_s0] sm:$0x1] %v6435_v10 }
0x1bb8   : > { %6816 = shalt.err (!%p6813_p10)
}
0x1bb9   : > { %s6817_s18 = scalar_lea.hbm %s8112_s1, 16  ;;  %s6821_s12 = scalar_lea.hbm %s8262_s28, 32 }
0x1bba   : > { %p6818_p2 = scmp.ne.s32.totalorder %s8112_s1, %s6817_s18  ;;  %p6822_p8 = scmp.lt.s32.totalorder %s8112_s1, %s8262_s28 }
0x1bbb   : > { %p6823_p13 = scmp.lt.s32.totalorder %s6821_s12, %s6817_s18 }
0x1bbc   : > { %p6819_p4 = pnand %p6818_p2, %p8263_p3 }
0x1bbd   : > { %p6824_p6 = por %p6823_p13, %p6822_p8 }
0x1bbe   : > { %p6820_p5 = pneg %p6819_p4 }
0x1bc0   : > { %p6825_p1 = pnand %p6824_p6, %p6820_p5 }
0x1bc2   : > { %6828 = shalt.err (!%p6825_p1)
}
0x1bc3   : > { %6021 = dma.vmem_to_hbm [thread:$0]  (%p8263_p3), %s5006_s23, 16, %s8112_s1, %s4993_s4  }
0x1bc4 PF: > { %s5017_s9 = sand.u32 1, %s6883_s7   ;;  %p8264_p7 = scmp.ne.s32.totalorder %s8223_s2, 0 }
0x1bc5   : > { %p8265_p9 = scmp.ge.s32.totalorder %s6895_s15, 2  ;;  %s5018_s5 = scalar_lea.sflag [#allocation6], %s5017_s9 }
0x1bc7   : > { %p6068_p11 = pnand %p8265_p9, %p8264_p7 }
0x1bc9   : > { %p6069_p12 = pneg %p6068_p11 }
0x1bcb   : > { %6878 = dma.done.wait (%p6069_p12), %s5018_s5, 16  }
0x1bcc   : > { %6880 = vsyncadd (%p6069_p12), %s5018_s5, 4294967280  ;;  %p87_p0 = scmp.ge.s32.totalorder %s7261_s3, 4   ;;  %s8266_s7 = smov %s6887_s10 }
0x1bcd   : > { %s8267_s10 = smov %s6891_s11  ;;  %s8268_s11 = smov %s7273_s16 }
0x1bce   : > { %s8269_s15 = smov %s7261_s3  ;;  %89 = sbr.rel (!%p87_p0) target bundleno = 77 (0x4d), region = 291 }
0x1bd3   :  { %5022 = vsyncpa [#allocation5], 1 }
0x1bd4   :  { %5024 = vsyncpa [#allocation5 + $0x1], 1 }
0x1bd5   :  { %5025 = vsyncpa [#allocation8], 1 }
0x1bd6   :  { %5026 = vsyncpa [#allocation11], 1 }
0x1bd7   :  { %5027 = vsyncpa [#allocation14], 1 }
0x1bd8   :  { %5028 = vsyncpa [#allocation17], 1 }
0x1bd9   :  { %5029 = vsyncpa [#allocation20], 1 }
0x1bda   :  { %5030 = vsyncpa [#allocation23], 1 }
0x1bdb   :  { %5031 = vsyncpa [#allocation26], 1 }
0x1bdc   :  { %5032 = vsyncpa [#allocation6], 1 }
0x1bdd   :  { %5034 = vsyncpa [#allocation6 + $0x1], 1 }

</bundles_post_ra>
